<compile_context>
chip_gen: v7x
topology: tpu7x:2x2x1
jax: 0.10.0
libtpu: 0.0.40
codegen_flags: <defaults>
</compile_context>

<pallas_src>
import functools

import jax
import jax.numpy as jnp
from jax import lax
from jax.experimental import pallas as pl
from jax.experimental.pallas import tpu as pltpu

_EPS = 1e-8          # torch.nn.CosineSimilarity default eps
_EPS2 = _EPS * _EPS  # rsqrt(max(sumsq, eps^2)) == 1 / max(norm, eps) per norm
_OUT_LANES = 128     # lane-dense scalar output slab (col 0 holds the loss)


# --------------------------------------------------------------------------
# small in-kernel helpers
# --------------------------------------------------------------------------
def _cos_stacks(a, b, dim):
    """Cosine similarity of two (dim+1, L) lane-dense stacks.

    Rows 0..dim-1 are the vector components, row `dim` is the squared norm
    (fused into the gather matmul). rsqrt runs on the EUP slot.
    """
    num = a[0:1, :] * b[0:1, :]
    for k in range(1, dim):
        num = num + a[k:k + 1, :] * b[k:k + 1, :]
    inv = lax.rsqrt(jnp.maximum(a[dim:dim + 1, :], _EPS2)) * \
        lax.rsqrt(jnp.maximum(b[dim:dim + 1, :], _EPS2))
    return num * inv                                       # (1, L)


def _cos_rows(a, b, dim):
    """Cosine similarity of two (L, dim+1) row stacks (col dim = ||.||^2)."""
    num = a[:, 0:1] * b[:, 0:1]
    for k in range(1, dim):
        num = num + a[:, k:k + 1] * b[:, k:k + 1]
    inv = lax.rsqrt(jnp.maximum(a[:, dim:dim + 1], _EPS2)) * \
        lax.rsqrt(jnp.maximum(b[:, dim:dim + 1], _EPS2))
    return num * inv                                       # (L, 1)


# --------------------------------------------------------------------------
# kernel
# --------------------------------------------------------------------------
def _normal_loss_kernel(pp_ref, pnt_ref, pnr_ref, gpt_ref, gnr_ref, gnt_ref,
                        out_ref, rmin_ref, best_ref, acc2_ref,
                        *, m_total, unroll):
    # pp_ref  : (Bt, N, D+2)  predicted points augmented [p, 1, ||p||^2]
    # pnt_ref : (Bt, D+1, N)  predicted normals + sq-norm, lane-dense
    # pnr_ref : (Bt, N, D+1)  predicted normals + sq-norm, row-oriented
    # gpt_ref : (Bt, D+2, Mc) gt points augmented [-2g, ||g||^2, 1] (chunked)
    # gnr_ref : (Bt, Mc, D+1) gt normals + sq-norm, row-oriented (chunked)
    # gnt_ref : (Bt, D+1, Mc) gt normals + sq-norm, lane-dense (chunked)
    bt, n, _ = pp_ref.shape
    dim = pnt_ref.shape[1] - 1
    mc = gpt_ref.shape[2]

    j = pl.program_id(1)
    last_j = pl.num_programs(1) - 1

    @pl.when(j == 0)
    def _init():
        rmin_ref[...] = jnp.full_like(rmin_ref, jnp.inf)
        best_ref[...] = jnp.zeros_like(best_ref)
        acc2_ref[...] = jnp.zeros_like(acc2_ref)

    iota_n = lax.broadcasted_iota(jnp.int32, (n, 1), 0)     # (N, 1)
    iota_m = lax.broadcasted_iota(jnp.int32, (1, mc), 1)    # (1, Mc)

    def chunk_body(b, carry):
        # Full squared-distance matrix straight off the MXU (K = D+2).
        d2 = jnp.dot(pp_ref[b], gpt_ref[b],
                     preferred_element_type=jnp.float32)    # (N, Mc)

        # ---- per-gt direction: column argmin over N is complete in-chunk ----
        min_col = jnp.min(d2, axis=0, keepdims=True)                    # (1, Mc)
        pred_idx = jnp.min(jnp.where(d2 == min_col, iota_n, n),
                           axis=0, keepdims=True)                       # (1, Mc)
        onehot_pred = (iota_n == pred_idx).astype(jnp.float32)          # (N, Mc)
        npn = lax.dot_general(pnt_ref[b], onehot_pred,
                              (((1,), (0,)), ((), ())),
                              preferred_element_type=jnp.float32)       # (D+1, Mc)
        cos2 = _cos_stacks(gnt_ref[b], npn, dim)                        # (1, Mc)
        acc2_ref[b] = acc2_ref[b] + jnp.sum(cos2)

        # ---- per-predicted direction: row argmin carried across M chunks ----
        min_row = jnp.min(d2, axis=1, keepdims=True)                    # (N, 1)
        gt_idx = jnp.min(jnp.where(d2 == min_row, iota_m, mc),
                         axis=1, keepdims=True)                         # (N, 1)
        onehot_gt = (iota_m == gt_idx).astype(jnp.float32)              # (N, Mc)
        cand = lax.dot_general(onehot_gt, gnr_ref[b],
                               (((1,), (0,)), ((), ())),
                               preferred_element_type=jnp.float32)      # (N, D+1)
        better = min_row < rmin_ref[b]          # strict '<': earlier chunk wins ties
        rmin_ref[b] = jnp.where(better, min_row, rmin_ref[b])
        best_ref[b] = jnp.where(better, cand, best_ref[b])
        return carry

    def finalize_body(b, carry):
        cos1 = _cos_rows(pnr_ref[b], best_ref[b], dim)                  # (N, 1)
        # acc2_ref[b] holds the dist2 sum broadcast across all lanes.
        loss_row = -(jnp.sum(cos1) * (1.0 / n)
                     + acc2_ref[b] * (1.0 / m_total))                   # (1, 128)
        out_ref[0, pl.ds(b, 1), :] = loss_row.astype(out_ref.dtype)
        return carry

    def _run(body):
        # fori_loop bounds live ranges per batch element (unroll only if tiny).
        if bt == 1:
            body(0, 0)
        elif unroll:
            lax.fori_loop(0, bt, body, 0, unroll=True)
        else:
            lax.fori_loop(0, bt, body, 0)

    _run(chunk_body)

    @pl.when(j == last_j)
    def _fin():
        _run(finalize_body)


# --------------------------------------------------------------------------
# tiling policy (generation aware)
# --------------------------------------------------------------------------
def _vmem_capacity_bytes():
    try:
        info = pltpu.get_tpu_info()
        cap = getattr(info, "vmem_capacity_bytes", None)
        if cap:
            return int(cap)
    except Exception:
        pass
    # Conservative fallback: assume the smallest (v7x-like) VMEM.
    return 64 * (1 << 20)


def _chunk_footprint_bytes(n, mc):
    # ~5 live (N, Mc) f32 temporaries + row-oriented (N, *) tiles padded to
    # 128 lanes (pp_aug, pn_rows, best, rmin, cos1) + a few (Mc, *) tiles.
    return 5 * n * mc * 4 + 6 * n * 128 * 4 + 3 * mc * 128 * 4


def _select_tiling(b, n, m, batch_tile=None, m_chunk=None):
    cap = _vmem_capacity_bytes()
    two_tc = cap <= 80 * (1 << 20)                   # v7x-style: 64 MiB, 2 TCs
    vmem_limit = (48 if two_tc else 96) * (1 << 20)  # leave headroom on v7x
    budget = int(vmem_limit * 0.55)

    # ---- M chunk size (last dim of chunked blocks: multiple of 128 or == M) --
    if m_chunk is not None:
        assert m % m_chunk == 0, "m_chunk must divide M"
        assert m_chunk == m or m_chunk % 128 == 0, \
            "m_chunk must be a multiple of 128 (or equal to M)"
        mc = m_chunk
    elif _chunk_footprint_bytes(n, m) <= budget:
        mc = m
    else:
        mc = None
        for cand in range(128, m, 128):
            if m % cand == 0 and _chunk_footprint_bytes(n, cand) <= budget:
                mc = cand
        if mc is None:
            # TODO(synk): pad M to a multiple of 128 (and tile N for very
            # large N) when no aligned divisor fits the VMEM budget.
            mc = 128 if m % 128 == 0 else m

    # ---- batch tile --------------------------------------------------------
    if batch_tile is not None:
        assert b % batch_tile == 0, "batch_tile must divide B"
        bt = batch_tile
    else:
        bt = 1
        for cand in range(1, b + 1):
            if b % cand:
                continue
            steps = b // cand
            if two_tc and b >= 2:
                # keep >= 2 (and even, when possible) batch steps so both
                # TensorCores get equal work under ("parallel", ...)
                if steps < 2:
                    continue
                if b % 2 == 0 and steps % 2 != 0:
                    continue
            if cand * _chunk_footprint_bytes(n, mc) <= budget:
                bt = cand
    return bt, mc, vmem_limit


# --------------------------------------------------------------------------
# wrapper
# --------------------------------------------------------------------------
@functools.partial(jax.jit, static_argnames=("batch_tile", "m_chunk"))
def normal_loss(pred_points, pred_normals, gt_points, gt_normals,
                *, batch_tile=None, m_chunk=None):
    pred_points = pred_points.astype(jnp.float32)
    pred_normals = pred_normals.astype(jnp.float32)
    gt_points = gt_points.astype(jnp.float32)
    gt_normals = gt_normals.astype(jnp.float32)

    b, n, dim = pred_points.shape
    _, m, _ = gt_points.shape

    bt, mc, vmem_limit = _select_tiling(b, n, m, batch_tile, m_chunk)
    nbt = b // bt
    n_chunks = m // mc

    # ---- layout / augmentation plumbing (outside the kernel) ----------------
    pp_sq = jnp.sum(pred_points * pred_points, axis=-1, keepdims=True)
    pp_aug = jnp.concatenate(
        [pred_points, jnp.ones_like(pp_sq), pp_sq], axis=-1)            # (B,N,D+2)

    gp_sq = jnp.sum(gt_points * gt_points, axis=-1, keepdims=True)
    gp_aug_t = jnp.transpose(
        jnp.concatenate([-2.0 * gt_points, gp_sq, jnp.ones_like(gp_sq)], axis=-1),
        (0, 2, 1))                                                      # (B,D+2,M)

    pn_sq = jnp.sum(pred_normals * pred_normals, axis=-1, keepdims=True)
    pn_rows = jnp.concatenate([pred_normals, pn_sq], axis=-1)           # (B,N,D+1)
    pn_cols = jnp.transpose(pn_rows, (0, 2, 1))                         # (B,D+1,N)

    gn_sq = jnp.sum(gt_normals * gt_normals, axis=-1, keepdims=True)
    gn_rows = jnp.concatenate([gt_normals, gn_sq], axis=-1)             # (B,M,D+1)
    gn_cols = jnp.transpose(gn_rows, (0, 2, 1))                         # (B,D+1,M)

    unroll = (n * mc) <= 64 * 1024

    kernel = functools.partial(_normal_loss_kernel, m_total=m, unroll=unroll)

    flops = b * (2 * (dim + 2) * n * m + 4 * (dim + 1) * n * m + 12 * n * m)
    bytes_accessed = sum(int(x.size) * 4 for x in
                         (pp_aug, gp_aug_t, pn_rows, pn_cols, gn_rows, gn_cols))
    bytes_accessed += nbt * bt * _OUT_LANES * 4
    cost = pl.CostEstimate(flops=int(flops),
                           transcendentals=int(2 * b * (n + m)),
                           bytes_accessed=int(bytes_accessed))

    out = pl.pallas_call(
        kernel,
        out_shape=jax.ShapeDtypeStruct((nbt, bt, _OUT_LANES), jnp.float32),
        grid_spec=pltpu.PrefetchScalarGridSpec(
            num_scalar_prefetch=0,
            grid=(nbt, n_chunks),
            in_specs=[
                pl.BlockSpec((bt, n, dim + 2), lambda i, j: (i, 0, 0)),   # pp_aug
                pl.BlockSpec((bt, dim + 1, n), lambda i, j: (i, 0, 0)),   # pn_cols
                pl.BlockSpec((bt, n, dim + 1), lambda i, j: (i, 0, 0)),   # pn_rows
                pl.BlockSpec((bt, dim + 2, mc), lambda i, j: (i, 0, j)),  # gp_aug_t
                pl.BlockSpec((bt, mc, dim + 1), lambda i, j: (i, j, 0)),  # gn_rows
                pl.BlockSpec((bt, dim + 1, mc), lambda i, j: (i, 0, j)),  # gn_cols
            ],
            out_specs=pl.BlockSpec((1, bt, _OUT_LANES), lambda i, j: (i, 0, 0)),
            scratch_shapes=[
                pltpu.VMEM((bt, n, 1), jnp.float32),            # running row-min
                pltpu.VMEM((bt, n, dim + 1), jnp.float32),      # best gathered gn
                pltpu.VMEM((bt, 1, _OUT_LANES), jnp.float32),   # dist2 accumulator
            ],
        ),
        compiler_params=pltpu.CompilerParams(
            dimension_semantics=("parallel", "arbitrary"),
            vmem_limit_bytes=vmem_limit),
        cost_estimate=cost,
    )(pp_aug, pn_cols, pn_rows, gp_aug_t, gn_rows, gn_cols)

    return out.reshape(b, _OUT_LANES)[:, 0]


# --------------------------------------------------------------------------
# pure-JAX reference mirroring the PyTorch module
# --------------------------------------------------------------------------
def _normal_loss_ref(pp_b, pn_b, gp_b, gn_b):
    def one(pp, pn, gp, gn):
        diff = pp[:, None, :] - gp[None, :, :]
        dist = jnp.sqrt(jnp.maximum(jnp.sum(diff * diff, axis=-1), 0.0))
        gt_idx = jnp.argmin(dist, axis=1)
        pred_idx = jnp.argmin(dist, axis=0)
        ngn = gn[gt_idx]
        npn = pn[pred_idx]

        def cos(a, b):
            num = jnp.sum(a * b, axis=-1)
            na = jnp.maximum(jnp.linalg.norm(a, axis=-1), _EPS)
            nb = jnp.maximum(jnp.linalg.norm(b, axis=-1), _EPS)
            return num / (na * nb)

        return -(jnp.mean(cos(pn, ngn)) + jnp.mean(cos(gn, npn)))

    return jax.vmap(one)(pp_b, pn_b, gp_b, gn_b)


def _make_inputs(key, b, n, m, d):
    k1, k2, k3, k4 = jax.random.split(key, 4)
    pp = jax.random.normal(k1, (b, n, d), jnp.float32)
    gp = jax.random.normal(k3, (b, m, d), jnp.float32)

    def unit(v):
        return v / jnp.linalg.norm(v, axis=-1, keepdims=True)

    pn = unit(jax.random.normal(k2, (b, n, d), jnp.float32))
    gn = unit(jax.random.normal(k4, (b, m, d), jnp.float32))
    return pp, pn, gp, gn


if __name__ == "__main__":
    # 1) Small demo shapes (single M chunk; batch tile chosen per generation).
    B, N, M, D = 8, 64, 48, 3
    pp, pn, gp, gn = _make_inputs(jax.random.PRNGKey(0), B, N, M, D)
    out = jax.block_until_ready(normal_loss(pp, pn, gp, gn))
    ref = _normal_loss_ref(pp, pn, gp, gn)
    assert out.shape == (B,), out.shape
    assert jnp.allclose(out, ref, atol=1e-5, rtol=1e-5), (out, ref)

    # 2) Exercise the M-chunked online-argmin path (2 M chunks, 2 batch tiles).
    B2, N2, M2 = 4, 64, 256
    pp2, pn2, gp2, gn2 = _make_inputs(jax.random.PRNGKey(1), B2, N2, M2, D)
    out2 = jax.block_until_ready(
        normal_loss(pp2, pn2, gp2, gn2, batch_tile=2, m_chunk=128))
    ref2 = _normal_loss_ref(pp2, pn2, gp2, gn2)
    assert out2.shape == (B2,), out2.shape
    assert jnp.allclose(out2, ref2, atol=1e-5, rtol=1e-5), (out2, ref2)

    print("KERNEL_OK")
</pallas_src>

<mosaic_0001>
module attributes {stable_mosaic.version = 11 : i64} {
  func.func @_normal_loss_kernel(%arg0: i32, %arg1: i32, %arg2: memref<4x64x5xf32, #tpu.memory_space<vmem>>, %arg3: memref<4x4x64xf32, #tpu.memory_space<vmem>>, %arg4: memref<4x64x4xf32, #tpu.memory_space<vmem>>, %arg5: memref<4x5x48xf32, #tpu.memory_space<vmem>>, %arg6: memref<4x48x4xf32, #tpu.memory_space<vmem>>, %arg7: memref<4x4x48xf32, #tpu.memory_space<vmem>>, %arg8: memref<1x4x128xf32, #tpu.memory_space<vmem>>, %arg9: memref<4x64x1xf32, #tpu.memory_space<vmem>>, %arg10: memref<4x64x4xf32, #tpu.memory_space<vmem>>, %arg11: memref<4x1x128xf32, #tpu.memory_space<vmem>>) attributes {dimension_semantics = [#tpu.dimension_semantics<parallel>, #tpu.dimension_semantics<arbitrary>], iteration_bounds = array<i64: 2, 1>, scalar_prefetch = 0 : i64, scratch_operands = 3 : i64, tpu.core_type = #tpu.core_type<tc>, window_params = [{transform_indices = @transform_0, window_bounds = array<i64: 4, 64, 5>}, {transform_indices = @transform_1, window_bounds = array<i64: 4, 4, 64>}, {transform_indices = @transform_2, window_bounds = array<i64: 4, 64, 4>}, {transform_indices = @transform_3, window_bounds = array<i64: 4, 5, 48>}, {transform_indices = @transform_4, window_bounds = array<i64: 4, 48, 4>}, {transform_indices = @transform_5, window_bounds = array<i64: 4, 4, 48>}, {transform_indices = @transform_6, window_bounds = array<i64: 1, 4, 128>}]} {
    %c0_i32 = arith.constant 0 : i32
    %0 = arith.cmpi eq, %arg1, %c0_i32 : i32
    %1 = arith.extui %0 : i1 to i32
    %c0_i32_0 = arith.constant 0 : i32
    %2 = arith.cmpi ne, %1, %c0_i32_0 : i32
    scf.if %2 {
      %cst_144 = arith.constant 0x7F800000 : f32
      %424 = vector.broadcast %cst_144 : f32 to vector<4x64x1xf32>
      %c0_145 = arith.constant 0 : index
      %c0_146 = arith.constant 0 : index
      %c0_147 = arith.constant 0 : index
      %425 = vector.load %arg9[%c0_145, %c0_146, %c0_147] : memref<4x64x1xf32, #tpu.memory_space<vmem>>, vector<4x64x1xf32>
      tpu.vector_store %arg9[%c0_145, %c0_146, %c0_147], %424 {strides = array<i32>} : memref<4x64x1xf32, #tpu.memory_space<vmem>>, vector<4x64x1xf32>,
      %cst_148 = arith.constant 0.000000e+00 : f32
      %426 = vector.broadcast %cst_148 : f32 to vector<4x64x4xf32>
      %c0_149 = arith.constant 0 : index
      %c0_150 = arith.constant 0 : index
      %c0_151 = arith.constant 0 : index
      %427 = vector.load %arg10[%c0_149, %c0_150, %c0_151] : memref<4x64x4xf32, #tpu.memory_space<vmem>>, vector<4x64x4xf32>
      tpu.vector_store %arg10[%c0_149, %c0_150, %c0_151], %426 {strides = array<i32>} : memref<4x64x4xf32, #tpu.memory_space<vmem>>, vector<4x64x4xf32>,
      %cst_152 = arith.constant 0.000000e+00 : f32
      %428 = vector.broadcast %cst_152 : f32 to vector<4x1x128xf32>
      %c0_153 = arith.constant 0 : index
      %c0_154 = arith.constant 0 : index
      %c0_155 = arith.constant 0 : index
      %429 = vector.load %arg11[%c0_153, %c0_154, %c0_155] : memref<4x1x128xf32, #tpu.memory_space<vmem>>, vector<4x1x128xf32>
      tpu.vector_store %arg11[%c0_153, %c0_154, %c0_155], %428 {strides = array<i32>} : memref<4x1x128xf32, #tpu.memory_space<vmem>>, vector<4x1x128xf32>,
    } else {
    }
    %3 = tpu.iota {dimensions = array<i32: 0>} : vector<64x1xi32>
    %4 = tpu.iota {dimensions = array<i32: 1>} : vector<1x48xi32>
    %c0_i32_1 = arith.constant 0 : i32
    %5 = arith.index_cast %c0_i32_1 : i32 to index
    %c0 = arith.constant 0 : index
    %c0_2 = arith.constant 0 : index
    %6 = vector.load %arg2[%5, %c0, %c0_2] : memref<4x64x5xf32, #tpu.memory_space<vmem>>, vector<1x64x5xf32>
    %7 = vector.shape_cast %6 : vector<1x64x5xf32> to vector<64x5xf32>
    %8 = arith.index_cast %c0_i32_1 : i32 to index
    %c0_3 = arith.constant 0 : index
    %c0_4 = arith.constant 0 : index
    %9 = vector.load %arg5[%8, %c0_3, %c0_4] : memref<4x5x48xf32, #tpu.memory_space<vmem>>, vector<1x5x48xf32>
    %10 = vector.shape_cast %9 : vector<1x5x48xf32> to vector<5x48xf32>
    %cst = arith.constant dense<0.000000e+00> : vector<64x48xf32>
    %11 = tpu.matmul %7, %10, %cst {dimension_numbers = #tpu.dot_dimension_numbers<[1], [0], [0], [1], [0, 0, 1, 1], [], []>} : vector<64x5xf32>, vector<5x48xf32>, vector<64x48xf32> -> vector<64x48xf32>
    %cst_5 = arith.constant dense<0x7F800000> : vector<48xf32>
    %12 = vector.multi_reduction <minimumf>, %11, %cst_5 [0] : vector<64x48xf32> to vector<48xf32>
    %13 = vector.shape_cast %12 : vector<48xf32> to vector<1x48xf32>
    %14 = vector.broadcast %13 : vector<1x48xf32> to vector<64x48xf32>
    %15 = arith.cmpf oeq, %11, %14 : vector<64x48xf32>
    %c64_i32 = arith.constant 64 : i32
    %16 = vector.shape_cast %3 : vector<64x1xi32> to vector<64x1xi32>
    %17 = vector.broadcast %16 : vector<64x1xi32> to vector<64x48xi32>
    %18 = vector.broadcast %c64_i32 : i32 to vector<64x48xi32>
    %19 = arith.select %15, %17, %18 : vector<64x48xi1>, vector<64x48xi32>
    %cst_6 = arith.constant dense<2147483647> : vector<48xi32>
    %20 = vector.multi_reduction <minsi>, %19, %cst_6 [0] : vector<64x48xi32> to vector<48xi32>
    %21 = vector.shape_cast %20 : vector<48xi32> to vector<1x48xi32>
    %22 = vector.broadcast %3 : vector<64x1xi32> to vector<64x48xi32>
    %23 = vector.broadcast %21 : vector<1x48xi32> to vector<64x48xi32>
    %24 = arith.cmpi eq, %22, %23 : vector<64x48xi32>
    %25 = arith.extui %24 : vector<64x48xi1> to vector<64x48xi32>
    %26 = arith.sitofp %25 : vector<64x48xi32> to vector<64x48xf32>
    %27 = arith.index_cast %c0_i32_1 : i32 to index
    %c0_7 = arith.constant 0 : index
    %c0_8 = arith.constant 0 : index
    %28 = vector.load %arg3[%27, %c0_7, %c0_8] : memref<4x4x64xf32, #tpu.memory_space<vmem>>, vector<1x4x64xf32>
    %29 = vector.shape_cast %28 : vector<1x4x64xf32> to vector<4x64xf32>
    %cst_9 = arith.constant dense<0.000000e+00> : vector<4x48xf32>
    %30 = tpu.matmul %29, %26, %cst_9 {dimension_numbers = #tpu.dot_dimension_numbers<[1], [0], [0], [1], [0, 0, 1, 1], [], []>} : vector<4x64xf32>, vector<64x48xf32>, vector<4x48xf32> -> vector<4x48xf32>
    %31 = arith.index_cast %c0_i32_1 : i32 to index
    %c0_10 = arith.constant 0 : index
    %c0_11 = arith.constant 0 : index
    %32 = vector.load %arg7[%31, %c0_10, %c0_11] : memref<4x4x48xf32, #tpu.memory_space<vmem>>, vector<1x4x48xf32>
    %33 = vector.shape_cast %32 : vector<1x4x48xf32> to vector<4x48xf32>
    %34 = vector.extract_strided_slice %33 {offsets = [0, 0], sizes = [1, 48], strides = [1, 1]} : vector<4x48xf32> to vector<1x48xf32>
    %35 = vector.extract_strided_slice %30 {offsets = [0, 0], sizes = [1, 48], strides = [1, 1]} : vector<4x48xf32> to vector<1x48xf32>
    %36 = arith.mulf %34, %35 : vector<1x48xf32>
    %37 = vector.extract_strided_slice %33 {offsets = [1, 0], sizes = [1, 48], strides = [1, 1]} : vector<4x48xf32> to vector<1x48xf32>
    %38 = vector.extract_strided_slice %30 {offsets = [1, 0], sizes = [1, 48], strides = [1, 1]} : vector<4x48xf32> to vector<1x48xf32>
    %39 = arith.mulf %37, %38 : vector<1x48xf32>
    %40 = arith.addf %36, %39 : vector<1x48xf32>
    %41 = vector.extract_strided_slice %33 {offsets = [2, 0], sizes = [1, 48], strides = [1, 1]} : vector<4x48xf32> to vector<1x48xf32>
    %42 = vector.extract_strided_slice %30 {offsets = [2, 0], sizes = [1, 48], strides = [1, 1]} : vector<4x48xf32> to vector<1x48xf32>
    %43 = arith.mulf %41, %42 : vector<1x48xf32>
    %44 = arith.addf %40, %43 : vector<1x48xf32>
    %45 = vector.extract_strided_slice %33 {offsets = [3, 0], sizes = [1, 48], strides = [1, 1]} : vector<4x48xf32> to vector<1x48xf32>
    %cst_12 = arith.constant 1.000000e-16 : f32
    %46 = vector.broadcast %cst_12 : f32 to vector<1x48xf32>
    %47 = arith.maximumf %45, %46 : vector<1x48xf32>
    %48 = math.rsqrt %47 : vector<1x48xf32>
    %49 = vector.extract_strided_slice %30 {offsets = [3, 0], sizes = [1, 48], strides = [1, 1]} : vector<4x48xf32> to vector<1x48xf32>
    %cst_13 = arith.constant 1.000000e-16 : f32
    %50 = vector.broadcast %cst_13 : f32 to vector<1x48xf32>
    %51 = arith.maximumf %49, %50 : vector<1x48xf32>
    %52 = math.rsqrt %51 : vector<1x48xf32>
    %53 = arith.mulf %48, %52 : vector<1x48xf32>
    %54 = arith.mulf %44, %53 : vector<1x48xf32>
    %55 = arith.index_cast %c0_i32_1 : i32 to index
    %c0_14 = arith.constant 0 : index
    %c0_15 = arith.constant 0 : index
    %56 = vector.load %arg11[%55, %c0_14, %c0_15] : memref<4x1x128xf32, #tpu.memory_space<vmem>>, vector<1x1x128xf32>
    %57 = vector.shape_cast %56 : vector<1x1x128xf32> to vector<1x128xf32>
    %58 = vector.shape_cast %54 : vector<1x48xf32> to vector<1x1x48xf32>
    %cst_16 = arith.constant dense<0.000000e+00> : vector<1xf32>
    %59 = vector.multi_reduction <add>, %58, %cst_16 [1, 2] : vector<1x1x48xf32> to vector<1xf32>
    %60 = vector.shape_cast %59 : vector<1xf32> to vector<1x1x1xf32>
    %61 = vector.extract %60[0, 0, 0] : f32 from vector<1x1x1xf32>
    %62 = vector.broadcast %61 : f32 to vector<1x128xf32>
    %63 = arith.addf %57, %62 : vector<1x128xf32>
    %64 = arith.index_cast %c0_i32_1 : i32 to index
    %c0_17 = arith.constant 0 : index
    %c0_18 = arith.constant 0 : index
    %65 = vector.load %arg11[%64, %c0_17, %c0_18] : memref<4x1x128xf32, #tpu.memory_space<vmem>>, vector<1x1x128xf32>
    %66 = vector.shape_cast %65 : vector<1x1x128xf32> to vector<1x128xf32>
    %67 = vector.shape_cast %63 : vector<1x128xf32> to vector<1x1x128xf32>
    tpu.vector_store %arg11[%64, %c0_17, %c0_18], %67 {strides = array<i32>} : memref<4x1x128xf32, #tpu.memory_space<vmem>>, vector<1x1x128xf32>,
    %cst_19 = arith.constant dense<0x7F800000> : vector<64xf32>
    %68 = vector.multi_reduction <minimumf>, %11, %cst_19 [1] : vector<64x48xf32> to vector<64xf32>
    %69 = vector.shape_cast %68 : vector<64xf32> to vector<64x1xf32>
    %70 = vector.broadcast %69 : vector<64x1xf32> to vector<64x48xf32>
    %71 = arith.cmpf oeq, %11, %70 : vector<64x48xf32>
    %c48_i32 = arith.constant 48 : i32
    %72 = vector.shape_cast %4 : vector<1x48xi32> to vector<1x48xi32>
    %73 = vector.broadcast %72 : vector<1x48xi32> to vector<64x48xi32>
    %74 = vector.broadcast %c48_i32 : i32 to vector<64x48xi32>
    %75 = arith.select %71, %73, %74 : vector<64x48xi1>, vector<64x48xi32>
    %cst_20 = arith.constant dense<2147483647> : vector<64xi32>
    %76 = vector.multi_reduction <minsi>, %75, %cst_20 [1] : vector<64x48xi32> to vector<64xi32>
    %77 = vector.shape_cast %76 : vector<64xi32> to vector<64x1xi32>
    %78 = vector.broadcast %4 : vector<1x48xi32> to vector<64x48xi32>
    %79 = vector.broadcast %77 : vector<64x1xi32> to vector<64x48xi32>
    %80 = arith.cmpi eq, %78, %79 : vector<64x48xi32>
    %81 = arith.extui %80 : vector<64x48xi1> to vector<64x48xi32>
    %82 = arith.sitofp %81 : vector<64x48xi32> to vector<64x48xf32>
    %83 = arith.index_cast %c0_i32_1 : i32 to index
    %c0_21 = arith.constant 0 : index
    %c0_22 = arith.constant 0 : index
    %84 = vector.load %arg6[%83, %c0_21, %c0_22] : memref<4x48x4xf32, #tpu.memory_space<vmem>>, vector<1x48x4xf32>
    %85 = vector.shape_cast %84 : vector<1x48x4xf32> to vector<48x4xf32>
    %cst_23 = arith.constant dense<0.000000e+00> : vector<64x4xf32>
    %86 = tpu.matmul %82, %85, %cst_23 {dimension_numbers = #tpu.dot_dimension_numbers<[1], [0], [0], [1], [0, 0, 1, 1], [], []>} : vector<64x48xf32>, vector<48x4xf32>, vector<64x4xf32> -> vector<64x4xf32>
    %87 = arith.index_cast %c0_i32_1 : i32 to index
    %c0_24 = arith.constant 0 : index
    %c0_25 = arith.constant 0 : index
    %88 = vector.load %arg9[%87, %c0_24, %c0_25] : memref<4x64x1xf32, #tpu.memory_space<vmem>>, vector<1x64x1xf32>
    %89 = vector.shape_cast %88 : vector<1x64x1xf32> to vector<64x1xf32>
    %90 = arith.cmpf olt, %69, %89 : vector<64x1xf32>
    %91 = arith.index_cast %c0_i32_1 : i32 to index
    %c0_26 = arith.constant 0 : index
    %c0_27 = arith.constant 0 : index
    %92 = vector.load %arg9[%91, %c0_26, %c0_27] : memref<4x64x1xf32, #tpu.memory_space<vmem>>, vector<1x64x1xf32>
    %93 = vector.shape_cast %92 : vector<1x64x1xf32> to vector<64x1xf32>
    %94 = arith.select %90, %69, %93 : vector<64x1xi1>, vector<64x1xf32>
    %95 = arith.index_cast %c0_i32_1 : i32 to index
    %c0_28 = arith.constant 0 : index
    %c0_29 = arith.constant 0 : index
    %96 = vector.load %arg9[%95, %c0_28, %c0_29] : memref<4x64x1xf32, #tpu.memory_space<vmem>>, vector<1x64x1xf32>
    %97 = vector.shape_cast %96 : vector<1x64x1xf32> to vector<64x1xf32>
    %98 = vector.shape_cast %94 : vector<64x1xf32> to vector<1x64x1xf32>
    tpu.vector_store %arg9[%95, %c0_28, %c0_29], %98 {strides = array<i32>} : memref<4x64x1xf32, #tpu.memory_space<vmem>>, vector<1x64x1xf32>,
    %99 = arith.index_cast %c0_i32_1 : i32 to index
    %c0_30 = arith.constant 0 : index
    %c0_31 = arith.constant 0 : index
    %100 = vector.load %arg10[%99, %c0_30, %c0_31] : memref<4x64x4xf32, #tpu.memory_space<vmem>>, vector<1x64x4xf32>
    %101 = vector.shape_cast %100 : vector<1x64x4xf32> to vector<64x4xf32>
    %102 = vector.shape_cast %90 : vector<64x1xi1> to vector<64x1xi1>
    %103 = vector.broadcast %102 : vector<64x1xi1> to vector<64x4xi1>
    %104 = arith.select %103, %86, %101 : vector<64x4xi1>, vector<64x4xf32>
    %105 = arith.index_cast %c0_i32_1 : i32 to index
    %c0_32 = arith.constant 0 : index
    %c0_33 = arith.constant 0 : index
    %106 = vector.load %arg10[%105, %c0_32, %c0_33] : memref<4x64x4xf32, #tpu.memory_space<vmem>>, vector<1x64x4xf32>
    %107 = vector.shape_cast %106 : vector<1x64x4xf32> to vector<64x4xf32>
    %108 = vector.shape_cast %104 : vector<64x4xf32> to vector<1x64x4xf32>
    tpu.vector_store %arg10[%105, %c0_32, %c0_33], %108 {strides = array<i32>} : memref<4x64x4xf32, #tpu.memory_space<vmem>>, vector<1x64x4xf32>,
    %c1_i32 = arith.constant 1 : i32
    %109 = arith.index_cast %c1_i32 : i32 to index
    %c0_34 = arith.constant 0 : index
    %c0_35 = arith.constant 0 : index
    %110 = vector.load %arg2[%109, %c0_34, %c0_35] : memref<4x64x5xf32, #tpu.memory_space<vmem>>, vector<1x64x5xf32>
    %111 = vector.shape_cast %110 : vector<1x64x5xf32> to vector<64x5xf32>
    %112 = arith.index_cast %c1_i32 : i32 to index
    %c0_36 = arith.constant 0 : index
    %c0_37 = arith.constant 0 : index
    %113 = vector.load %arg5[%112, %c0_36, %c0_37] : memref<4x5x48xf32, #tpu.memory_space<vmem>>, vector<1x5x48xf32>
    %114 = vector.shape_cast %113 : vector<1x5x48xf32> to vector<5x48xf32>
    %cst_38 = arith.constant dense<0.000000e+00> : vector<64x48xf32>
    %115 = tpu.matmul %111, %114, %cst_38 {dimension_numbers = #tpu.dot_dimension_numbers<[1], [0], [0], [1], [0, 0, 1, 1], [], []>} : vector<64x5xf32>, vector<5x48xf32>, vector<64x48xf32> -> vector<64x48xf32>
    %cst_39 = arith.constant dense<0x7F800000> : vector<48xf32>
    %116 = vector.multi_reduction <minimumf>, %115, %cst_39 [0] : vector<64x48xf32> to vector<48xf32>
    %117 = vector.shape_cast %116 : vector<48xf32> to vector<1x48xf32>
    %118 = vector.broadcast %117 : vector<1x48xf32> to vector<64x48xf32>
    %119 = arith.cmpf oeq, %115, %118 : vector<64x48xf32>
    %c64_i32_40 = arith.constant 64 : i32
    %120 = vector.shape_cast %3 : vector<64x1xi32> to vector<64x1xi32>
    %121 = vector.broadcast %120 : vector<64x1xi32> to vector<64x48xi32>
    %122 = vector.broadcast %c64_i32_40 : i32 to vector<64x48xi32>
    %123 = arith.select %119, %121, %122 : vector<64x48xi1>, vector<64x48xi32>
    %cst_41 = arith.constant dense<2147483647> : vector<48xi32>
    %124 = vector.multi_reduction <minsi>, %123, %cst_41 [0] : vector<64x48xi32> to vector<48xi32>
    %125 = vector.shape_cast %124 : vector<48xi32> to vector<1x48xi32>
    %126 = vector.broadcast %3 : vector<64x1xi32> to vector<64x48xi32>
    %127 = vector.broadcast %125 : vector<1x48xi32> to vector<64x48xi32>
    %128 = arith.cmpi eq, %126, %127 : vector<64x48xi32>
    %129 = arith.extui %128 : vector<64x48xi1> to vector<64x48xi32>
    %130 = arith.sitofp %129 : vector<64x48xi32> to vector<64x48xf32>
    %131 = arith.index_cast %c1_i32 : i32 to index
    %c0_42 = arith.constant 0 : index
    %c0_43 = arith.constant 0 : index
    %132 = vector.load %arg3[%131, %c0_42, %c0_43] : memref<4x4x64xf32, #tpu.memory_space<vmem>>, vector<1x4x64xf32>
    %133 = vector.shape_cast %132 : vector<1x4x64xf32> to vector<4x64xf32>
    %cst_44 = arith.constant dense<0.000000e+00> : vector<4x48xf32>
    %134 = tpu.matmul %133, %130, %cst_44 {dimension_numbers = #tpu.dot_dimension_numbers<[1], [0], [0], [1], [0, 0, 1, 1], [], []>} : vector<4x64xf32>, vector<64x48xf32>, vector<4x48xf32> -> vector<4x48xf32>
    %135 = arith.index_cast %c1_i32 : i32 to index
    %c0_45 = arith.constant 0 : index
    %c0_46 = arith.constant 0 : index
    %136 = vector.load %arg7[%135, %c0_45, %c0_46] : memref<4x4x48xf32, #tpu.memory_space<vmem>>, vector<1x4x48xf32>
    %137 = vector.shape_cast %136 : vector<1x4x48xf32> to vector<4x48xf32>
    %138 = vector.extract_strided_slice %137 {offsets = [0, 0], sizes = [1, 48], strides = [1, 1]} : vector<4x48xf32> to vector<1x48xf32>
    %139 = vector.extract_strided_slice %134 {offsets = [0, 0], sizes = [1, 48], strides = [1, 1]} : vector<4x48xf32> to vector<1x48xf32>
    %140 = arith.mulf %138, %139 : vector<1x48xf32>
    %141 = vector.extract_strided_slice %137 {offsets = [1, 0], sizes = [1, 48], strides = [1, 1]} : vector<4x48xf32> to vector<1x48xf32>
    %142 = vector.extract_strided_slice %134 {offsets = [1, 0], sizes = [1, 48], strides = [1, 1]} : vector<4x48xf32> to vector<1x48xf32>
    %143 = arith.mulf %141, %142 : vector<1x48xf32>
    %144 = arith.addf %140, %143 : vector<1x48xf32>
    %145 = vector.extract_strided_slice %137 {offsets = [2, 0], sizes = [1, 48], strides = [1, 1]} : vector<4x48xf32> to vector<1x48xf32>
    %146 = vector.extract_strided_slice %134 {offsets = [2, 0], sizes = [1, 48], strides = [1, 1]} : vector<4x48xf32> to vector<1x48xf32>
    %147 = arith.mulf %145, %146 : vector<1x48xf32>
    %148 = arith.addf %144, %147 : vector<1x48xf32>
    %149 = vector.extract_strided_slice %137 {offsets = [3, 0], sizes = [1, 48], strides = [1, 1]} : vector<4x48xf32> to vector<1x48xf32>
    %cst_47 = arith.constant 1.000000e-16 : f32
    %150 = vector.broadcast %cst_47 : f32 to vector<1x48xf32>
    %151 = arith.maximumf %149, %150 : vector<1x48xf32>
    %152 = math.rsqrt %151 : vector<1x48xf32>
    %153 = vector.extract_strided_slice %134 {offsets = [3, 0], sizes = [1, 48], strides = [1, 1]} : vector<4x48xf32> to vector<1x48xf32>
    %cst_48 = arith.constant 1.000000e-16 : f32
    %154 = vector.broadcast %cst_48 : f32 to vector<1x48xf32>
    %155 = arith.maximumf %153, %154 : vector<1x48xf32>
    %156 = math.rsqrt %155 : vector<1x48xf32>
    %157 = arith.mulf %152, %156 : vector<1x48xf32>
    %158 = arith.mulf %148, %157 : vector<1x48xf32>
    %159 = arith.index_cast %c1_i32 : i32 to index
    %c0_49 = arith.constant 0 : index
    %c0_50 = arith.constant 0 : index
    %160 = vector.load %arg11[%159, %c0_49, %c0_50] : memref<4x1x128xf32, #tpu.memory_space<vmem>>, vector<1x1x128xf32>
    %161 = vector.shape_cast %160 : vector<1x1x128xf32> to vector<1x128xf32>
    %162 = vector.shape_cast %158 : vector<1x48xf32> to vector<1x1x48xf32>
    %cst_51 = arith.constant dense<0.000000e+00> : vector<1xf32>
    %163 = vector.multi_reduction <add>, %162, %cst_51 [1, 2] : vector<1x1x48xf32> to vector<1xf32>
    %164 = vector.shape_cast %163 : vector<1xf32> to vector<1x1x1xf32>
    %165 = vector.extract %164[0, 0, 0] : f32 from vector<1x1x1xf32>
    %166 = vector.broadcast %165 : f32 to vector<1x128xf32>
    %167 = arith.addf %161, %166 : vector<1x128xf32>
    %168 = arith.index_cast %c1_i32 : i32 to index
    %c0_52 = arith.constant 0 : index
    %c0_53 = arith.constant 0 : index
    %169 = vector.load %arg11[%168, %c0_52, %c0_53] : memref<4x1x128xf32, #tpu.memory_space<vmem>>, vector<1x1x128xf32>
    %170 = vector.shape_cast %169 : vector<1x1x128xf32> to vector<1x128xf32>
    %171 = vector.shape_cast %167 : vector<1x128xf32> to vector<1x1x128xf32>
    tpu.vector_store %arg11[%168, %c0_52, %c0_53], %171 {strides = array<i32>} : memref<4x1x128xf32, #tpu.memory_space<vmem>>, vector<1x1x128xf32>,
    %cst_54 = arith.constant dense<0x7F800000> : vector<64xf32>
    %172 = vector.multi_reduction <minimumf>, %115, %cst_54 [1] : vector<64x48xf32> to vector<64xf32>
    %173 = vector.shape_cast %172 : vector<64xf32> to vector<64x1xf32>
    %174 = vector.broadcast %173 : vector<64x1xf32> to vector<64x48xf32>
    %175 = arith.cmpf oeq, %115, %174 : vector<64x48xf32>
    %c48_i32_55 = arith.constant 48 : i32
    %176 = vector.shape_cast %4 : vector<1x48xi32> to vector<1x48xi32>
    %177 = vector.broadcast %176 : vector<1x48xi32> to vector<64x48xi32>
    %178 = vector.broadcast %c48_i32_55 : i32 to vector<64x48xi32>
    %179 = arith.select %175, %177, %178 : vector<64x48xi1>, vector<64x48xi32>
    %cst_56 = arith.constant dense<2147483647> : vector<64xi32>
    %180 = vector.multi_reduction <minsi>, %179, %cst_56 [1] : vector<64x48xi32> to vector<64xi32>
    %181 = vector.shape_cast %180 : vector<64xi32> to vector<64x1xi32>
    %182 = vector.broadcast %4 : vector<1x48xi32> to vector<64x48xi32>
    %183 = vector.broadcast %181 : vector<64x1xi32> to vector<64x48xi32>
    %184 = arith.cmpi eq, %182, %183 : vector<64x48xi32>
    %185 = arith.extui %184 : vector<64x48xi1> to vector<64x48xi32>
    %186 = arith.sitofp %185 : vector<64x48xi32> to vector<64x48xf32>
    %187 = arith.index_cast %c1_i32 : i32 to index
    %c0_57 = arith.constant 0 : index
    %c0_58 = arith.constant 0 : index
    %188 = vector.load %arg6[%187, %c0_57, %c0_58] : memref<4x48x4xf32, #tpu.memory_space<vmem>>, vector<1x48x4xf32>
    %189 = vector.shape_cast %188 : vector<1x48x4xf32> to vector<48x4xf32>
    %cst_59 = arith.constant dense<0.000000e+00> : vector<64x4xf32>
    %190 = tpu.matmul %186, %189, %cst_59 {dimension_numbers = #tpu.dot_dimension_numbers<[1], [0], [0], [1], [0, 0, 1, 1], [], []>} : vector<64x48xf32>, vector<48x4xf32>, vector<64x4xf32> -> vector<64x4xf32>
    %191 = arith.index_cast %c1_i32 : i32 to index
    %c0_60 = arith.constant 0 : index
    %c0_61 = arith.constant 0 : index
    %192 = vector.load %arg9[%191, %c0_60, %c0_61] : memref<4x64x1xf32, #tpu.memory_space<vmem>>, vector<1x64x1xf32>
    %193 = vector.shape_cast %192 : vector<1x64x1xf32> to vector<64x1xf32>
    %194 = arith.cmpf olt, %173, %193 : vector<64x1xf32>
    %195 = arith.index_cast %c1_i32 : i32 to index
    %c0_62 = arith.constant 0 : index
    %c0_63 = arith.constant 0 : index
    %196 = vector.load %arg9[%195, %c0_62, %c0_63] : memref<4x64x1xf32, #tpu.memory_space<vmem>>, vector<1x64x1xf32>
    %197 = vector.shape_cast %196 : vector<1x64x1xf32> to vector<64x1xf32>
    %198 = arith.select %194, %173, %197 : vector<64x1xi1>, vector<64x1xf32>
    %199 = arith.index_cast %c1_i32 : i32 to index
    %c0_64 = arith.constant 0 : index
    %c0_65 = arith.constant 0 : index
    %200 = vector.load %arg9[%199, %c0_64, %c0_65] : memref<4x64x1xf32, #tpu.memory_space<vmem>>, vector<1x64x1xf32>
    %201 = vector.shape_cast %200 : vector<1x64x1xf32> to vector<64x1xf32>
    %202 = vector.shape_cast %198 : vector<64x1xf32> to vector<1x64x1xf32>
    tpu.vector_store %arg9[%199, %c0_64, %c0_65], %202 {strides = array<i32>} : memref<4x64x1xf32, #tpu.memory_space<vmem>>, vector<1x64x1xf32>,
    %203 = arith.index_cast %c1_i32 : i32 to index
    %c0_66 = arith.constant 0 : index
    %c0_67 = arith.constant 0 : index
    %204 = vector.load %arg10[%203, %c0_66, %c0_67] : memref<4x64x4xf32, #tpu.memory_space<vmem>>, vector<1x64x4xf32>
    %205 = vector.shape_cast %204 : vector<1x64x4xf32> to vector<64x4xf32>
    %206 = vector.shape_cast %194 : vector<64x1xi1> to vector<64x1xi1>
    %207 = vector.broadcast %206 : vector<64x1xi1> to vector<64x4xi1>
    %208 = arith.select %207, %190, %205 : vector<64x4xi1>, vector<64x4xf32>
    %209 = arith.index_cast %c1_i32 : i32 to index
    %c0_68 = arith.constant 0 : index
    %c0_69 = arith.constant 0 : index
    %210 = vector.load %arg10[%209, %c0_68, %c0_69] : memref<4x64x4xf32, #tpu.memory_space<vmem>>, vector<1x64x4xf32>
    %211 = vector.shape_cast %210 : vector<1x64x4xf32> to vector<64x4xf32>
    %212 = vector.shape_cast %208 : vector<64x4xf32> to vector<1x64x4xf32>
    tpu.vector_store %arg10[%209, %c0_68, %c0_69], %212 {strides = array<i32>} : memref<4x64x4xf32, #tpu.memory_space<vmem>>, vector<1x64x4xf32>,
    %c2_i32 = arith.constant 2 : i32
    %213 = arith.index_cast %c2_i32 : i32 to index
    %c0_70 = arith.constant 0 : index
    %c0_71 = arith.constant 0 : index
    %214 = vector.load %arg2[%213, %c0_70, %c0_71] : memref<4x64x5xf32, #tpu.memory_space<vmem>>, vector<1x64x5xf32>
    %215 = vector.shape_cast %214 : vector<1x64x5xf32> to vector<64x5xf32>
    %216 = arith.index_cast %c2_i32 : i32 to index
    %c0_72 = arith.constant 0 : index
    %c0_73 = arith.constant 0 : index
    %217 = vector.load %arg5[%216, %c0_72, %c0_73] : memref<4x5x48xf32, #tpu.memory_space<vmem>>, vector<1x5x48xf32>
    %218 = vector.shape_cast %217 : vector<1x5x48xf32> to vector<5x48xf32>
    %cst_74 = arith.constant dense<0.000000e+00> : vector<64x48xf32>
    %219 = tpu.matmul %215, %218, %cst_74 {dimension_numbers = #tpu.dot_dimension_numbers<[1], [0], [0], [1], [0, 0, 1, 1], [], []>} : vector<64x5xf32>, vector<5x48xf32>, vector<64x48xf32> -> vector<64x48xf32>
    %cst_75 = arith.constant dense<0x7F800000> : vector<48xf32>
    %220 = vector.multi_reduction <minimumf>, %219, %cst_75 [0] : vector<64x48xf32> to vector<48xf32>
    %221 = vector.shape_cast %220 : vector<48xf32> to vector<1x48xf32>
    %222 = vector.broadcast %221 : vector<1x48xf32> to vector<64x48xf32>
    %223 = arith.cmpf oeq, %219, %222 : vector<64x48xf32>
    %c64_i32_76 = arith.constant 64 : i32
    %224 = vector.shape_cast %3 : vector<64x1xi32> to vector<64x1xi32>
    %225 = vector.broadcast %224 : vector<64x1xi32> to vector<64x48xi32>
    %226 = vector.broadcast %c64_i32_76 : i32 to vector<64x48xi32>
    %227 = arith.select %223, %225, %226 : vector<64x48xi1>, vector<64x48xi32>
    %cst_77 = arith.constant dense<2147483647> : vector<48xi32>
    %228 = vector.multi_reduction <minsi>, %227, %cst_77 [0] : vector<64x48xi32> to vector<48xi32>
    %229 = vector.shape_cast %228 : vector<48xi32> to vector<1x48xi32>
    %230 = vector.broadcast %3 : vector<64x1xi32> to vector<64x48xi32>
    %231 = vector.broadcast %229 : vector<1x48xi32> to vector<64x48xi32>
    %232 = arith.cmpi eq, %230, %231 : vector<64x48xi32>
    %233 = arith.extui %232 : vector<64x48xi1> to vector<64x48xi32>
    %234 = arith.sitofp %233 : vector<64x48xi32> to vector<64x48xf32>
    %235 = arith.index_cast %c2_i32 : i32 to index
    %c0_78 = arith.constant 0 : index
    %c0_79 = arith.constant 0 : index
    %236 = vector.load %arg3[%235, %c0_78, %c0_79] : memref<4x4x64xf32, #tpu.memory_space<vmem>>, vector<1x4x64xf32>
    %237 = vector.shape_cast %236 : vector<1x4x64xf32> to vector<4x64xf32>
    %cst_80 = arith.constant dense<0.000000e+00> : vector<4x48xf32>
    %238 = tpu.matmul %237, %234, %cst_80 {dimension_numbers = #tpu.dot_dimension_numbers<[1], [0], [0], [1], [0, 0, 1, 1], [], []>} : vector<4x64xf32>, vector<64x48xf32>, vector<4x48xf32> -> vector<4x48xf32>
    %239 = arith.index_cast %c2_i32 : i32 to index
    %c0_81 = arith.constant 0 : index
    %c0_82 = arith.constant 0 : index
    %240 = vector.load %arg7[%239, %c0_81, %c0_82] : memref<4x4x48xf32, #tpu.memory_space<vmem>>, vector<1x4x48xf32>
    %241 = vector.shape_cast %240 : vector<1x4x48xf32> to vector<4x48xf32>
    %242 = vector.extract_strided_slice %241 {offsets = [0, 0], sizes = [1, 48], strides = [1, 1]} : vector<4x48xf32> to vector<1x48xf32>
    %243 = vector.extract_strided_slice %238 {offsets = [0, 0], sizes = [1, 48], strides = [1, 1]} : vector<4x48xf32> to vector<1x48xf32>
    %244 = arith.mulf %242, %243 : vector<1x48xf32>
    %245 = vector.extract_strided_slice %241 {offsets = [1, 0], sizes = [1, 48], strides = [1, 1]} : vector<4x48xf32> to vector<1x48xf32>
    %246 = vector.extract_strided_slice %238 {offsets = [1, 0], sizes = [1, 48], strides = [1, 1]} : vector<4x48xf32> to vector<1x48xf32>
    %247 = arith.mulf %245, %246 : vector<1x48xf32>
    %248 = arith.addf %244, %247 : vector<1x48xf32>
    %249 = vector.extract_strided_slice %241 {offsets = [2, 0], sizes = [1, 48], strides = [1, 1]} : vector<4x48xf32> to vector<1x48xf32>
    %250 = vector.extract_strided_slice %238 {offsets = [2, 0], sizes = [1, 48], strides = [1, 1]} : vector<4x48xf32> to vector<1x48xf32>
    %251 = arith.mulf %249, %250 : vector<1x48xf32>
    %252 = arith.addf %248, %251 : vector<1x48xf32>
    %253 = vector.extract_strided_slice %241 {offsets = [3, 0], sizes = [1, 48], strides = [1, 1]} : vector<4x48xf32> to vector<1x48xf32>
    %cst_83 = arith.constant 1.000000e-16 : f32
    %254 = vector.broadcast %cst_83 : f32 to vector<1x48xf32>
    %255 = arith.maximumf %253, %254 : vector<1x48xf32>
    %256 = math.rsqrt %255 : vector<1x48xf32>
    %257 = vector.extract_strided_slice %238 {offsets = [3, 0], sizes = [1, 48], strides = [1, 1]} : vector<4x48xf32> to vector<1x48xf32>
    %cst_84 = arith.constant 1.000000e-16 : f32
    %258 = vector.broadcast %cst_84 : f32 to vector<1x48xf32>
    %259 = arith.maximumf %257, %258 : vector<1x48xf32>
    %260 = math.rsqrt %259 : vector<1x48xf32>
    %261 = arith.mulf %256, %260 : vector<1x48xf32>
    %262 = arith.mulf %252, %261 : vector<1x48xf32>
    %263 = arith.index_cast %c2_i32 : i32 to index
    %c0_85 = arith.constant 0 : index
    %c0_86 = arith.constant 0 : index
    %264 = vector.load %arg11[%263, %c0_85, %c0_86] : memref<4x1x128xf32, #tpu.memory_space<vmem>>, vector<1x1x128xf32>
    %265 = vector.shape_cast %264 : vector<1x1x128xf32> to vector<1x128xf32>
    %266 = vector.shape_cast %262 : vector<1x48xf32> to vector<1x1x48xf32>
    %cst_87 = arith.constant dense<0.000000e+00> : vector<1xf32>
    %267 = vector.multi_reduction <add>, %266, %cst_87 [1, 2] : vector<1x1x48xf32> to vector<1xf32>
    %268 = vector.shape_cast %267 : vector<1xf32> to vector<1x1x1xf32>
    %269 = vector.extract %268[0, 0, 0] : f32 from vector<1x1x1xf32>
    %270 = vector.broadcast %269 : f32 to vector<1x128xf32>
    %271 = arith.addf %265, %270 : vector<1x128xf32>
    %272 = arith.index_cast %c2_i32 : i32 to index
    %c0_88 = arith.constant 0 : index
    %c0_89 = arith.constant 0 : index
    %273 = vector.load %arg11[%272, %c0_88, %c0_89] : memref<4x1x128xf32, #tpu.memory_space<vmem>>, vector<1x1x128xf32>
    %274 = vector.shape_cast %273 : vector<1x1x128xf32> to vector<1x128xf32>
    %275 = vector.shape_cast %271 : vector<1x128xf32> to vector<1x1x128xf32>
    tpu.vector_store %arg11[%272, %c0_88, %c0_89], %275 {strides = array<i32>} : memref<4x1x128xf32, #tpu.memory_space<vmem>>, vector<1x1x128xf32>,
    %cst_90 = arith.constant dense<0x7F800000> : vector<64xf32>
    %276 = vector.multi_reduction <minimumf>, %219, %cst_90 [1] : vector<64x48xf32> to vector<64xf32>
    %277 = vector.shape_cast %276 : vector<64xf32> to vector<64x1xf32>
    %278 = vector.broadcast %277 : vector<64x1xf32> to vector<64x48xf32>
    %279 = arith.cmpf oeq, %219, %278 : vector<64x48xf32>
    %c48_i32_91 = arith.constant 48 : i32
    %280 = vector.shape_cast %4 : vector<1x48xi32> to vector<1x48xi32>
    %281 = vector.broadcast %280 : vector<1x48xi32> to vector<64x48xi32>
    %282 = vector.broadcast %c48_i32_91 : i32 to vector<64x48xi32>
    %283 = arith.select %279, %281, %282 : vector<64x48xi1>, vector<64x48xi32>
    %cst_92 = arith.constant dense<2147483647> : vector<64xi32>
    %284 = vector.multi_reduction <minsi>, %283, %cst_92 [1] : vector<64x48xi32> to vector<64xi32>
    %285 = vector.shape_cast %284 : vector<64xi32> to vector<64x1xi32>
    %286 = vector.broadcast %4 : vector<1x48xi32> to vector<64x48xi32>
    %287 = vector.broadcast %285 : vector<64x1xi32> to vector<64x48xi32>
    %288 = arith.cmpi eq, %286, %287 : vector<64x48xi32>
    %289 = arith.extui %288 : vector<64x48xi1> to vector<64x48xi32>
    %290 = arith.sitofp %289 : vector<64x48xi32> to vector<64x48xf32>
    %291 = arith.index_cast %c2_i32 : i32 to index
    %c0_93 = arith.constant 0 : index
    %c0_94 = arith.constant 0 : index
    %292 = vector.load %arg6[%291, %c0_93, %c0_94] : memref<4x48x4xf32, #tpu.memory_space<vmem>>, vector<1x48x4xf32>
    %293 = vector.shape_cast %292 : vector<1x48x4xf32> to vector<48x4xf32>
    %cst_95 = arith.constant dense<0.000000e+00> : vector<64x4xf32>
    %294 = tpu.matmul %290, %293, %cst_95 {dimension_numbers = #tpu.dot_dimension_numbers<[1], [0], [0], [1], [0, 0, 1, 1], [], []>} : vector<64x48xf32>, vector<48x4xf32>, vector<64x4xf32> -> vector<64x4xf32>
    %295 = arith.index_cast %c2_i32 : i32 to index
    %c0_96 = arith.constant 0 : index
    %c0_97 = arith.constant 0 : index
    %296 = vector.load %arg9[%295, %c0_96, %c0_97] : memref<4x64x1xf32, #tpu.memory_space<vmem>>, vector<1x64x1xf32>
    %297 = vector.shape_cast %296 : vector<1x64x1xf32> to vector<64x1xf32>
    %298 = arith.cmpf olt, %277, %297 : vector<64x1xf32>
    %299 = arith.index_cast %c2_i32 : i32 to index
    %c0_98 = arith.constant 0 : index
    %c0_99 = arith.constant 0 : index
    %300 = vector.load %arg9[%299, %c0_98, %c0_99] : memref<4x64x1xf32, #tpu.memory_space<vmem>>, vector<1x64x1xf32>
    %301 = vector.shape_cast %300 : vector<1x64x1xf32> to vector<64x1xf32>
    %302 = arith.select %298, %277, %301 : vector<64x1xi1>, vector<64x1xf32>
    %303 = arith.index_cast %c2_i32 : i32 to index
    %c0_100 = arith.constant 0 : index
    %c0_101 = arith.constant 0 : index
    %304 = vector.load %arg9[%303, %c0_100, %c0_101] : memref<4x64x1xf32, #tpu.memory_space<vmem>>, vector<1x64x1xf32>
    %305 = vector.shape_cast %304 : vector<1x64x1xf32> to vector<64x1xf32>
    %306 = vector.shape_cast %302 : vector<64x1xf32> to vector<1x64x1xf32>
    tpu.vector_store %arg9[%303, %c0_100, %c0_101], %306 {strides = array<i32>} : memref<4x64x1xf32, #tpu.memory_space<vmem>>, vector<1x64x1xf32>,
    %307 = arith.index_cast %c2_i32 : i32 to index
    %c0_102 = arith.constant 0 : index
    %c0_103 = arith.constant 0 : index
    %308 = vector.load %arg10[%307, %c0_102, %c0_103] : memref<4x64x4xf32, #tpu.memory_space<vmem>>, vector<1x64x4xf32>
    %309 = vector.shape_cast %308 : vector<1x64x4xf32> to vector<64x4xf32>
    %310 = vector.shape_cast %298 : vector<64x1xi1> to vector<64x1xi1>
    %311 = vector.broadcast %310 : vector<64x1xi1> to vector<64x4xi1>
    %312 = arith.select %311, %294, %309 : vector<64x4xi1>, vector<64x4xf32>
    %313 = arith.index_cast %c2_i32 : i32 to index
    %c0_104 = arith.constant 0 : index
    %c0_105 = arith.constant 0 : index
    %314 = vector.load %arg10[%313, %c0_104, %c0_105] : memref<4x64x4xf32, #tpu.memory_space<vmem>>, vector<1x64x4xf32>
    %315 = vector.shape_cast %314 : vector<1x64x4xf32> to vector<64x4xf32>
    %316 = vector.shape_cast %312 : vector<64x4xf32> to vector<1x64x4xf32>
    tpu.vector_store %arg10[%313, %c0_104, %c0_105], %316 {strides = array<i32>} : memref<4x64x4xf32, #tpu.memory_space<vmem>>, vector<1x64x4xf32>,
    %c3_i32 = arith.constant 3 : i32
    %317 = arith.index_cast %c3_i32 : i32 to index
    %c0_106 = arith.constant 0 : index
    %c0_107 = arith.constant 0 : index
    %318 = vector.load %arg2[%317, %c0_106, %c0_107] : memref<4x64x5xf32, #tpu.memory_space<vmem>>, vector<1x64x5xf32>
    %319 = vector.shape_cast %318 : vector<1x64x5xf32> to vector<64x5xf32>
    %320 = arith.index_cast %c3_i32 : i32 to index
    %c0_108 = arith.constant 0 : index
    %c0_109 = arith.constant 0 : index
    %321 = vector.load %arg5[%320, %c0_108, %c0_109] : memref<4x5x48xf32, #tpu.memory_space<vmem>>, vector<1x5x48xf32>
    %322 = vector.shape_cast %321 : vector<1x5x48xf32> to vector<5x48xf32>
    %cst_110 = arith.constant dense<0.000000e+00> : vector<64x48xf32>
    %323 = tpu.matmul %319, %322, %cst_110 {dimension_numbers = #tpu.dot_dimension_numbers<[1], [0], [0], [1], [0, 0, 1, 1], [], []>} : vector<64x5xf32>, vector<5x48xf32>, vector<64x48xf32> -> vector<64x48xf32>
    %cst_111 = arith.constant dense<0x7F800000> : vector<48xf32>
    %324 = vector.multi_reduction <minimumf>, %323, %cst_111 [0] : vector<64x48xf32> to vector<48xf32>
    %325 = vector.shape_cast %324 : vector<48xf32> to vector<1x48xf32>
    %326 = vector.broadcast %325 : vector<1x48xf32> to vector<64x48xf32>
    %327 = arith.cmpf oeq, %323, %326 : vector<64x48xf32>
    %c64_i32_112 = arith.constant 64 : i32
    %328 = vector.shape_cast %3 : vector<64x1xi32> to vector<64x1xi32>
    %329 = vector.broadcast %328 : vector<64x1xi32> to vector<64x48xi32>
    %330 = vector.broadcast %c64_i32_112 : i32 to vector<64x48xi32>
    %331 = arith.select %327, %329, %330 : vector<64x48xi1>, vector<64x48xi32>
    %cst_113 = arith.constant dense<2147483647> : vector<48xi32>
    %332 = vector.multi_reduction <minsi>, %331, %cst_113 [0] : vector<64x48xi32> to vector<48xi32>
    %333 = vector.shape_cast %332 : vector<48xi32> to vector<1x48xi32>
    %334 = vector.broadcast %3 : vector<64x1xi32> to vector<64x48xi32>
    %335 = vector.broadcast %333 : vector<1x48xi32> to vector<64x48xi32>
    %336 = arith.cmpi eq, %334, %335 : vector<64x48xi32>
    %337 = arith.extui %336 : vector<64x48xi1> to vector<64x48xi32>
    %338 = arith.sitofp %337 : vector<64x48xi32> to vector<64x48xf32>
    %339 = arith.index_cast %c3_i32 : i32 to index
    %c0_114 = arith.constant 0 : index
    %c0_115 = arith.constant 0 : index
    %340 = vector.load %arg3[%339, %c0_114, %c0_115] : memref<4x4x64xf32, #tpu.memory_space<vmem>>, vector<1x4x64xf32>
    %341 = vector.shape_cast %340 : vector<1x4x64xf32> to vector<4x64xf32>
    %cst_116 = arith.constant dense<0.000000e+00> : vector<4x48xf32>
    %342 = tpu.matmul %341, %338, %cst_116 {dimension_numbers = #tpu.dot_dimension_numbers<[1], [0], [0], [1], [0, 0, 1, 1], [], []>} : vector<4x64xf32>, vector<64x48xf32>, vector<4x48xf32> -> vector<4x48xf32>
    %343 = arith.index_cast %c3_i32 : i32 to index
    %c0_117 = arith.constant 0 : index
    %c0_118 = arith.constant 0 : index
    %344 = vector.load %arg7[%343, %c0_117, %c0_118] : memref<4x4x48xf32, #tpu.memory_space<vmem>>, vector<1x4x48xf32>
    %345 = vector.shape_cast %344 : vector<1x4x48xf32> to vector<4x48xf32>
    %346 = vector.extract_strided_slice %345 {offsets = [0, 0], sizes = [1, 48], strides = [1, 1]} : vector<4x48xf32> to vector<1x48xf32>
    %347 = vector.extract_strided_slice %342 {offsets = [0, 0], sizes = [1, 48], strides = [1, 1]} : vector<4x48xf32> to vector<1x48xf32>
    %348 = arith.mulf %346, %347 : vector<1x48xf32>
    %349 = vector.extract_strided_slice %345 {offsets = [1, 0], sizes = [1, 48], strides = [1, 1]} : vector<4x48xf32> to vector<1x48xf32>
    %350 = vector.extract_strided_slice %342 {offsets = [1, 0], sizes = [1, 48], strides = [1, 1]} : vector<4x48xf32> to vector<1x48xf32>
    %351 = arith.mulf %349, %350 : vector<1x48xf32>
    %352 = arith.addf %348, %351 : vector<1x48xf32>
    %353 = vector.extract_strided_slice %345 {offsets = [2, 0], sizes = [1, 48], strides = [1, 1]} : vector<4x48xf32> to vector<1x48xf32>
    %354 = vector.extract_strided_slice %342 {offsets = [2, 0], sizes = [1, 48], strides = [1, 1]} : vector<4x48xf32> to vector<1x48xf32>
    %355 = arith.mulf %353, %354 : vector<1x48xf32>
    %356 = arith.addf %352, %355 : vector<1x48xf32>
    %357 = vector.extract_strided_slice %345 {offsets = [3, 0], sizes = [1, 48], strides = [1, 1]} : vector<4x48xf32> to vector<1x48xf32>
    %cst_119 = arith.constant 1.000000e-16 : f32
    %358 = vector.broadcast %cst_119 : f32 to vector<1x48xf32>
    %359 = arith.maximumf %357, %358 : vector<1x48xf32>
    %360 = math.rsqrt %359 : vector<1x48xf32>
    %361 = vector.extract_strided_slice %342 {offsets = [3, 0], sizes = [1, 48], strides = [1, 1]} : vector<4x48xf32> to vector<1x48xf32>
    %cst_120 = arith.constant 1.000000e-16 : f32
    %362 = vector.broadcast %cst_120 : f32 to vector<1x48xf32>
    %363 = arith.maximumf %361, %362 : vector<1x48xf32>
    %364 = math.rsqrt %363 : vector<1x48xf32>
    %365 = arith.mulf %360, %364 : vector<1x48xf32>
    %366 = arith.mulf %356, %365 : vector<1x48xf32>
    %367 = arith.index_cast %c3_i32 : i32 to index
    %c0_121 = arith.constant 0 : index
    %c0_122 = arith.constant 0 : index
    %368 = vector.load %arg11[%367, %c0_121, %c0_122] : memref<4x1x128xf32, #tpu.memory_space<vmem>>, vector<1x1x128xf32>
    %369 = vector.shape_cast %368 : vector<1x1x128xf32> to vector<1x128xf32>
    %370 = vector.shape_cast %366 : vector<1x48xf32> to vector<1x1x48xf32>
    %cst_123 = arith.constant dense<0.000000e+00> : vector<1xf32>
    %371 = vector.multi_reduction <add>, %370, %cst_123 [1, 2] : vector<1x1x48xf32> to vector<1xf32>
    %372 = vector.shape_cast %371 : vector<1xf32> to vector<1x1x1xf32>
    %373 = vector.extract %372[0, 0, 0] : f32 from vector<1x1x1xf32>
    %374 = vector.broadcast %373 : f32 to vector<1x128xf32>
    %375 = arith.addf %369, %374 : vector<1x128xf32>
    %376 = arith.index_cast %c3_i32 : i32 to index
    %c0_124 = arith.constant 0 : index
    %c0_125 = arith.constant 0 : index
    %377 = vector.load %arg11[%376, %c0_124, %c0_125] : memref<4x1x128xf32, #tpu.memory_space<vmem>>, vector<1x1x128xf32>
    %378 = vector.shape_cast %377 : vector<1x1x128xf32> to vector<1x128xf32>
    %379 = vector.shape_cast %375 : vector<1x128xf32> to vector<1x1x128xf32>
    tpu.vector_store %arg11[%376, %c0_124, %c0_125], %379 {strides = array<i32>} : memref<4x1x128xf32, #tpu.memory_space<vmem>>, vector<1x1x128xf32>,
    %cst_126 = arith.constant dense<0x7F800000> : vector<64xf32>
    %380 = vector.multi_reduction <minimumf>, %323, %cst_126 [1] : vector<64x48xf32> to vector<64xf32>
    %381 = vector.shape_cast %380 : vector<64xf32> to vector<64x1xf32>
    %382 = vector.broadcast %381 : vector<64x1xf32> to vector<64x48xf32>
    %383 = arith.cmpf oeq, %323, %382 : vector<64x48xf32>
    %c48_i32_127 = arith.constant 48 : i32
    %384 = vector.shape_cast %4 : vector<1x48xi32> to vector<1x48xi32>
    %385 = vector.broadcast %384 : vector<1x48xi32> to vector<64x48xi32>
    %386 = vector.broadcast %c48_i32_127 : i32 to vector<64x48xi32>
    %387 = arith.select %383, %385, %386 : vector<64x48xi1>, vector<64x48xi32>
    %cst_128 = arith.constant dense<2147483647> : vector<64xi32>
    %388 = vector.multi_reduction <minsi>, %387, %cst_128 [1] : vector<64x48xi32> to vector<64xi32>
    %389 = vector.shape_cast %388 : vector<64xi32> to vector<64x1xi32>
    %390 = vector.broadcast %4 : vector<1x48xi32> to vector<64x48xi32>
    %391 = vector.broadcast %389 : vector<64x1xi32> to vector<64x48xi32>
    %392 = arith.cmpi eq, %390, %391 : vector<64x48xi32>
    %393 = arith.extui %392 : vector<64x48xi1> to vector<64x48xi32>
    %394 = arith.sitofp %393 : vector<64x48xi32> to vector<64x48xf32>
    %395 = arith.index_cast %c3_i32 : i32 to index
    %c0_129 = arith.constant 0 : index
    %c0_130 = arith.constant 0 : index
    %396 = vector.load %arg6[%395, %c0_129, %c0_130] : memref<4x48x4xf32, #tpu.memory_space<vmem>>, vector<1x48x4xf32>
    %397 = vector.shape_cast %396 : vector<1x48x4xf32> to vector<48x4xf32>
    %cst_131 = arith.constant dense<0.000000e+00> : vector<64x4xf32>
    %398 = tpu.matmul %394, %397, %cst_131 {dimension_numbers = #tpu.dot_dimension_numbers<[1], [0], [0], [1], [0, 0, 1, 1], [], []>} : vector<64x48xf32>, vector<48x4xf32>, vector<64x4xf32> -> vector<64x4xf32>
    %399 = arith.index_cast %c3_i32 : i32 to index
    %c0_132 = arith.constant 0 : index
    %c0_133 = arith.constant 0 : index
    %400 = vector.load %arg9[%399, %c0_132, %c0_133] : memref<4x64x1xf32, #tpu.memory_space<vmem>>, vector<1x64x1xf32>
    %401 = vector.shape_cast %400 : vector<1x64x1xf32> to vector<64x1xf32>
    %402 = arith.cmpf olt, %381, %401 : vector<64x1xf32>
    %403 = arith.index_cast %c3_i32 : i32 to index
    %c0_134 = arith.constant 0 : index
    %c0_135 = arith.constant 0 : index
    %404 = vector.load %arg9[%403, %c0_134, %c0_135] : memref<4x64x1xf32, #tpu.memory_space<vmem>>, vector<1x64x1xf32>
    %405 = vector.shape_cast %404 : vector<1x64x1xf32> to vector<64x1xf32>
    %406 = arith.select %402, %381, %405 : vector<64x1xi1>, vector<64x1xf32>
    %407 = arith.index_cast %c3_i32 : i32 to index
    %c0_136 = arith.constant 0 : index
    %c0_137 = arith.constant 0 : index
    %408 = vector.load %arg9[%407, %c0_136, %c0_137] : memref<4x64x1xf32, #tpu.memory_space<vmem>>, vector<1x64x1xf32>
    %409 = vector.shape_cast %408 : vector<1x64x1xf32> to vector<64x1xf32>
    %410 = vector.shape_cast %406 : vector<64x1xf32> to vector<1x64x1xf32>
    tpu.vector_store %arg9[%407, %c0_136, %c0_137], %410 {strides = array<i32>} : memref<4x64x1xf32, #tpu.memory_space<vmem>>, vector<1x64x1xf32>,
    %411 = arith.index_cast %c3_i32 : i32 to index
    %c0_138 = arith.constant 0 : index
    %c0_139 = arith.constant 0 : index
    %412 = vector.load %arg10[%411, %c0_138, %c0_139] : memref<4x64x4xf32, #tpu.memory_space<vmem>>, vector<1x64x4xf32>
    %413 = vector.shape_cast %412 : vector<1x64x4xf32> to vector<64x4xf32>
    %414 = vector.shape_cast %402 : vector<64x1xi1> to vector<64x1xi1>
    %415 = vector.broadcast %414 : vector<64x1xi1> to vector<64x4xi1>
    %416 = arith.select %415, %398, %413 : vector<64x4xi1>, vector<64x4xf32>
    %417 = arith.index_cast %c3_i32 : i32 to index
    %c0_140 = arith.constant 0 : index
    %c0_141 = arith.constant 0 : index
    %418 = vector.load %arg10[%417, %c0_140, %c0_141] : memref<4x64x4xf32, #tpu.memory_space<vmem>>, vector<1x64x4xf32>
    %419 = vector.shape_cast %418 : vector<1x64x4xf32> to vector<64x4xf32>
    %420 = vector.shape_cast %416 : vector<64x4xf32> to vector<1x64x4xf32>
    tpu.vector_store %arg10[%417, %c0_140, %c0_141], %420 {strides = array<i32>} : memref<4x64x4xf32, #tpu.memory_space<vmem>>, vector<1x64x4xf32>,
    %c4_i32 = arith.constant 4 : i32
    %c0_i32_142 = arith.constant 0 : i32
    %421 = arith.cmpi eq, %arg1, %c0_i32_142 : i32
    %422 = arith.extui %421 : i1 to i32
    %c0_i32_143 = arith.constant 0 : i32
    %423 = arith.cmpi ne, %422, %c0_i32_143 : i32
    scf.if %423 {
      %c0_i32_144 = arith.constant 0 : i32
      %424 = arith.index_cast %c0_i32_144 : i32 to index
      %c0_145 = arith.constant 0 : index
      %c0_146 = arith.constant 0 : index
      %425 = vector.load %arg4[%424, %c0_145, %c0_146] : memref<4x64x4xf32, #tpu.memory_space<vmem>>, vector<1x64x4xf32>
      %426 = vector.shape_cast %425 : vector<1x64x4xf32> to vector<64x4xf32>
      %427 = arith.index_cast %c0_i32_144 : i32 to index
      %c0_147 = arith.constant 0 : index
      %c0_148 = arith.constant 0 : index
      %428 = vector.load %arg10[%427, %c0_147, %c0_148] : memref<4x64x4xf32, #tpu.memory_space<vmem>>, vector<1x64x4xf32>
      %429 = vector.shape_cast %428 : vector<1x64x4xf32> to vector<64x4xf32>
      %430 = vector.extract_strided_slice %426 {offsets = [0, 0], sizes = [64, 1], strides = [1, 1]} : vector<64x4xf32> to vector<64x1xf32>
      %431 = vector.extract_strided_slice %429 {offsets = [0, 0], sizes = [64, 1], strides = [1, 1]} : vector<64x4xf32> to vector<64x1xf32>
      %432 = arith.mulf %430, %431 : vector<64x1xf32>
      %433 = vector.extract_strided_slice %426 {offsets = [0, 1], sizes = [64, 1], strides = [1, 1]} : vector<64x4xf32> to vector<64x1xf32>
      %434 = vector.extract_strided_slice %429 {offsets = [0, 1], sizes = [64, 1], strides = [1, 1]} : vector<64x4xf32> to vector<64x1xf32>
      %435 = arith.mulf %433, %434 : vector<64x1xf32>
      %436 = arith.addf %432, %435 : vector<64x1xf32>
      %437 = vector.extract_strided_slice %426 {offsets = [0, 2], sizes = [64, 1], strides = [1, 1]} : vector<64x4xf32> to vector<64x1xf32>
      %438 = vector.extract_strided_slice %429 {offsets = [0, 2], sizes = [64, 1], strides = [1, 1]} : vector<64x4xf32> to vector<64x1xf32>
      %439 = arith.mulf %437, %438 : vector<64x1xf32>
      %440 = arith.addf %436, %439 : vector<64x1xf32>
      %441 = vector.extract_strided_slice %426 {offsets = [0, 3], sizes = [64, 1], strides = [1, 1]} : vector<64x4xf32> to vector<64x1xf32>
      %cst_149 = arith.constant 1.000000e-16 : f32
      %442 = vector.broadcast %cst_149 : f32 to vector<64x1xf32>
      %443 = arith.maximumf %441, %442 : vector<64x1xf32>
      %444 = math.rsqrt %443 : vector<64x1xf32>
      %445 = vector.extract_strided_slice %429 {offsets = [0, 3], sizes = [64, 1], strides = [1, 1]} : vector<64x4xf32> to vector<64x1xf32>
      %cst_150 = arith.constant 1.000000e-16 : f32
      %446 = vector.broadcast %cst_150 : f32 to vector<64x1xf32>
      %447 = arith.maximumf %445, %446 : vector<64x1xf32>
      %448 = math.rsqrt %447 : vector<64x1xf32>
      %449 = arith.mulf %444, %448 : vector<64x1xf32>
      %450 = arith.mulf %440, %449 : vector<64x1xf32>
      %451 = vector.shape_cast %450 : vector<64x1xf32> to vector<1x64x1xf32>
      %cst_151 = arith.constant dense<0.000000e+00> : vector<1xf32>
      %452 = vector.multi_reduction <add>, %451, %cst_151 [1, 2] : vector<1x64x1xf32> to vector<1xf32>
      %453 = vector.shape_cast %452 : vector<1xf32> to vector<1x1x1xf32>
      %454 = vector.extract %453[0, 0, 0] : f32 from vector<1x1x1xf32>
      %cst_152 = arith.constant 1.562500e-02 : f32
      %455 = arith.mulf %454, %cst_152 : f32
      %456 = arith.index_cast %c0_i32_144 : i32 to index
      %c0_153 = arith.constant 0 : index
      %c0_154 = arith.constant 0 : index
      %457 = vector.load %arg11[%456, %c0_153, %c0_154] : memref<4x1x128xf32, #tpu.memory_space<vmem>>, vector<1x1x128xf32>
      %458 = vector.shape_cast %457 : vector<1x1x128xf32> to vector<1x128xf32>
      %cst_155 = arith.constant 0.020833334 : f32
      %459 = vector.broadcast %cst_155 : f32 to vector<1x128xf32>
      %460 = arith.mulf %458, %459 : vector<1x128xf32>
      %461 = vector.broadcast %455 : f32 to vector<1x128xf32>
      %462 = arith.addf %461, %460 : vector<1x128xf32>
      %cst_156 = arith.constant 0.000000e+00 : f32
      %463 = vector.broadcast %cst_156 : f32 to vector<1x128xf32>
      %464 = arith.subf %463, %462 : vector<1x128xf32>
      %c0_157 = arith.constant 0 : index
      %465 = arith.index_cast %c0_i32_144 : i32 to index
      %c0_158 = arith.constant 0 : index
      %466 = vector.load %arg8[%c0_157, %465, %c0_158] : memref<1x4x128xf32, #tpu.memory_space<vmem>>, vector<1x1x128xf32>
      %467 = vector.shape_cast %466 : vector<1x1x128xf32> to vector<1x128xf32>
      %468 = vector.shape_cast %464 : vector<1x128xf32> to vector<1x1x128xf32>
      tpu.vector_store %arg8[%c0_157, %465, %c0_158], %468 {strides = array<i32>} : memref<1x4x128xf32, #tpu.memory_space<vmem>>, vector<1x1x128xf32>,
      %c1_i32_159 = arith.constant 1 : i32
      %469 = arith.index_cast %c1_i32_159 : i32 to index
      %c0_160 = arith.constant 0 : index
      %c0_161 = arith.constant 0 : index
      %470 = vector.load %arg4[%469, %c0_160, %c0_161] : memref<4x64x4xf32, #tpu.memory_space<vmem>>, vector<1x64x4xf32>
      %471 = vector.shape_cast %470 : vector<1x64x4xf32> to vector<64x4xf32>
      %472 = arith.index_cast %c1_i32_159 : i32 to index
      %c0_162 = arith.constant 0 : index
      %c0_163 = arith.constant 0 : index
      %473 = vector.load %arg10[%472, %c0_162, %c0_163] : memref<4x64x4xf32, #tpu.memory_space<vmem>>, vector<1x64x4xf32>
      %474 = vector.shape_cast %473 : vector<1x64x4xf32> to vector<64x4xf32>
      %475 = vector.extract_strided_slice %471 {offsets = [0, 0], sizes = [64, 1], strides = [1, 1]} : vector<64x4xf32> to vector<64x1xf32>
      %476 = vector.extract_strided_slice %474 {offsets = [0, 0], sizes = [64, 1], strides = [1, 1]} : vector<64x4xf32> to vector<64x1xf32>
      %477 = arith.mulf %475, %476 : vector<64x1xf32>
      %478 = vector.extract_strided_slice %471 {offsets = [0, 1], sizes = [64, 1], strides = [1, 1]} : vector<64x4xf32> to vector<64x1xf32>
      %479 = vector.extract_strided_slice %474 {offsets = [0, 1], sizes = [64, 1], strides = [1, 1]} : vector<64x4xf32> to vector<64x1xf32>
      %480 = arith.mulf %478, %479 : vector<64x1xf32>
      %481 = arith.addf %477, %480 : vector<64x1xf32>
      %482 = vector.extract_strided_slice %471 {offsets = [0, 2], sizes = [64, 1], strides = [1, 1]} : vector<64x4xf32> to vector<64x1xf32>
      %483 = vector.extract_strided_slice %474 {offsets = [0, 2], sizes = [64, 1], strides = [1, 1]} : vector<64x4xf32> to vector<64x1xf32>
      %484 = arith.mulf %482, %483 : vector<64x1xf32>
      %485 = arith.addf %481, %484 : vector<64x1xf32>
      %486 = vector.extract_strided_slice %471 {offsets = [0, 3], sizes = [64, 1], strides = [1, 1]} : vector<64x4xf32> to vector<64x1xf32>
      %cst_164 = arith.constant 1.000000e-16 : f32
      %487 = vector.broadcast %cst_164 : f32 to vector<64x1xf32>
      %488 = arith.maximumf %486, %487 : vector<64x1xf32>
      %489 = math.rsqrt %488 : vector<64x1xf32>
      %490 = vector.extract_strided_slice %474 {offsets = [0, 3], sizes = [64, 1], strides = [1, 1]} : vector<64x4xf32> to vector<64x1xf32>
      %cst_165 = arith.constant 1.000000e-16 : f32
      %491 = vector.broadcast %cst_165 : f32 to vector<64x1xf32>
      %492 = arith.maximumf %490, %491 : vector<64x1xf32>
      %493 = math.rsqrt %492 : vector<64x1xf32>
      %494 = arith.mulf %489, %493 : vector<64x1xf32>
      %495 = arith.mulf %485, %494 : vector<64x1xf32>
      %496 = vector.shape_cast %495 : vector<64x1xf32> to vector<1x64x1xf32>
      %cst_166 = arith.constant dense<0.000000e+00> : vector<1xf32>
      %497 = vector.multi_reduction <add>, %496, %cst_166 [1, 2] : vector<1x64x1xf32> to vector<1xf32>
      %498 = vector.shape_cast %497 : vector<1xf32> to vector<1x1x1xf32>
      %499 = vector.extract %498[0, 0, 0] : f32 from vector<1x1x1xf32>
      %cst_167 = arith.constant 1.562500e-02 : f32
      %500 = arith.mulf %499, %cst_167 : f32
      %501 = arith.index_cast %c1_i32_159 : i32 to index
      %c0_168 = arith.constant 0 : index
      %c0_169 = arith.constant 0 : index
      %502 = vector.load %arg11[%501, %c0_168, %c0_169] : memref<4x1x128xf32, #tpu.memory_space<vmem>>, vector<1x1x128xf32>
      %503 = vector.shape_cast %502 : vector<1x1x128xf32> to vector<1x128xf32>
      %cst_170 = arith.constant 0.020833334 : f32
      %504 = vector.broadcast %cst_170 : f32 to vector<1x128xf32>
      %505 = arith.mulf %503, %504 : vector<1x128xf32>
      %506 = vector.broadcast %500 : f32 to vector<1x128xf32>
      %507 = arith.addf %506, %505 : vector<1x128xf32>
      %cst_171 = arith.constant 0.000000e+00 : f32
      %508 = vector.broadcast %cst_171 : f32 to vector<1x128xf32>
      %509 = arith.subf %508, %507 : vector<1x128xf32>
      %c0_172 = arith.constant 0 : index
      %510 = arith.index_cast %c1_i32_159 : i32 to index
      %c0_173 = arith.constant 0 : index
      %511 = vector.load %arg8[%c0_172, %510, %c0_173] : memref<1x4x128xf32, #tpu.memory_space<vmem>>, vector<1x1x128xf32>
      %512 = vector.shape_cast %511 : vector<1x1x128xf32> to vector<1x128xf32>
      %513 = vector.shape_cast %509 : vector<1x128xf32> to vector<1x1x128xf32>
      tpu.vector_store %arg8[%c0_172, %510, %c0_173], %513 {strides = array<i32>} : memref<1x4x128xf32, #tpu.memory_space<vmem>>, vector<1x1x128xf32>,
      %c2_i32_174 = arith.constant 2 : i32
      %514 = arith.index_cast %c2_i32_174 : i32 to index
      %c0_175 = arith.constant 0 : index
      %c0_176 = arith.constant 0 : index
      %515 = vector.load %arg4[%514, %c0_175, %c0_176] : memref<4x64x4xf32, #tpu.memory_space<vmem>>, vector<1x64x4xf32>
      %516 = vector.shape_cast %515 : vector<1x64x4xf32> to vector<64x4xf32>
      %517 = arith.index_cast %c2_i32_174 : i32 to index
      %c0_177 = arith.constant 0 : index
      %c0_178 = arith.constant 0 : index
      %518 = vector.load %arg10[%517, %c0_177, %c0_178] : memref<4x64x4xf32, #tpu.memory_space<vmem>>, vector<1x64x4xf32>
      %519 = vector.shape_cast %518 : vector<1x64x4xf32> to vector<64x4xf32>
      %520 = vector.extract_strided_slice %516 {offsets = [0, 0], sizes = [64, 1], strides = [1, 1]} : vector<64x4xf32> to vector<64x1xf32>
      %521 = vector.extract_strided_slice %519 {offsets = [0, 0], sizes = [64, 1], strides = [1, 1]} : vector<64x4xf32> to vector<64x1xf32>
      %522 = arith.mulf %520, %521 : vector<64x1xf32>
      %523 = vector.extract_strided_slice %516 {offsets = [0, 1], sizes = [64, 1], strides = [1, 1]} : vector<64x4xf32> to vector<64x1xf32>
      %524 = vector.extract_strided_slice %519 {offsets = [0, 1], sizes = [64, 1], strides = [1, 1]} : vector<64x4xf32> to vector<64x1xf32>
      %525 = arith.mulf %523, %524 : vector<64x1xf32>
      %526 = arith.addf %522, %525 : vector<64x1xf32>
      %527 = vector.extract_strided_slice %516 {offsets = [0, 2], sizes = [64, 1], strides = [1, 1]} : vector<64x4xf32> to vector<64x1xf32>
      %528 = vector.extract_strided_slice %519 {offsets = [0, 2], sizes = [64, 1], strides = [1, 1]} : vector<64x4xf32> to vector<64x1xf32>
      %529 = arith.mulf %527, %528 : vector<64x1xf32>
      %530 = arith.addf %526, %529 : vector<64x1xf32>
      %531 = vector.extract_strided_slice %516 {offsets = [0, 3], sizes = [64, 1], strides = [1, 1]} : vector<64x4xf32> to vector<64x1xf32>
      %cst_179 = arith.constant 1.000000e-16 : f32
      %532 = vector.broadcast %cst_179 : f32 to vector<64x1xf32>
      %533 = arith.maximumf %531, %532 : vector<64x1xf32>
      %534 = math.rsqrt %533 : vector<64x1xf32>
      %535 = vector.extract_strided_slice %519 {offsets = [0, 3], sizes = [64, 1], strides = [1, 1]} : vector<64x4xf32> to vector<64x1xf32>
      %cst_180 = arith.constant 1.000000e-16 : f32
      %536 = vector.broadcast %cst_180 : f32 to vector<64x1xf32>
      %537 = arith.maximumf %535, %536 : vector<64x1xf32>
      %538 = math.rsqrt %537 : vector<64x1xf32>
      %539 = arith.mulf %534, %538 : vector<64x1xf32>
      %540 = arith.mulf %530, %539 : vector<64x1xf32>
      %541 = vector.shape_cast %540 : vector<64x1xf32> to vector<1x64x1xf32>
      %cst_181 = arith.constant dense<0.000000e+00> : vector<1xf32>
      %542 = vector.multi_reduction <add>, %541, %cst_181 [1, 2] : vector<1x64x1xf32> to vector<1xf32>
      %543 = vector.shape_cast %542 : vector<1xf32> to vector<1x1x1xf32>
      %544 = vector.extract %543[0, 0, 0] : f32 from vector<1x1x1xf32>
      %cst_182 = arith.constant 1.562500e-02 : f32
      %545 = arith.mulf %544, %cst_182 : f32
      %546 = arith.index_cast %c2_i32_174 : i32 to index
      %c0_183 = arith.constant 0 : index
      %c0_184 = arith.constant 0 : index
      %547 = vector.load %arg11[%546, %c0_183, %c0_184] : memref<4x1x128xf32, #tpu.memory_space<vmem>>, vector<1x1x128xf32>
      %548 = vector.shape_cast %547 : vector<1x1x128xf32> to vector<1x128xf32>
      %cst_185 = arith.constant 0.020833334 : f32
      %549 = vector.broadcast %cst_185 : f32 to vector<1x128xf32>
      %550 = arith.mulf %548, %549 : vector<1x128xf32>
      %551 = vector.broadcast %545 : f32 to vector<1x128xf32>
      %552 = arith.addf %551, %550 : vector<1x128xf32>
      %cst_186 = arith.constant 0.000000e+00 : f32
      %553 = vector.broadcast %cst_186 : f32 to vector<1x128xf32>
      %554 = arith.subf %553, %552 : vector<1x128xf32>
      %c0_187 = arith.constant 0 : index
      %555 = arith.index_cast %c2_i32_174 : i32 to index
      %c0_188 = arith.constant 0 : index
      %556 = vector.load %arg8[%c0_187, %555, %c0_188] : memref<1x4x128xf32, #tpu.memory_space<vmem>>, vector<1x1x128xf32>
      %557 = vector.shape_cast %556 : vector<1x1x128xf32> to vector<1x128xf32>
      %558 = vector.shape_cast %554 : vector<1x128xf32> to vector<1x1x128xf32>
      tpu.vector_store %arg8[%c0_187, %555, %c0_188], %558 {strides = array<i32>} : memref<1x4x128xf32, #tpu.memory_space<vmem>>, vector<1x1x128xf32>,
      %c3_i32_189 = arith.constant 3 : i32
      %559 = arith.index_cast %c3_i32_189 : i32 to index
      %c0_190 = arith.constant 0 : index
      %c0_191 = arith.constant 0 : index
      %560 = vector.load %arg4[%559, %c0_190, %c0_191] : memref<4x64x4xf32, #tpu.memory_space<vmem>>, vector<1x64x4xf32>
      %561 = vector.shape_cast %560 : vector<1x64x4xf32> to vector<64x4xf32>
      %562 = arith.index_cast %c3_i32_189 : i32 to index
      %c0_192 = arith.constant 0 : index
      %c0_193 = arith.constant 0 : index
      %563 = vector.load %arg10[%562, %c0_192, %c0_193] : memref<4x64x4xf32, #tpu.memory_space<vmem>>, vector<1x64x4xf32>
      %564 = vector.shape_cast %563 : vector<1x64x4xf32> to vector<64x4xf32>
      %565 = vector.extract_strided_slice %561 {offsets = [0, 0], sizes = [64, 1], strides = [1, 1]} : vector<64x4xf32> to vector<64x1xf32>
      %566 = vector.extract_strided_slice %564 {offsets = [0, 0], sizes = [64, 1], strides = [1, 1]} : vector<64x4xf32> to vector<64x1xf32>
      %567 = arith.mulf %565, %566 : vector<64x1xf32>
      %568 = vector.extract_strided_slice %561 {offsets = [0, 1], sizes = [64, 1], strides = [1, 1]} : vector<64x4xf32> to vector<64x1xf32>
      %569 = vector.extract_strided_slice %564 {offsets = [0, 1], sizes = [64, 1], strides = [1, 1]} : vector<64x4xf32> to vector<64x1xf32>
      %570 = arith.mulf %568, %569 : vector<64x1xf32>
      %571 = arith.addf %567, %570 : vector<64x1xf32>
      %572 = vector.extract_strided_slice %561 {offsets = [0, 2], sizes = [64, 1], strides = [1, 1]} : vector<64x4xf32> to vector<64x1xf32>
      %573 = vector.extract_strided_slice %564 {offsets = [0, 2], sizes = [64, 1], strides = [1, 1]} : vector<64x4xf32> to vector<64x1xf32>
      %574 = arith.mulf %572, %573 : vector<64x1xf32>
      %575 = arith.addf %571, %574 : vector<64x1xf32>
      %576 = vector.extract_strided_slice %561 {offsets = [0, 3], sizes = [64, 1], strides = [1, 1]} : vector<64x4xf32> to vector<64x1xf32>
      %cst_194 = arith.constant 1.000000e-16 : f32
      %577 = vector.broadcast %cst_194 : f32 to vector<64x1xf32>
      %578 = arith.maximumf %576, %577 : vector<64x1xf32>
      %579 = math.rsqrt %578 : vector<64x1xf32>
      %580 = vector.extract_strided_slice %564 {offsets = [0, 3], sizes = [64, 1], strides = [1, 1]} : vector<64x4xf32> to vector<64x1xf32>
      %cst_195 = arith.constant 1.000000e-16 : f32
      %581 = vector.broadcast %cst_195 : f32 to vector<64x1xf32>
      %582 = arith.maximumf %580, %581 : vector<64x1xf32>
      %583 = math.rsqrt %582 : vector<64x1xf32>
      %584 = arith.mulf %579, %583 : vector<64x1xf32>
      %585 = arith.mulf %575, %584 : vector<64x1xf32>
      %586 = vector.shape_cast %585 : vector<64x1xf32> to vector<1x64x1xf32>
      %cst_196 = arith.constant dense<0.000000e+00> : vector<1xf32>
      %587 = vector.multi_reduction <add>, %586, %cst_196 [1, 2] : vector<1x64x1xf32> to vector<1xf32>
      %588 = vector.shape_cast %587 : vector<1xf32> to vector<1x1x1xf32>
      %589 = vector.extract %588[0, 0, 0] : f32 from vector<1x1x1xf32>
      %cst_197 = arith.constant 1.562500e-02 : f32
      %590 = arith.mulf %589, %cst_197 : f32
      %591 = arith.index_cast %c3_i32_189 : i32 to index
      %c0_198 = arith.constant 0 : index
      %c0_199 = arith.constant 0 : index
      %592 = vector.load %arg11[%591, %c0_198, %c0_199] : memref<4x1x128xf32, #tpu.memory_space<vmem>>, vector<1x1x128xf32>
      %593 = vector.shape_cast %592 : vector<1x1x128xf32> to vector<1x128xf32>
      %cst_200 = arith.constant 0.020833334 : f32
      %594 = vector.broadcast %cst_200 : f32 to vector<1x128xf32>
      %595 = arith.mulf %593, %594 : vector<1x128xf32>
      %596 = vector.broadcast %590 : f32 to vector<1x128xf32>
      %597 = arith.addf %596, %595 : vector<1x128xf32>
      %cst_201 = arith.constant 0.000000e+00 : f32
      %598 = vector.broadcast %cst_201 : f32 to vector<1x128xf32>
      %599 = arith.subf %598, %597 : vector<1x128xf32>
      %c0_202 = arith.constant 0 : index
      %600 = arith.index_cast %c3_i32_189 : i32 to index
      %c0_203 = arith.constant 0 : index
      %601 = vector.load %arg8[%c0_202, %600, %c0_203] : memref<1x4x128xf32, #tpu.memory_space<vmem>>, vector<1x1x128xf32>
      %602 = vector.shape_cast %601 : vector<1x1x128xf32> to vector<1x128xf32>
      %603 = vector.shape_cast %599 : vector<1x128xf32> to vector<1x1x128xf32>
      tpu.vector_store %arg8[%c0_202, %600, %c0_203], %603 {strides = array<i32>} : memref<1x4x128xf32, #tpu.memory_space<vmem>>, vector<1x1x128xf32>,
      %c4_i32_204 = arith.constant 4 : i32
    } else {
    }
    return
  }
  func.func @transform_0(%arg0: i32, %arg1: i32) -> (i32, i32, i32) {
    %c0_i32 = arith.constant 0 : i32
    %c0_i32_0 = arith.constant 0 : i32
    %c0_i32_1 = arith.constant 0 : i32
    return %arg0, %c0_i32, %c0_i32_0 : i32, i32, i32
  }
  func.func @transform_1(%arg0: i32, %arg1: i32) -> (i32, i32, i32) {
    %c0_i32 = arith.constant 0 : i32
    %c0_i32_0 = arith.constant 0 : i32
    %c0_i32_1 = arith.constant 0 : i32
    return %arg0, %c0_i32, %c0_i32_0 : i32, i32, i32
  }
  func.func @transform_2(%arg0: i32, %arg1: i32) -> (i32, i32, i32) {
    %c0_i32 = arith.constant 0 : i32
    %c0_i32_0 = arith.constant 0 : i32
    %c0_i32_1 = arith.constant 0 : i32
    return %arg0, %c0_i32, %c0_i32_0 : i32, i32, i32
  }
  func.func @transform_3(%arg0: i32, %arg1: i32) -> (i32, i32, i32) {
    %c0_i32 = arith.constant 0 : i32
    %c0_i32_0 = arith.constant 0 : i32
    return %arg0, %c0_i32, %arg1 : i32, i32, i32
  }
  func.func @transform_4(%arg0: i32, %arg1: i32) -> (i32, i32, i32) {
    %c0_i32 = arith.constant 0 : i32
    %c0_i32_0 = arith.constant 0 : i32
    return %arg0, %arg1, %c0_i32 : i32, i32, i32
  }
  func.func @transform_5(%arg0: i32, %arg1: i32) -> (i32, i32, i32) {
    %c0_i32 = arith.constant 0 : i32
    %c0_i32_0 = arith.constant 0 : i32
    return %arg0, %c0_i32, %arg1 : i32, i32, i32
  }
  func.func @transform_6(%arg0: i32, %arg1: i32) -> (i32, i32, i32) {
    %c0_i32 = arith.constant 0 : i32
    %c0_i32_0 = arith.constant 0 : i32
    %c0_i32_1 = arith.constant 0 : i32
    return %arg0, %c0_i32, %c0_i32_0 : i32, i32, i32
  }
}

</mosaic_0001>

<bundles_post_ra>
// kernel: normal_loss.1
= control target key start
LH: loop header
LB: loop body
LE: loop exit
PB: predicated region body
PF: predicated region fallthrough
CT: control target
= control target key end

     0   :  { %s5473_s21 = smov 0   ;;  %s5475_s22 = smov 0   ;;  %s7926_s0 = inlined_call_operand.vmem [shape: f32[8,64,5], index: 0, kind: input, shape index: {}]   ;;  %s7927_s1 = inlined_call_operand.vmem [shape: f32[8,4,64], index: 1, kind: input, shape index: {}]   ;;  %s7928_s2 = inlined_call_operand.vmem [shape: f32[8,64,4], index: 2, kind: input, shape index: {}]   ;;  %s7929_s3 = inlined_call_operand.vmem [shape: f32[8,5,48], index: 3, kind: input, shape index: {}]   ;;  %s7930_s4 = inlined_call_operand.vmem [shape: f32[8,48,4], index: 4, kind: input, shape index: {}]   ;;  %s7931_s5 = inlined_call_operand.vmem [shape: f32[8,4,48], index: 5, kind: input, shape index: {}]   ;;  %s7932_s6 = inlined_call_operand.vmem [shape: f32[2,4,128], index: 6, kind: output, shape index: {}]  }
   0x1   :  { %s5477_s23 = smov 0  }
   0x2 LB: > { %s28_s24 = sadd.s32 1, %s5423_s22  ;;  %p4492_p0 = scmp.ge.s32.totalorder %s5427_s23, 1  ;;  %s5427_s23 = sphi %s5477_s23, %s16_s23   ;;  %s5423_s22 = sphi %s5475_s22, %s8286_s22   ;;  %s5419_s21 = sphi %s5473_s21, %s8285_s21  }
   0x3   : > { %p30_p1 = scmp.ge.s32.totalorder %s28_s24, 2  ;;  %p300_p2 = scmp.lt.s32.totalorder %s5427_s23, 3 }
   0x5   : > { %s8288_s24 = smov (%p30_p1, %s28_s24), 0  ;;  %p301_p3 = pnand %p4492_p0, %p300_p2 }
   0x7   : > { %304 = sbr.rel (%p301_p3) target bundleno = 2377 (0x949), region = 44 }
   0xe   : > { %s4493_s25 = sshll.u32 %s5419_s21, 2  ;;  %vm515_vm0 = vcmask 39936   ;;  %vm540_vm1 = vcmask 1044480   ;;  %v7935_v13 = vmov 0.0|0.0   ;;  %vm649_vm2 = vcmask 392192   ;;  %p417_p5 = scmp.lt.s32.totalorder %s5419_s21, 1 }
   0xf   : > { %p368_p4 = scmp.lt.s32.totalorder %s4493_s25, 7  ;;  %vm8022_vm3 = vcmask 7168   ;;  %v5430_v40 = vmov inf   ;;  %v495_v45 = vlaneseq  ;;  %v7933_v47 = vmov 0  }
  0x10   : > { %426 = vst.msk [vmem:[#allocation2] sm:$0xff] %vm8022_vm3, %v5430_v40  ;;  %427 = vst.msk [vmem:[#allocation2 + $0x8] sm:$0xff] %vm8022_vm3, %v5430_v40  ;;  %5257 = vset.pattern.permute.xlu1 %v7933_v47  ;;  %5258 = vset.pattern.permute.xlu0 %v7933_v47  ;;  %s8292_s21 = smov (!%p417_p5, %s5419_s21), 1 }
  0x11   : > { %s8290_s25 = smov (!%p368_p4, %s4493_s25), 7  ;;  %428 = vst.msk [vmem:[#allocation2 + $0x10] sm:$0xff] %vm8022_vm3, %v5430_v40  ;;  %429 = vst.msk [vmem:[#allocation2 + $0x18] sm:$0xff] %vm8022_vm3, %v5430_v40  ;;  %v5617_v49 = vshrl.u32 %v495_v45, 7  ;;  %s4507_s11 = sshll.u32 %s8292_s21, 2 }
  0x12   : > { %s4753_s26 = sshll.u32 %s8290_s25, 6  ;;  %s4502_s27 = sshll.u32 %s8290_s25, 3  ;;  %430 = vst.msk [vmem:[#allocation2 + $0x20] sm:$0xff] %vm8022_vm3, %v5430_v40  ;;  %431 = vst.msk [vmem:[#allocation2 + $0x28] sm:$0xff] %vm8022_vm3, %v5430_v40 }
  0x13   : > { %s5503_s30 = scalar_lea.vmem %s7926_s0, %s4753_s26  ;;  %s5508_s9 = scalar_lea.vmem %s7929_s3, %s4502_s27  ;;  %432 = vst.msk [vmem:[#allocation2 + $0x30] sm:$0xff] %vm8022_vm3, %v5430_v40  ;;  %433 = vst.msk [vmem:[#allocation2 + $0x38] sm:$0xff] %vm8022_vm3, %v5430_v40  ;;  %v5620_v52 = vadd.s32 8, %v5617_v49  ;;  %v5623_v53 = vadd.s32 16, %v5617_v49  ;;  %v5626_v54 = vadd.s32 24, %v5617_v49  ;;  %v5629_v55 = vadd.s32 32, %v5617_v49 }
  0x14   : > { %v506_v0 = vld [vmem:[%s5503_s30] sm:$0xff]  ;;  %v507_v2 = vld [vmem:[%s5503_s30 + $0x8] sm:$0xff]  ;;  %v508_v3 = vld [vmem:[%s5503_s30 + $0x10] sm:$0xff]  ;;  %434 = vst.msk [vmem:[#allocation2 + $0x40] sm:$0xff] %vm8022_vm3, %v5430_v40  ;;  %v5632_v56 = vadd.s32 40, %v5617_v49  ;;  %v5635_v57 = vadd.s32 48, %v5617_v49  ;;  %s420_s18 = scalar_lea.vmem %s7932_s6, %s4507_s11 }
  0x15   : > { %v514_v1 = vld [vmem:[%s5508_s9] sm:$0x1f]  ;;  %4885 = vmatprep.mubr.msk.f32.mxu0 %vm515_vm0, %v506_v0  ;;  %v509_v4 = vld [vmem:[%s5503_s30 + $0x18] sm:$0xff]  ;;  %v511_v6 = vld [vmem:[%s5503_s30 + $0x28] sm:$0xff]  ;;  %435 = vst.msk [vmem:[#allocation2 + $0x48] sm:$0xff] %vm8022_vm3, %v5430_v40  ;;  %v5638_v58 = vadd.s32 56, %v5617_v49 }
  0x16   : > { %4883 = vmatprep.subr.msk.mxu0 %vm540_vm1, %v514_v1  ;;  %v510_v5 = vld [vmem:[%s5503_s30 + $0x20] sm:$0xff]  ;;  %v512_v7 = vld [vmem:[%s5503_s30 + $0x30] sm:$0xff]  ;;  %v513_v8 = vld [vmem:[%s5503_s30 + $0x38] sm:$0xff]  ;;  %436 = vst.msk [vmem:[#allocation2 + $0x50] sm:$0xff] %vm8022_vm3, %v5430_v40  ;;  %s5207_s10 = smul.u32 48, %s8290_s25  ;;  %s4497_s14 = sshll.u32 %s8290_s25, 2 }
  0x17   : > { %4884 = vmatpush3.msk.msra.mxu0 %vm540_vm1, %v514_v1  ;;  %v4558_v9 = vld [vmem:[%s5508_s9 + $0x8] sm:$0x1f]  ;;  %v4550_v10 = vld [vmem:[%s5503_s30 + $0x40] sm:$0xff]  ;;  %v4552_v12 = vld [vmem:[%s5503_s30 + $0x50] sm:$0xff]  ;;  %437 = vst.msk [vmem:[#allocation2 + $0x58] sm:$0xff] %vm8022_vm3, %v5430_v40  ;;  %s6018_s17 = scalar_lea.vmem %s7927_s1, %s4497_s14  ;;  %s6554_s20 = scalar_lea.vmem %s7931_s5, %s4497_s14 }
  0x18   : > { %4886 = vmatmul.mubr.msk.f32.vlgmr.msra.gmra.mrb[0].mxu0 %vm515_vm0, %v507_v2  ;;  %v4551_v11 = vld [vmem:[%s5503_s30 + $0x48] sm:$0xff]  ;;  %4940 = vmatprep.subr.msk.mxu1 %vm540_vm1, %v4558_v9  ;;  %v4553_v14 = vld [vmem:[%s5503_s30 + $0x58] sm:$0xff]  ;;  %v4554_v15 = vld [vmem:[%s5503_s30 + $0x60] sm:$0xff]  ;;  %438 = vst.msk [vmem:[#allocation2 + $0x60] sm:$0xff] %vm8022_vm3, %v5430_v40  ;;  %s5951_s13 = scalar_lea.vmem %s7930_s4, %s5207_s10  ;;  %s5435_s25 = smov 127  }
  0x19   : > { %4888 = vmatprep.mubr.msk.f32.mxu0 %vm515_vm0, %v508_v3  ;;  %4942 = vmatprep.mubr.msk.f32.mxu1 %vm515_vm0, %v4550_v10  ;;  %v4555_v16 = vld [vmem:[%s5503_s30 + $0x68] sm:$0xff]  ;;  %v4556_v17 = vld [vmem:[%s5503_s30 + $0x70] sm:$0xff]  ;;  %v4557_v18 = vld [vmem:[%s5503_s30 + $0x78] sm:$0xff]  ;;  %439 = vst.msk [vmem:[#allocation2 + $0x68] sm:$0xff] %vm8022_vm3, %v5430_v40 }
  0x1a   : > { %4941 = vmatpush3.msk.msra.mxu1 %vm540_vm1, %v4558_v9  ;;  %5111 = vmatprep.subr.bf16.mxu0 %v7935_v13  ;;  %440 = vst.msk [vmem:[#allocation2 + $0x70] sm:$0xff] %vm8022_vm3, %v5430_v40  ;;  %441 = vst.msk [vmem:[#allocation2 + $0x78] sm:$0xff] %vm8022_vm3, %v5430_v40 }
  0x1b   : > { %4943 = vmatmul.mubr.msk.f32.vlgmr.msra.gmra.mrb[0].mxu1 %vm515_vm0, %v4551_v11  ;;  %5135 = vmatprep.subr.bf16.mxu1 %v7935_v13  ;;  %442 = vst.msk [vmem:[#allocation2 + $0x80] sm:$0xff] %vm8022_vm3, %v5430_v40  ;;  %443 = vst.msk [vmem:[#allocation2 + $0x88] sm:$0xff] %vm8022_vm3, %v5430_v40 }
  0x1c   : > { %4889 = vmatmul.mubr.msk.f32.gmra.mrb[2].mxu0 %vm515_vm0, %v509_v4  ;;  %4945 = vmatprep.mubr.msk.f32.mxu1 %vm515_vm0, %v4552_v12  ;;  %444 = vst.msk [vmem:[#allocation2 + $0x90] sm:$0xff] %vm8022_vm3, %v5430_v40  ;;  %445 = vst.msk [vmem:[#allocation2 + $0x98] sm:$0xff] %vm8022_vm3, %v5430_v40 }
  0x1d   : > { %4891 = vmatprep.mubr.msk.f32.mxu0 %vm515_vm0, %v510_v5  ;;  %446 = vst.msk [vmem:[#allocation2 + $0xa0] sm:$0xff] %vm8022_vm3, %v5430_v40  ;;  %447 = vst.msk [vmem:[#allocation2 + $0xa8] sm:$0xff] %vm8022_vm3, %v5430_v40 }
  0x1e   : > { %448 = vst.msk [vmem:[#allocation2 + $0xb0] sm:$0xff] %vm8022_vm3, %v5430_v40  ;;  %449 = vst.msk [vmem:[#allocation2 + $0xb8] sm:$0xff] %vm8022_vm3, %v5430_v40 }
  0x1f   : > { %4946 = vmatmul.mubr.msk.f32.gmra.mrb[2].mxu1 %vm515_vm0, %v4553_v14  ;;  %450 = vst.msk [vmem:[#allocation2 + $0xc0] sm:$0xff] %vm8022_vm3, %v5430_v40  ;;  %451 = vst.msk [vmem:[#allocation2 + $0xc8] sm:$0xff] %vm8022_vm3, %v5430_v40 }
  0x20   : > { %4892 = vmatmul.mubr.msk.f32.gmra.mrb[4].mxu0 %vm515_vm0, %v511_v6  ;;  %4948 = vmatprep.mubr.msk.f32.mxu1 %vm515_vm0, %v4554_v15  ;;  %452 = vst.msk [vmem:[#allocation2 + $0xd0] sm:$0xff] %vm8022_vm3, %v5430_v40  ;;  %453 = vst.msk [vmem:[#allocation2 + $0xd8] sm:$0xff] %vm8022_vm3, %v5430_v40 }
  0x21   : > { %4894 = vmatprep.mubr.msk.f32.mxu0 %vm515_vm0, %v512_v7  ;;  %454 = vst.msk [vmem:[#allocation2 + $0xe0] sm:$0xff] %vm8022_vm3, %v5430_v40  ;;  %455 = vst.msk [vmem:[#allocation2 + $0xe8] sm:$0xff] %vm8022_vm3, %v5430_v40 }
  0x22   : > { %456 = vst.msk [vmem:[#allocation2 + $0xf0] sm:$0xff] %vm8022_vm3, %v5430_v40  ;;  %457 = vst.msk [vmem:[#allocation2 + $0xf8] sm:$0xff] %vm8022_vm3, %v5430_v40 }
  0x23   : > { %4949 = vmatmul.mubr.msk.f32.gmra.mrb[4].mxu1 %vm515_vm0, %v4555_v16 }
  0x24   : > { %4895 = vmatmul.mubr.msk.f32.gmra.mrb[6].mxu0 %vm515_vm0, %v513_v8  ;;  %4951 = vmatprep.mubr.msk.f32.mxu1 %vm515_vm0, %v4556_v17 }
  0x27   : > { %4952 = vmatmul.mubr.msk.f32.gmra.mrb[6].mxu1 %vm515_vm0, %v4557_v18 }
  0xeb   : > { %v5550_v19 = vpop.f32.mrb[0].mxu0 }
  0xec   : > { %v5552_v20 = vpop.f32.mrb[1].mxu0  ;;  %v651_v24 = vsel %vm649_vm2, %v5550_v19, inf }
  0xed   : > { %v650_v21 = vsel %vm649_vm2, %v5552_v20, inf }
  0xee   : > { %850 = vmin.xlane.f32.xlu0 %v650_v21 }
  0xef   : > { %v5556_v22 = vpop.f32.mrb[2].mxu0 }
  0xf0   : > { %v5558_v23 = vpop.f32.mrb[3].mxu0  ;;  %v653_v29 = vsel %vm649_vm2, %v5556_v22, inf }
  0xf1   : > { %v652_v25 = vsel %vm649_vm2, %v5558_v23, inf }
  0xf2   : > { %852 = vmin.xlane.f32.xlu0 %v651_v24  ;;  %854 = vmin.xlane.f32.xlu1 %v652_v25 }
  0xf3   : > { %v5564_v26 = vpop.f32.mrb[4].mxu0 }
  0xf4   : > { %v5566_v27 = vpop.f32.mrb[5].mxu0  ;;  %v656_v28 = vsel %vm649_vm2, %v5564_v26, inf }
  0xf5   : > { %v654_v30 = vsel %vm649_vm2, %v5566_v27, inf  ;;  %v657_v31 = vmin.f32 %v651_v24, %v656_v28 }
  0xf6   : > { %856 = vmin.xlane.f32.xlu1 %v653_v29  ;;  %858 = vmin.xlane.f32.xlu0 %v654_v30  ;;  %v655_v32 = vmin.f32 %v650_v21, %v654_v30 }
  0xf7   : > { %v5574_v33 = vpop.f32.mrb[6].mxu0 }
  0xf8   : > { %v5576_v34 = vpop.f32.mrb[7].mxu0  ;;  %v662_v35 = vmin.f32 %v655_v32, %v657_v31  ;;  %v660_v36 = vsel %vm649_vm2, %v5574_v33, inf  ;;  %v7937_v31 = vmov 1.0|1.0   ;;  %v5679_v32 = vpop.f32.mrb[0].mxu1 }
  0xf9   : > { %v658_v37 = vsel %vm649_vm2, %v5576_v34, inf  ;;  %v661_v38 = vmin.f32 %v653_v29, %v660_v36  ;;  %v5693_v40 = vsel %vm649_vm2, %v5679_v32, inf }
  0xfa   : > { %860 = vmin.xlane.f32.xlu1 %v656_v28  ;;  %862 = vmin.xlane.f32.xlu0 %v658_v37  ;;  %v659_v39 = vmin.f32 %v652_v25, %v658_v37 }
  0xfc   : > { %v663_v41 = vmin.f32 %v659_v39, %v661_v38 }
  0xfe   : > { %864 = vmin.xlane.f32.xlu1 %v660_v36  ;;  %v664_v42 = vmin.f32 %v662_v35, %v663_v41  ;;  %v5681_v35 = vpop.f32.mrb[1].mxu1 }
  0xff   : > { %v5683_v36 = vpop.f32.mrb[2].mxu1  ;;  %v5697_v41 = vsel %vm649_vm2, %v5681_v35, inf }
 0x100   : > { %v665_v43 = vrot.slane %v664_v42, 4  ;;  %v5685_v37 = vpop.f32.mrb[3].mxu1 }
 0x101   : > { %v5687_v38 = vpop.f32.mrb[4].mxu1 }
 0x102   : > { %v666_v44 = vmin.f32 %v664_v42, %v665_v43  ;;  %v5689_v39 = vpop.f32.mrb[5].mxu1  ;;  %v5701_v42 = vsel %vm649_vm2, %v5687_v38, inf }
 0x103   : > { %v5705_v43 = vsel %vm649_vm2, %v5689_v39, inf }
 0x104   : > { %v667_v46 = vrot.slane %v666_v44, 2 }
 0x106   : > { %v668_v48 = vmin.f32 %v666_v44, %v667_v46  ;;  %v5708_v44 = vand.u32 127, %v495_v45  ;;  %v5710_v46 = vld [vmem:[#allocation2] sm:$0xff]  ;;  %v5726_v45 = vpop.f32.mrb[6].mxu1 }
 0x107   : > { %8035 = vst [vmem:[#allocation5_spill] sm:$0xff] %v5710_v46  ;;  %8037 = vst [vmem:[#allocation7_spill] sm:$0xff] %v5726_v45 }
 0x108   : > { %v669_v50 = vrot.slane %v668_v48, 1 }
 0x10a   : > { %v670_v51 = vmin.f32 %v668_v48, %v669_v50  ;;  %v5714_v48 = vsel %vm649_vm2, %v5683_v36, inf  ;;  %v1409_v50 = vmin.f32 %v5693_v40, %v5701_v42 }
 0x10c   : > { %vm671_vm4 = vcmp.eq.f32.partialorder %v5552_v20, %v670_v51  ;;  %vm672_vm5 = vcmp.eq.f32.partialorder %v5550_v19, %v670_v51  ;;  %vm673_vm6 = vcmp.eq.f32.partialorder %v5558_v23, %v670_v51  ;;  %vm674_vm7 = vcmp.eq.f32.partialorder %v5556_v22, %v670_v51 }
 0x10d   : > { %vm675_vm8 = vcmp.eq.f32.partialorder %v5566_v27, %v670_v51  ;;  %vm676_vm9 = vcmp.eq.f32.partialorder %v5564_v26, %v670_v51  ;;  %vm677_vm10 = vcmp.eq.f32.partialorder %v5576_v34, %v670_v51  ;;  %vm678_vm11 = vcmp.eq.f32.partialorder %v5574_v33, %v670_v51 }
 0x10e   : > { %v679_v59 = vsel %vm671_vm4, %v5617_v49, 64  ;;  %v680_v60 = vsel %vm672_vm5, %v5620_v52, 64  ;;  %v681_v61 = vsel %vm673_vm6, %v5623_v53, 64  ;;  %v682_v62 = vsel %vm674_vm7, %v5626_v54, 64 }
 0x10f   : > { %v683_v63 = vsel %vm675_vm8, %v5629_v55, 64  ;;  %v684_v0 = vsel %vm676_vm9, %v5632_v56, 64  ;;  %v685_v1 = vsel %vm677_vm10, %v5635_v57, 64  ;;  %v686_v2 = vsel %vm678_vm11, %v5638_v58, 64 }
 0x110   : > { %v687_v3 = vsel %vm649_vm2, %v679_v59, 2147483647  ;;  %v688_v4 = vsel %vm649_vm2, %v680_v60, 2147483647  ;;  %v689_v5 = vsel %vm649_vm2, %v681_v61, 2147483647  ;;  %v1407_v51 = vmin.f32 %v5697_v41, %v5705_v43 }
 0x111   : > { %v690_v6 = vsel %vm649_vm2, %v682_v62, 2147483647  ;;  %v691_v7 = vsel %vm649_vm2, %v683_v63, 2147483647  ;;  %v694_v8 = vsel %vm649_vm2, %v684_v0, 2147483647 }
 0x112   : > { %vm692_vm12 = vcmp.lt.s32.totalorder %v687_v3, %v691_v7  ;;  %vm695_vm13 = vcmp.lt.s32.totalorder %v688_v4, %v694_v8  ;;  %v697_v9 = vsel %vm649_vm2, %v685_v1, 2147483647  ;;  %v700_v10 = vsel %vm649_vm2, %v686_v2, 2147483647  ;;  %v5734_v62 = vpop.f32.mrb[7].mxu1  ;;  %v5750_v2 = vld [vmem:[#allocation2 + $0x10] sm:$0xff] }
 0x113   : > { %v693_v11 = vsel %vm692_vm12, %v687_v3, %v691_v7  ;;  %v696_v12 = vsel %vm695_vm13, %v688_v4, %v694_v8  ;;  %vm698_vm14 = vcmp.lt.s32.totalorder %v689_v5, %v697_v9  ;;  %vm701_vm15 = vcmp.lt.s32.totalorder %v690_v6, %v700_v10  ;;  %8038 = vst [vmem:[#allocation8_spill] sm:$0xff] %v5734_v62 }
 0x114   : > { %v699_v14 = vsel %vm698_vm14, %v689_v5, %v697_v9  ;;  %v702_v15 = vsel %vm701_vm15, %v690_v6, %v700_v10  ;;  %vm703_vm4 = vcmp.lt.s32.totalorder %v693_v11, %v696_v12  ;;  %v5724_v60 = vsel %vm649_vm2, %v5685_v37, inf  ;;  %8039 = vst [vmem:[#allocation9_spill] sm:$0xff] %v5750_v2 }
 0x115   : > { %v704_v16 = vsel %vm703_vm4, %v693_v11, %v696_v12  ;;  %vm705_vm5 = vcmp.lt.s32.totalorder %v699_v14, %v702_v15  ;;  %v5732_v61 = vsel %vm649_vm2, %v5726_v45, inf  ;;  %v5743_v1 = vsel %vm649_vm2, %v5734_v62, inf }
 0x116   : > { %v706_v17 = vsel %vm705_vm5, %v699_v14, %v702_v15  ;;  %v1413_v0 = vmin.f32 %v5714_v48, %v5732_v61  ;;  %v1414_v4 = vmin.f32 %v1407_v51, %v1409_v50  ;;  %v1411_v5 = vmin.f32 %v5724_v60, %v5743_v1 }
 0x117   : > { %vm707_vm6 = vcmp.lt.s32.totalorder %v704_v16, %v706_v17 }
 0x118   : > { %v708_v18 = vsel %vm707_vm6, %v704_v16, %v706_v17  ;;  %v1415_v9 = vmin.f32 %v1411_v5, %v1413_v0 }
 0x119   : > { %v709_v21 = vrot.slane %v708_v18, 4 }
 0x11b   : > { %vm710_vm7 = vcmp.lt.s32.totalorder %v708_v18, %v709_v21 }
 0x11c   : > { %v711_v24 = vsel %vm710_vm7, %v708_v18, %v709_v21 }
 0x11d   : > { %v712_v25 = vrot.slane %v711_v24, 2 }
 0x11f   : > { %vm713_vm8 = vcmp.lt.s32.totalorder %v711_v24, %v712_v25 }
 0x120   : > { %v714_v28 = vsel %vm713_vm8, %v711_v24, %v712_v25 }
 0x121   : > { %v715_v29 = vrot.slane %v714_v28, 1 }
 0x123   : > { %vm716_vm9 = vcmp.lt.s32.totalorder %v714_v28, %v715_v29 }
 0x124   : > { %v717_v30 = vsel %vm716_vm9, %v714_v28, %v715_v29 }
 0x125   : > { %vm718_vm10 = vcmp.eq.s32.totalorder %v5617_v49, %v717_v30  ;;  %vm719_vm11 = vcmp.eq.s32.totalorder %v5620_v52, %v717_v30  ;;  %vm720_vm13 = vcmp.eq.s32.totalorder %v5623_v53, %v717_v30  ;;  %vm721_vm14 = vcmp.eq.s32.totalorder %v5626_v54, %v717_v30 }
 0x126   : > { %vm5112_vm12 = vmpackc.low %vm719_vm11, %vm718_vm10  ;;  %vm722_vm4 = vcmp.eq.s32.totalorder %v5629_v55, %v717_v30  ;;  %vm723_vm5 = vcmp.eq.s32.totalorder %v5632_v56, %v717_v30  ;;  %vm724_vm7 = vcmp.eq.s32.totalorder %v5635_v57, %v717_v30  ;;  %vm725_vm8 = vcmp.eq.s32.totalorder %v5638_v58, %v717_v30 }
 0x127   : > { %5113 = vmatpush3.bf16.msk.msra.mxu0 %vm5112_vm12, %v7937_v31  ;;  %vm5115_vm15 = vmpackc.low %vm721_vm14, %vm720_vm13 }
 0x128   : > { %5114 = vmatprep.subr.bf16.mxu0 %v7935_v13  ;;  %vm5118_vm6 = vmpackc.low %vm723_vm5, %vm722_vm4 }
 0x129   : > { %vm5121_vm9 = vmpackc.low %vm725_vm8, %vm724_vm7 }
 0x12b   : > { %5116 = vmatpush3.bf16.msk.msra.mxu0 %vm5115_vm15, %v7937_v31 }
 0x12c   : > { %5117 = vmatprep.subr.bf16.mxu0 %v7935_v13 }
 0x12f   : > { %5119 = vmatpush3.bf16.msk.msra.mxu0 %vm5118_vm6, %v7937_v31 }
 0x130   : > { %5120 = vmatprep.subr.bf16.mxu0 %v7935_v13 }
 0x133   : > { %5122 = vmatpush3.bf16.msk.msra.mxu0 %vm5121_vm9, %v7937_v31  ;;  %v5886_v31 = vld [vmem:[#allocation2 + $0x38] sm:$0xff] }
 0x134   : > { %8049 = vst [vmem:[#allocation19_spill] sm:$0xff] %v5886_v31 }
 0x17b   : > { %v5720_v59 = vpop.xlane.xlu0 %850 }
 0x17c   : > { %8036 = vst [vmem:[#allocation6_spill] sm:$0xff] %v5720_v59  ;;  %vm866_vm10 = vcmp.eq.f32.partialorder %v5552_v20, %v5720_v59  ;;  %vm1169_vm11 = vcmp.lt.f32.partialorder %v5720_v59, %v5710_v46 }
 0x17d   : > { %v874_v63 = vsel %vm866_vm10, %v5708_v44, 48  ;;  %v1177_v20 = vsel %vm1169_vm11, %v5720_v59, %v5710_v46 }
 0x17e   : > { %v5753_v3 = vsel %vm649_vm2, %v874_v63, 2147483647  ;;  %1186 = vst.msk [vmem:[#allocation2] sm:$0xff] %vm8022_vm3, %v1177_v20 }
 0x17f   : > { %v5758_v6 = vpop.xlane.xlu0 %852  ;;  %v5760_v7 = vpop.xlane.xlu1 %854  ;;  %v884_v8 = vshra.s32 %v5753_v3, 16 }
 0x180   : > { %8040 = vst [vmem:[#allocation10_spill] sm:$0xff] %v5758_v6  ;;  %8041 = vst [vmem:[#allocation11_spill] sm:$0xff] %v5760_v7  ;;  %vm867_vm12 = vcmp.eq.f32.partialorder %v5550_v19, %v5758_v6  ;;  %vm868_vm13 = vcmp.eq.f32.partialorder %v5558_v23, %v5760_v7  ;;  %vm7977_vm14 = vcmp.lt.f32.partialorder %v5760_v7, %v5750_v2 }
 0x181   : > { %v5769_v10 = vcvt.s32.f32 %v884_v8  ;;  %v875_v11 = vsel %vm867_vm12, %v5708_v44, 48  ;;  %v876_v12 = vsel %vm868_vm13, %v5708_v44, 48  ;;  %v1416_v19 = vmin.f32 %v1414_v4, %v1415_v9 }
 0x182   : > { %v5774_v14 = vsel %vm649_vm2, %v875_v11, 2147483647  ;;  %v5777_v15 = vsel %vm649_vm2, %v876_v12, 2147483647  ;;  %v1179_v23 = vsel %vm7977_vm14, %v5760_v7, %v5750_v2  ;;  %v5826_v12 = vld [vmem:[#allocation2 + $0x20] sm:$0xff] }
 0x183   : > { %v5784_v16 = vpop.xlane.xlu1 %856  ;;  %v5786_v17 = vpop.xlane.xlu0 %858  ;;  %887 = vmin.xlane.f32.xlu0 %v5769_v10  ;;  %v899_v18 = vshra.s32 %v5774_v14, 16  ;;  %v914_v21 = vshra.s32 %v5777_v15, 16  ;;  %1188 = vst.msk [vmem:[#allocation2 + $0x10] sm:$0xff] %vm8022_vm3, %v1179_v23  ;;  %v1417_v24 = vrot.slane %v1416_v19, 4  ;;  %8046 = vst [vmem:[#allocation16_spill] sm:$0xff] %v5826_v12 }
 0x184   : > { %8042 = vst [vmem:[#allocation12_spill] sm:$0xff] %v5784_v16  ;;  %8043 = vst [vmem:[#allocation13_spill] sm:$0xff] %v5786_v17  ;;  %vm869_vm15 = vcmp.eq.f32.partialorder %v5556_v22, %v5784_v16  ;;  %vm870_vm4 = vcmp.eq.f32.partialorder %v5566_v27, %v5786_v17  ;;  %vm7974_vm8 = vcmp.lt.f32.partialorder %v5786_v17, %v5826_v12 }
 0x185   : > { %v5796_v25 = vcvt.s32.f32 %v899_v18  ;;  %v5798_v28 = vcvt.s32.f32 %v914_v21  ;;  %v877_v29 = vsel %vm869_vm15, %v5708_v44, 48  ;;  %v878_v30 = vsel %vm870_vm4, %v5708_v44, 48 }
 0x186   : > { %v5803_v50 = vsel %vm649_vm2, %v877_v29, 2147483647  ;;  %v5806_v51 = vsel %vm649_vm2, %v878_v30, 2147483647  ;;  %v1418_v63 = vmin.f32 %v1416_v19, %v1417_v24  ;;  %v5844_v29 = vld [vmem:[#allocation2 + $0x28] sm:$0xff] }
 0x187   : > { %v5808_v22 = vpop.xlane.xlu1 %860  ;;  %902 = vmin.xlane.f32.xlu1 %v5796_v25  ;;  %917 = vmin.xlane.f32.xlu0 %v5798_v28  ;;  %v5812_v27 = vpop.xlane.xlu0 %862  ;;  %v929_v0 = vshra.s32 %v5803_v50, 16  ;;  %v944_v20 = vshra.s32 %v5806_v51, 16  ;;  %8048 = vst [vmem:[#allocation18_spill] sm:$0xff] %v5844_v29 }
 0x188   : > { %8044 = vst [vmem:[#allocation14_spill] sm:$0xff] %v5808_v22  ;;  %8045 = vst [vmem:[#allocation15_spill] sm:$0xff] %v5812_v27  ;;  %vm871_vm5 = vcmp.eq.f32.partialorder %v5564_v26, %v5808_v22  ;;  %vm872_vm6 = vcmp.eq.f32.partialorder %v5576_v34, %v5812_v27  ;;  %v1419_v4 = vrot.slane %v1418_v63, 2  ;;  %vm7951_vm9 = vcmp.lt.f32.partialorder %v5808_v22, %v5844_v29 }
 0x189   : > { %v5820_v5 = vcvt.s32.f32 %v929_v0  ;;  %v5822_v8 = vcvt.s32.f32 %v944_v20  ;;  %v879_v9 = vsel %vm871_vm5, %v5708_v44, 48  ;;  %v880_v11 = vsel %vm872_vm6, %v5708_v44, 48 }
 0x18a   : > { %v5829_v19 = vsel %vm649_vm2, %v879_v9, 2147483647  ;;  %v5832_v23 = vsel %vm649_vm2, %v880_v11, 2147483647  ;;  %v1420_v26 = vmin.f32 %v1418_v63, %v1419_v4  ;;  %v1182_v46 = vsel %vm7951_vm9, %v5808_v22, %v5844_v29 }
 0x18b   : > { %932 = vmin.xlane.f32.xlu1 %v5820_v5  ;;  %v5835_v34 = vpop.xlane.xlu1 %864  ;;  %947 = vmin.xlane.f32.xlu0 %v5822_v8  ;;  %v959_v18 = vshra.s32 %v5829_v19, 16  ;;  %v974_v21 = vshra.s32 %v5832_v23, 16  ;;  %1191 = vst.msk [vmem:[#allocation2 + $0x28] sm:$0xff] %vm8022_vm3, %v1182_v46 }
 0x18c   : > { %8047 = vst [vmem:[#allocation17_spill] sm:$0xff] %v5835_v34  ;;  %vm873_vm7 = vcmp.eq.f32.partialorder %v5574_v33, %v5835_v34  ;;  %v1421_v24 = vrot.slane %v1420_v26, 1  ;;  %v1181_v33 = vsel %vm7974_vm8, %v5786_v17, %v5826_v12  ;;  %v5888_v12 = vld [vmem:[#allocation2 + $0x8] sm:$0xff] }
 0x18d   : > { %v5846_v30 = vcvt.s32.f32 %v959_v18  ;;  %v5848_v63 = vcvt.s32.f32 %v974_v21  ;;  %v881_v0 = vsel %vm873_vm7, %v5708_v44, 48  ;;  %1190 = vst.msk [vmem:[#allocation2 + $0x20] sm:$0xff] %vm8022_vm3, %v1181_v33  ;;  %8050 = vst [vmem:[#allocation20_spill] sm:$0xff] %v5888_v12 }
 0x18e   : > { %v5852_v20 = vsel %vm649_vm2, %v881_v0, 2147483647  ;;  %v1422_v4 = vmin.f32 %v1420_v26, %v1421_v24 }
 0x18f   : > { %962 = vmin.xlane.f32.xlu1 %v5846_v30  ;;  %977 = vmin.xlane.f32.xlu0 %v5848_v63  ;;  %v989_v9 = vshra.s32 %v5852_v20, 16 }
 0x190   : > { %vm1423_vm10 = vcmp.eq.f32.partialorder %v5681_v35, %v1422_v4  ;;  %vm1424_vm12 = vcmp.eq.f32.partialorder %v5679_v32, %v1422_v4  ;;  %vm1425_vm13 = vcmp.eq.f32.partialorder %v5685_v37, %v1422_v4  ;;  %vm1426_vm15 = vcmp.eq.f32.partialorder %v5683_v36, %v1422_v4 }
 0x191   : > { %v5869_v11 = vcvt.s32.f32 %v989_v9  ;;  %vm1427_vm4 = vcmp.eq.f32.partialorder %v5689_v39, %v1422_v4  ;;  %vm1428_vm5 = vcmp.eq.f32.partialorder %v5687_v38, %v1422_v4  ;;  %vm1429_vm6 = vcmp.eq.f32.partialorder %v5734_v62, %v1422_v4  ;;  %v5902_v62 = vld [vmem:[#allocation2 + $0x18] sm:$0xff] }
 0x192   : > { %vm1430_vm7 = vcmp.eq.f32.partialorder %v5726_v45, %v1422_v4  ;;  %v1431_v26 = vsel %vm1423_vm10, %v5617_v49, 64  ;;  %v1432_v18 = vsel %vm1424_vm12, %v5620_v52, 64  ;;  %v1433_v21 = vsel %vm1425_vm13, %v5623_v53, 64  ;;  %8051 = vst [vmem:[#allocation21_spill] sm:$0xff] %v5902_v62 }
 0x193   : > { %992 = vmin.xlane.f32.xlu1 %v5869_v11  ;;  %v1434_v24 = vsel %vm1426_vm15, %v5626_v54, 64  ;;  %v1435_v0 = vsel %vm1427_vm4, %v5629_v55, 64  ;;  %v1436_v33 = vsel %vm1428_vm5, %v5632_v56, 64  ;;  %v1437_v9 = vsel %vm1429_vm6, %v5635_v57, 64 }
 0x194   : > { %v1438_v47 = vsel %vm1430_vm7, %v5638_v58, 64  ;;  %v1439_v4 = vsel %vm649_vm2, %v1431_v26, 2147483647  ;;  %v1440_v13 = vsel %vm649_vm2, %v1432_v18, 2147483647  ;;  %vm7949_vm6 = vcmp.lt.f32.partialorder %v5835_v34, %v5886_v31 }
 0x195   : > { %v1441_v17 = vsel %vm649_vm2, %v1433_v21, 2147483647  ;;  %v1442_v2 = vsel %vm649_vm2, %v1434_v24, 2147483647  ;;  %v1443_v7 = vsel %vm649_vm2, %v1435_v0, 2147483647  ;;  %vm7948_vm7 = vcmp.lt.f32.partialorder %v5758_v6, %v5888_v12 }
 0x196   : > { %vm1444_vm10 = vcmp.lt.s32.totalorder %v1439_v4, %v1443_v7  ;;  %v1446_v26 = vsel %vm649_vm2, %v1436_v33, 2147483647  ;;  %v1449_v18 = vsel %vm649_vm2, %v1437_v9, 2147483647  ;;  %v1452_v59 = vsel %vm649_vm2, %v1438_v47, 2147483647 }
 0x197   : > { %v1445_v21 = vsel %vm1444_vm10, %v1439_v4, %v1443_v7  ;;  %vm1447_vm12 = vcmp.lt.s32.totalorder %v1440_v13, %v1446_v26  ;;  %vm1450_vm13 = vcmp.lt.s32.totalorder %v1441_v17, %v1449_v18  ;;  %vm1453_vm15 = vcmp.lt.s32.totalorder %v1442_v2, %v1452_v59  ;;  %v5908_v47 = vld [vmem:[#allocation2 + $0x30] sm:$0xff] }
 0x198   : > { %v1448_v24 = vsel %vm1447_vm12, %v1440_v13, %v1446_v26  ;;  %v1451_v0 = vsel %vm1450_vm13, %v1441_v17, %v1449_v18  ;;  %v1454_v45 = vsel %vm1453_vm15, %v1442_v2, %v1452_v59  ;;  %8052 = vst [vmem:[#allocation22_spill] sm:$0xff] %v5908_v47  ;;  %v1184_v13 = vsel %vm7949_vm6, %v5835_v34, %v5886_v31 }
 0x199   : > { %vm1455_vm4 = vcmp.lt.s32.totalorder %v1445_v21, %v1448_v24  ;;  %vm1457_vm5 = vcmp.lt.s32.totalorder %v1451_v0, %v1454_v45  ;;  %1193 = vst.msk [vmem:[#allocation2 + $0x38] sm:$0xff] %vm8022_vm3, %v1184_v13  ;;  %v1178_v59 = vsel %vm7948_vm7, %v5758_v6, %v5888_v12  ;;  %vm7947_vm12 = vcmp.lt.f32.partialorder %v5784_v16, %v5902_v62 }
 0x19a   : > { %v1456_v46 = vsel %vm1455_vm4, %v1445_v21, %v1448_v24  ;;  %v1458_v7 = vsel %vm1457_vm5, %v1451_v0, %v1454_v45  ;;  %1187 = vst.msk [vmem:[#allocation2 + $0x8] sm:$0xff] %vm8022_vm3, %v1178_v59  ;;  %v1180_v45 = vsel %vm7947_vm12, %v5784_v16, %v5902_v62  ;;  %vm7950_vm13 = vcmp.lt.f32.partialorder %v5812_v27, %v5908_v47 }
 0x19b   : > { %vm1459_vm10 = vcmp.lt.s32.totalorder %v1456_v46, %v1458_v7  ;;  %1189 = vst.msk [vmem:[#allocation2 + $0x18] sm:$0xff] %vm8022_vm3, %v1180_v45  ;;  %v1183_v33 = vsel %vm7950_vm13, %v5812_v27, %v5908_v47  ;;  %v8053_v24 = vmov 1.0|1.0   ;;  %v8054_v0 = vmov 0.0|0.0  }
 0x19c   : > { %v1460_v2 = vsel %vm1459_vm10, %v1456_v46, %v1458_v7  ;;  %1192 = vst.msk [vmem:[#allocation2 + $0x30] sm:$0xff] %vm8022_vm3, %v1183_v33  ;;  %v1026_v46 = vld [vmem:[%s5951_s13] sm:$0xff]  ;;  %v1027_v7 = vld [vmem:[%s5951_s13 + $0x8] sm:$0xff]  ;;  %v7953_v13 = vmov 0.0   ;;  %v898_v33 = vand.u32 65535, %v5774_v14 }
 0x19d   : > { %v1461_v17 = vrot.slane %v1460_v2, 4  ;;  %491 = vst [vmem:[#allocation4] sm:$0x1] %v7953_v13  ;;  %492 = vst [vmem:[#allocation4 + $0x1] sm:$0x1] %v7953_v13  ;;  %v5123_v59 = vpack.c.bf16 %v1027_v7, %v1026_v46  ;;  %v943_v7 = vand.u32 65535, %v5806_v51 }
 0x19e   : > { %493 = vst [vmem:[#allocation4 + $0x2] sm:$0x1] %v7953_v13  ;;  %494 = vst [vmem:[#allocation4 + $0x3] sm:$0x1] %v7953_v13  ;;  %v973_v51 = vand.u32 65535, %v5832_v23 }
 0x19f   : > { %vm1462_vm15 = vcmp.lt.s32.totalorder %v1460_v2, %v1461_v17  ;;  %5124 = vmatprep.subr.bf16.mxu0 %v5123_v59 }
 0x1a0   : > { %v1463_v9 = vsel %vm1462_vm15, %v1460_v2, %v1461_v17  ;;  %v883_v2 = vand.u32 65535, %v5753_v3  ;;  %v928_v3 = vand.u32 65535, %v5803_v50  ;;  %v958_v50 = vand.u32 65535, %v5829_v19 }
 0x1a1   : > { %v1464_v4 = vrot.slane %v1463_v9, 2  ;;  %v988_v19 = vand.u32 65535, %v5852_v20 }
 0x1a2   : > { %v885_v17 = vcvt.s32.f32 %v883_v2 }
 0x1a3   : > { %vm1465_vm4 = vcmp.lt.s32.totalorder %v1463_v9, %v1464_v4 }
 0x1a4   : > { %v1466_v26 = vsel %vm1465_vm4, %v1463_v9, %v1464_v4  ;;  %v913_v9 = vand.u32 65535, %v5777_v15 }
 0x1a5   : > { %v1467_v18 = vrot.slane %v1466_v26, 1 }
 0x1a6   : > { %v915_v46 = vcvt.s32.f32 %v913_v9 }
 0x1a7   : > { %vm1468_vm5 = vcmp.lt.s32.totalorder %v1466_v26, %v1467_v18 }
 0x1a8   : > { %v1469_v21 = vsel %vm1468_vm5, %v1466_v26, %v1467_v18  ;;  %vm8012_vm5 = vmmov 0  }
 0x1a9   : > { %vm1470_vm10 = vcmp.eq.s32.totalorder %v5617_v49, %v1469_v21  ;;  %vm1471_vm12 = vcmp.eq.s32.totalorder %v5620_v52, %v1469_v21  ;;  %vm1472_vm7 = vcmp.eq.s32.totalorder %v5623_v53, %v1469_v21  ;;  %vm1473_vm6 = vcmp.eq.s32.totalorder %v5626_v54, %v1469_v21  ;;  %4913 = vmatprep.mubr.msk.f32.mxu0 %vm8012_vm5, %v7953_v13 }
 0x1aa   : > { %vm5136_vm13 = vmpackc.low %vm1471_vm12, %vm1470_vm10  ;;  %vm1474_vm4 = vcmp.eq.s32.totalorder %v5629_v55, %v1469_v21  ;;  %vm1475_vm9 = vcmp.eq.s32.totalorder %v5632_v56, %v1469_v21  ;;  %4970 = vmatprep.mubr.msk.f32.mxu1 %vm8012_vm5, %v7953_v13 }
 0x1ab   : > { %5137 = vmatpush3.bf16.msk.msra.mxu1 %vm5136_vm13, %v8053_v24  ;;  %vm5139_vm15 = vmpackc.low %vm1473_vm6, %vm1472_vm7  ;;  %vm1476_vm13 = vcmp.eq.s32.totalorder %v5635_v57, %v1469_v21  ;;  %vm1477_vm6 = vcmp.eq.s32.totalorder %v5638_v58, %v1469_v21  ;;  %v900_v21 = vcvt.s32.f32 %v898_v33  ;;  %v945_v33 = vcvt.s32.f32 %v943_v7  ;;  %v742_v7 = vld [vmem:[%s6018_s17] sm:$0xf] }
 0x1ac   : > { %5138 = vmatprep.subr.bf16.mxu1 %v8054_v0  ;;  %vm5142_vm12 = vmpackc.low %vm1475_vm9, %vm1474_vm4 }
 0x1ad   : > { %vm5145_vm7 = vmpackc.low %vm1477_vm6, %vm1476_vm13 }
 0x1af   : > { %5140 = vmatpush3.bf16.msk.msra.mxu1 %vm5139_vm15, %v8053_v24 }
 0x1b0   : > { %5141 = vmatprep.subr.bf16.mxu1 %v8054_v0 }
 0x1b3   : > { %5143 = vmatpush3.bf16.msk.msra.mxu1 %vm5142_vm12, %v8053_v24 }
 0x1b4   : > { %5144 = vmatprep.subr.bf16.mxu1 %v8054_v0 }
 0x1b7   : > { %5146 = vmatpush3.bf16.msk.msra.mxu1 %vm5145_vm7, %v8053_v24 }
 0x210   : > { %v5970_v45 = vpop.xlane.xlu0 %887 }
 0x211   : > { %vm889_vm9 = vcmp.eq.f32.partialorder %v5769_v10, %v5970_v45 }
 0x212   : > { %v890_v4 = vsel %vm889_vm9, %v885_v17, inf  ;;  %v930_v17 = vcvt.s32.f32 %v928_v3  ;;  %v990_v3 = vcvt.s32.f32 %v988_v19  ;;  %vm8011_vm9 = vcmask 523264  }
 0x213   : > { %891 = vmin.xlane.f32.xlu0 %v890_v4  ;;  %4914 = vmatmul.mubr.msk.f32.vlgmr.msra.gmra.mrb[8].mxu0 %vm8011_vm9, %v742_v7 }
 0x214   : > { %v5976_v26 = vpop.xlane.xlu1 %902  ;;  %v5978_v18 = vpop.xlane.xlu0 %917  ;;  %5126 = vmatpush3.bf16.msra.mxu0 %v5123_v59 }
 0x215   : > { %vm904_vm10 = vcmp.eq.f32.partialorder %v5796_v25, %v5976_v26  ;;  %vm919_vm15 = vcmp.eq.f32.partialorder %v5798_v28, %v5978_v18  ;;  %v909_v59 = vcvt.f32.s32 %v5976_v26 }
 0x216   : > { %v905_v14 = vsel %vm904_vm10, %v900_v21, inf  ;;  %v920_v10 = vsel %vm919_vm15, %v915_v46, inf  ;;  %v960_v21 = vcvt.s32.f32 %v958_v50  ;;  %v975_v46 = vcvt.s32.f32 %v973_v51 }
 0x217   : > { %906 = vmin.xlane.f32.xlu1 %v905_v14  ;;  %921 = vmin.xlane.f32.xlu0 %v920_v10  ;;  %v910_v51 = vshll.u32 %v909_v59, 16 }
 0x218   : > { %v5986_v15 = vpop.xlane.xlu1 %932  ;;  %v5988_v2 = vpop.xlane.xlu0 %947 }
 0x219   : > { %vm934_vm4 = vcmp.eq.f32.partialorder %v5820_v5, %v5986_v15  ;;  %vm949_vm12 = vcmp.eq.f32.partialorder %v5822_v8, %v5988_v2 }
 0x21a   : > { %v935_v25 = vsel %vm934_vm4, %v930_v17, inf  ;;  %v950_v28 = vsel %vm949_vm12, %v945_v33, inf }
 0x21b   : > { %936 = vmin.xlane.f32.xlu1 %v935_v25  ;;  %951 = vmin.xlane.f32.xlu0 %v950_v28 }
 0x21c   : > { %v5996_v9 = vpop.xlane.xlu1 %962  ;;  %v5998_v4 = vpop.xlane.xlu0 %977 }
 0x21d   : > { %vm964_vm13 = vcmp.eq.f32.partialorder %v5846_v30, %v5996_v9  ;;  %vm979_vm6 = vcmp.eq.f32.partialorder %v5848_v63, %v5998_v4  ;;  %v1028_v30 = vld [vmem:[%s5951_s13 + $0x10] sm:$0xff]  ;;  %v1029_v63 = vld [vmem:[%s5951_s13 + $0x18] sm:$0xff] }
 0x21e   : > { %v965_v5 = vsel %vm964_vm13, %v960_v21, inf  ;;  %v980_v8 = vsel %vm979_vm6, %v975_v46, inf  ;;  %v5127_v14 = vpack.c.bf16 %v1029_v63, %v1028_v30 }
 0x21f   : > { %966 = vmin.xlane.f32.xlu1 %v965_v5  ;;  %981 = vmin.xlane.f32.xlu0 %v980_v8  ;;  %v969_v8 = vcvt.f32.s32 %v5996_v9 }
 0x220   : > { %v6005_v23 = vpop.xlane.xlu1 %992  ;;  %5128 = vmatprep.subr.bf16.mxu0 %v5127_v14 }
 0x221   : > { %vm994_vm7 = vcmp.eq.f32.partialorder %v5869_v11, %v6005_v23  ;;  %v1031_v11 = vld [vmem:[%s5951_s13 + $0x28] sm:$0xff]  ;;  %5130 = vmatpush3.bf16.msra.mxu0 %v5127_v14 }
 0x222   : > { %v995_v20 = vsel %vm994_vm7, %v990_v3, inf }
 0x223   : > { %996 = vmin.xlane.f32.xlu1 %v995_v20  ;;  %1603 = vmin.xlane.f32.xlu0 %v5697_v41  ;;  %v1030_v41 = vld [vmem:[%s5951_s13 + $0x20] sm:$0xff] }
 0x224   : > { %v5131_v10 = vpack.c.bf16 %v1031_v11, %v1030_v41  ;;  %v970_v11 = vshll.u32 %v969_v8, 16 }
 0x226   : > { %5132 = vmatprep.subr.bf16.mxu0 %v5131_v10 }
 0x227   : > { %1605 = vmin.xlane.f32.xlu1 %v5693_v40  ;;  %1607 = vmin.xlane.f32.xlu0 %v5724_v60  ;;  %v4617_v40 = vld [vmem:[%s5508_s9 + $0x10] sm:$0x1f]  ;;  %v894_v60 = vcvt.f32.s32 %v5970_v45 }
 0x228   : > { %5134 = vmatpush3.bf16.msra.mxu0 %v5131_v10 }
 0x229   : > { %4997 = vmatprep.subr.msk.mxu0 %vm540_vm1, %v4617_v40 }
 0x22b   : > { %1609 = vmin.xlane.f32.xlu1 %v5714_v48  ;;  %1611 = vmin.xlane.f32.xlu0 %v5705_v43  ;;  %v895_v48 = vshll.u32 %v894_v60, 16  ;;  %v924_v43 = vcvt.f32.s32 %v5978_v18 }
 0x22d   : > { %v925_v28 = vshll.u32 %v924_v43, 16 }
 0x22f   : > { %1613 = vmin.xlane.f32.xlu1 %v5701_v42  ;;  %1615 = vmin.xlane.f32.xlu0 %v5743_v1  ;;  %v939_v42 = vcvt.f32.s32 %v5986_v15  ;;  %v954_v1 = vcvt.f32.s32 %v5988_v2  ;;  %v984_v15 = vcvt.f32.s32 %v5998_v4  ;;  %v999_v4 = vcvt.f32.s32 %v6005_v23  ;;  %v6056_v23 = vld [vmem:[#allocation2 + $0x40] sm:$0xff] }
 0x230   : > { %8055 = vst [vmem:[#allocation23_spill] sm:$0xff] %v6056_v23 }
 0x231   : > { %v940_v18 = vshll.u32 %v939_v42, 16  ;;  %v955_v5 = vshll.u32 %v954_v1, 16  ;;  %v985_v9 = vshll.u32 %v984_v15, 16 }
 0x233   : > { %1617 = vmin.xlane.f32.xlu1 %v5732_v61 }
 0x2a0   : > { %v892_v17 = vpop.xlane.xlu0 %891 }
 0x2a1   : > { %v893_v33 = vcvt.f32.s32 %v892_v17 }
 0x2a3   : > { %v896_v50 = vadd.s32 %v895_v48, %v893_v33 }
 0x2a4   : > { %v907_v25 = vpop.xlane.xlu1 %906  ;;  %v922_v61 = vpop.xlane.xlu0 %921 }
 0x2a5   : > { %v908_v21 = vcvt.f32.s32 %v907_v25  ;;  %v923_v46 = vcvt.f32.s32 %v922_v61  ;;  %vm1002_vm10 = vcmp.eq.s32.totalorder %v5708_v44, %v896_v50 }
 0x2a6   : > { %v4534_v45 = vsel %vm1002_vm10, 1.0, %v7953_v13 }
 0x2a7   : > { %v911_v26 = vadd.s32 %v910_v51, %v908_v21  ;;  %v926_v19 = vadd.s32 %v925_v28, %v923_v46  ;;  %4928 = vmatprep.mubr.msk.f32.mxu0 %vm649_vm2, %v4534_v45  ;;  %v1000_v51 = vshll.u32 %v999_v4, 16  ;;  %v6070_v21 = vld [vmem:[#allocation2 + $0x48] sm:$0xff] }
 0x2a8   : > { %v937_v2 = vpop.xlane.xlu1 %936  ;;  %v952_v3 = vpop.xlane.xlu0 %951  ;;  %8057 = vst [vmem:[#allocation25_spill] sm:$0xff] %v6070_v21 }
 0x2a9   : > { %vm1003_vm15 = vcmp.eq.s32.totalorder %v5708_v44, %v911_v26  ;;  %v938_v20 = vcvt.f32.s32 %v937_v2  ;;  %v953_v30 = vcvt.f32.s32 %v952_v3  ;;  %vm1004_vm4 = vcmp.eq.s32.totalorder %v5708_v44, %v926_v19 }
 0x2aa   : > { %v4535_v63 = vsel %vm1003_vm15, 1.0, %v7953_v13  ;;  %v4536_v7 = vsel %vm1004_vm4, 1.0, %v7953_v13 }
 0x2ab   : > { %v941_v14 = vadd.s32 %v940_v18, %v938_v20  ;;  %v956_v41 = vadd.s32 %v955_v5, %v953_v30  ;;  %4929 = vmatmul.mubr.msk.f32.vlgmr.msra.gmra.mrb[10].mxu0 %vm649_vm2, %v4535_v63  ;;  %v4609_v5 = vld [vmem:[%s5503_s30 + $0x80] sm:$0xff]  ;;  %v6101_v20 = vld [vmem:[#allocation2 + $0x50] sm:$0xff] }
 0x2ac   : > { %v967_v10 = vpop.xlane.xlu1 %966  ;;  %v982_v60 = vpop.xlane.xlu0 %981  ;;  %4931 = vmatprep.mubr.msk.f32.mxu0 %vm649_vm2, %v4536_v7  ;;  %4998 = vmatpush3.msk.msra.mxu0 %vm540_vm1, %v4617_v40  ;;  %8060 = vst [vmem:[#allocation28_spill] sm:$0xff] %v6101_v20 }
 0x2ad   : > { %v968_v59 = vcvt.f32.s32 %v967_v10  ;;  %v983_v17 = vcvt.f32.s32 %v982_v60  ;;  %vm1005_vm12 = vcmp.eq.s32.totalorder %v5708_v44, %v941_v14  ;;  %vm1006_vm13 = vcmp.eq.s32.totalorder %v5708_v44, %v956_v41  ;;  %v4610_v14 = vld [vmem:[%s5503_s30 + $0x88] sm:$0xff]  ;;  %v4611_v10 = vld [vmem:[%s5503_s30 + $0x90] sm:$0xff] }
 0x2ae   : > { %v4537_v48 = vsel %vm1005_vm12, 1.0, %v7953_v13  ;;  %v4538_v43 = vsel %vm1006_vm13, 1.0, %v7953_v13 }
 0x2af   : > { %v971_v33 = vadd.s32 %v970_v11, %v968_v59  ;;  %v986_v50 = vadd.s32 %v985_v9, %v983_v17  ;;  %4932 = vmatmul.mubr.msk.f32.gmra.mrb[12].mxu0 %vm649_vm2, %v4537_v48 }
 0x2b0   : > { %v997_v42 = vpop.xlane.xlu1 %996  ;;  %v6058_v1 = vpop.xlane.xlu0 %1603  ;;  %4934 = vmatprep.mubr.msk.f32.mxu0 %vm649_vm2, %v4538_v43  ;;  %v4612_v43 = vld [vmem:[%s5503_s30 + $0x98] sm:$0xff] }
 0x2b1   : > { %8056 = vst [vmem:[#allocation24_spill] sm:$0xff] %v6058_v1  ;;  %v998_v40 = vcvt.f32.s32 %v997_v42  ;;  %vm1007_vm6 = vcmp.eq.s32.totalorder %v5708_v44, %v971_v33  ;;  %vm1008_vm7 = vcmp.eq.s32.totalorder %v5708_v44, %v986_v50  ;;  %vm1619_vm10 = vcmp.eq.f32.partialorder %v5681_v35, %v6058_v1 }
 0x2b2   : > { %v4539_v25 = vsel %vm1007_vm6, 1.0, %v7953_v13  ;;  %v4540_v61 = vsel %vm1008_vm7, 1.0, %v7953_v13  ;;  %v1627_v28 = vsel %vm1619_vm10, %v5708_v44, 48  ;;  %vm7973_vm15 = vcmp.lt.f32.partialorder %v6058_v1, %v6056_v23 }
 0x2b3   : > { %v1001_v46 = vadd.s32 %v1000_v51, %v998_v40  ;;  %4935 = vmatmul.mubr.msk.f32.gmra.mrb[14].mxu0 %vm649_vm2, %v4539_v25  ;;  %v6074_v45 = vsel %vm649_vm2, %v1627_v28, 2147483647  ;;  %v1932_v35 = vsel %vm7973_vm15, %v6058_v1, %v6056_v23  ;;  %v8065_v51 = vld [vmem:[#allocation8_spill] sm:$0xff] }
 0x2b4   : > { %v6081_v26 = vpop.xlane.xlu1 %1605  ;;  %v6083_v19 = vpop.xlane.xlu0 %1607  ;;  %4937 = vmatprep.mubr.msk.f32.mxu0 %vm649_vm2, %v4540_v61  ;;  %v1637_v18 = vshra.s32 %v6074_v45, 16  ;;  %1940 = vst.msk [vmem:[#allocation2 + $0x40] sm:$0xff] %vm8022_vm3, %v1932_v35  ;;  %v4613_v61 = vld [vmem:[%s5503_s30 + $0xa0] sm:$0xff] }
 0x2b5   : > { %8058 = vst [vmem:[#allocation26_spill] sm:$0xff] %v6081_v26  ;;  %8059 = vst [vmem:[#allocation27_spill] sm:$0xff] %v6083_v19  ;;  %vm1009_vm4 = vcmp.eq.s32.totalorder %v5708_v44, %v1001_v46  ;;  %vm1620_vm12 = vcmp.eq.f32.partialorder %v5679_v32, %v6081_v26  ;;  %vm1621_vm13 = vcmp.eq.f32.partialorder %v5685_v37, %v6083_v19  ;;  %v6174_v35 = vld [vmem:[#allocation2 + $0x60] sm:$0xff] }
 0x2b6   : > { %vm7972_vm6 = vcmp.lt.f32.partialorder %v6081_v26, %v6070_v21  ;;  %v4541_v8 = vsel %vm1009_vm4, 1.0, %v7953_v13  ;;  %v6097_v15 = vcvt.s32.f32 %v1637_v18  ;;  %v1628_v2 = vsel %vm1620_vm12, %v5708_v44, 48  ;;  %8067 = vst [vmem:[#allocation33_spill] sm:$0xff] %v6174_v35 }
 0x2b7   : > { %v1629_v3 = vsel %vm1621_vm13, %v5708_v44, 48  ;;  %4938 = vmatmul.mubr.msk.f32.gmra.mrb[16].mxu0 %vm649_vm2, %v4541_v8  ;;  %v6105_v32 = vsel %vm649_vm2, %v1628_v2, 2147483647  ;;  %v1933_v30 = vsel %vm7972_vm6, %v6081_v26, %v6070_v21  ;;  %vm7971_vm4 = vcmp.lt.f32.partialorder %v6083_v19, %v6101_v20  ;;  %v6183_v8 = vld [vmem:[#allocation2 + $0x68] sm:$0xff] }
 0x2b8   : > { %v6108_v37 = vsel %vm649_vm2, %v1629_v3, 2147483647  ;;  %v6115_v63 = vpop.xlane.xlu1 %1609  ;;  %1640 = vmin.xlane.f32.xlu0 %v6097_v15  ;;  %v6118_v7 = vpop.xlane.xlu0 %1611  ;;  %4999 = vmatprep.mubr.msk.f32.mxu0 %vm515_vm0, %v4609_v5  ;;  %v1652_v41 = vshra.s32 %v6105_v32, 16  ;;  %1941 = vst.msk [vmem:[#allocation2 + $0x48] sm:$0xff] %vm8022_vm3, %v1933_v30  ;;  %v1934_v42 = vsel %vm7971_vm4, %v6083_v19, %v6101_v20  ;;  %8068 = vst [vmem:[#allocation34_spill] sm:$0xff] %v6183_v8  ;;  %v4614_v3 = vld [vmem:[%s5503_s30 + $0xa8] sm:$0xff] }
 0x2b9   : > { %8061 = vst [vmem:[#allocation29_spill] sm:$0xff] %v6115_v63  ;;  %8062 = vst [vmem:[#allocation30_spill] sm:$0xff] %v6118_v7  ;;  %v1667_v11 = vshra.s32 %v6108_v37, 16  ;;  %vm1622_vm7 = vcmp.eq.f32.partialorder %v5683_v36, %v6115_v63  ;;  %vm1623_vm10 = vcmp.eq.f32.partialorder %v5689_v39, %v6118_v7  ;;  %v1651_v13 = vand.u32 65535, %v6105_v32 }
 0x2ba   : > { %v6131_v9 = vcvt.s32.f32 %v1652_v41  ;;  %v1630_v60 = vsel %vm1622_vm7, %v5708_v44, 48  ;;  %v1631_v59 = vsel %vm1623_vm10, %v5708_v44, 48  ;;  %1942 = vst.msk [vmem:[#allocation2 + $0x50] sm:$0xff] %vm8022_vm3, %v1934_v42  ;;  %v8070_v41 = vld [vmem:[#allocation7_spill] sm:$0xff] }
 0x2bb   : > { %v6133_v4 = vcvt.s32.f32 %v1667_v11  ;;  %5000 = vmatmul.mubr.msk.f32.vlgmr.msra.gmra.mrb[18].mxu0 %vm515_vm0, %v4610_v14  ;;  %v6140_v36 = vsel %vm649_vm2, %v1630_v60, 2147483647  ;;  %v6143_v39 = vsel %vm649_vm2, %v1631_v59, 2147483647  ;;  %v4615_v60 = vld [vmem:[%s5503_s30 + $0xb0] sm:$0xff]  ;;  %v4616_v42 = vld [vmem:[%s5503_s30 + $0xb8] sm:$0xff] }
 0x2bc   : > { %1655 = vmin.xlane.f32.xlu1 %v6131_v9  ;;  %v6146_v17 = vpop.xlane.xlu1 %1613  ;;  %v6149_v48 = vpop.xlane.xlu0 %1615  ;;  %v1682_v33 = vshra.s32 %v6140_v36, 16  ;;  %v1697_v50 = vshra.s32 %v6143_v39, 16  ;;  %5002 = vmatprep.mubr.msk.f32.mxu0 %vm515_vm0, %v4611_v10 }
 0x2bd   : > { %8063 = vst [vmem:[#allocation31_spill] sm:$0xff] %v6146_v17  ;;  %1670 = vmin.xlane.f32.xlu0 %v6133_v4  ;;  %8064 = vst [vmem:[#allocation32_spill] sm:$0xff] %v6149_v48  ;;  %vm1624_vm12 = vcmp.eq.f32.partialorder %v5687_v38, %v6146_v17  ;;  %vm1625_vm13 = vcmp.eq.f32.partialorder %v8065_v51, %v6149_v48  ;;  %v6172_v38 = vld [vmem:[#allocation2 + $0x58] sm:$0xff] }
 0x2be   : > { %v6164_v40 = vcvt.s32.f32 %v1682_v33  ;;  %v6166_v25 = vcvt.s32.f32 %v1697_v50  ;;  %v1632_v28 = vsel %vm1624_vm12, %v5708_v44, 48  ;;  %v1633_v46 = vsel %vm1625_vm13, %v5708_v44, 48  ;;  %8066 = vst [vmem:[#allocation8_spill] sm:$0xff] %v6172_v38  ;;  %v6209_v33 = vld [vmem:[#allocation2 + $0x78] sm:$0xff] }
 0x2bf   : > { %5003 = vmatmul.mubr.msk.f32.gmra.mrb[20].mxu0 %vm515_vm0, %v4612_v43  ;;  %v6178_v18 = vsel %vm649_vm2, %v1632_v28, 2147483647  ;;  %v6181_v5 = vsel %vm649_vm2, %v1633_v46, 2147483647  ;;  %vm7952_vm10 = vcmp.lt.f32.partialorder %v6115_v63, %v6172_v38  ;;  %vm7959_vm12 = vcmp.lt.f32.partialorder %v6118_v7, %v6174_v35  ;;  %v6207_v43 = vld [vmem:[#allocation2 + $0x70] sm:$0xff]  ;;  %8072 = vst [vmem:[#allocation36_spill] sm:$0xff] %v6209_v33 }
 0x2c0   : > { %1685 = vmin.xlane.f32.xlu1 %v6164_v40  ;;  %v6186_v2 = vpop.xlane.xlu1 %1617  ;;  %v1712_v30 = vshra.s32 %v6178_v18, 16  ;;  %v1727_v14 = vshra.s32 %v6181_v5, 16  ;;  %5005 = vmatprep.mubr.msk.f32.mxu0 %vm515_vm0, %v4613_v61  ;;  %vm7958_vm13 = vcmp.lt.f32.partialorder %v6146_v17, %v6183_v8  ;;  %8071 = vst [vmem:[#allocation7_spill] sm:$0xff] %v6207_v43  ;;  %v1935_v51 = vsel %vm7952_vm10, %v6115_v63, %v6172_v38 }
 0x2c1   : > { %8069 = vst [vmem:[#allocation35_spill] sm:$0xff] %v6186_v2  ;;  %1700 = vmin.xlane.f32.xlu0 %v6166_v25  ;;  %vm1626_vm7 = vcmp.eq.f32.partialorder %v8070_v41, %v6186_v2  ;;  %1943 = vst.msk [vmem:[#allocation2 + $0x58] sm:$0xff] %vm8022_vm3, %v1935_v51  ;;  %v1936_v28 = vsel %vm7959_vm12, %v6118_v7, %v6174_v35  ;;  %v1937_v46 = vsel %vm7958_vm13, %v6146_v17, %v6183_v8  ;;  %v4595_v51 = vld [vmem:[%s5951_s13 + $0x30] sm:$0xff] }
 0x2c2   : > { %v6199_v11 = vcvt.s32.f32 %v1712_v30  ;;  %v6201_v10 = vcvt.s32.f32 %v1727_v14  ;;  %v1634_v59 = vsel %vm1626_vm7, %v5708_v44, 48  ;;  %1944 = vst.msk [vmem:[#allocation2 + $0x60] sm:$0xff] %vm8022_vm3, %v1936_v28  ;;  %vm7957_vm7 = vcmp.lt.f32.partialorder %v6149_v48, %v6207_v43  ;;  %1945 = vst.msk [vmem:[#allocation2 + $0x68] sm:$0xff] %vm8022_vm3, %v1937_v46 }
 0x2c3   : > { %5006 = vmatmul.mubr.msk.f32.gmra.mrb[22].mxu0 %vm515_vm0, %v4614_v3  ;;  %v6213_v50 = vsel %vm649_vm2, %v1634_v59, 2147483647  ;;  %vm7955_vm10 = vcmp.lt.f32.partialorder %v6186_v2, %v6209_v33  ;;  %v1938_v30 = vsel %vm7957_vm7, %v6149_v48, %v6207_v43  ;;  %v4576_v59 = vld [vmem:[%s6018_s17 + $0x4] sm:$0xf]  ;;  %v1636_v28 = vand.u32 65535, %v6074_v45 }
 0x2c4   : > { %1715 = vmin.xlane.f32.xlu1 %v6199_v11  ;;  %v1742_v61 = vshra.s32 %v6213_v50, 16  ;;  %5008 = vmatprep.mubr.msk.f32.mxu0 %vm515_vm0, %v4615_v60  ;;  %1946 = vst.msk [vmem:[#allocation2 + $0x70] sm:$0xff] %vm8022_vm3, %v1938_v30  ;;  %v1939_v14 = vsel %vm7955_vm10, %v6186_v2, %v6209_v33  ;;  %v1681_v45 = vand.u32 65535, %v6140_v36  ;;  %v1711_v36 = vand.u32 65535, %v6178_v18 }
 0x2c5   : > { %1730 = vmin.xlane.f32.xlu0 %v6201_v10  ;;  %1947 = vst.msk [vmem:[#allocation2 + $0x78] sm:$0xff] %vm8022_vm3, %v1939_v14  ;;  %4971 = vmatmul.mubr.msk.f32.vlgmr.msra.gmra.mrb[8].mxu1 %vm8011_vm9, %v4576_v59  ;;  %v1638_v30 = vcvt.s32.f32 %v1636_v28  ;;  %v1666_v14 = vand.u32 65535, %v6108_v37 }
 0x2c6   : > { %v6241_v3 = vcvt.s32.f32 %v1742_v61  ;;  %v4596_v61 = vld [vmem:[%s5951_s13 + $0x38] sm:$0xff] }
 0x2c7   : > { %5009 = vmatmul.mubr.msk.f32.gmra.mrb[24].mxu0 %vm515_vm0, %v4616_v42  ;;  %v5147_v42 = vpack.c.bf16 %v4596_v61, %v4595_v51  ;;  %v1653_v51 = vcvt.s32.f32 %v1651_v13  ;;  %v1668_v61 = vcvt.s32.f32 %v1666_v14  ;;  %v1683_v13 = vcvt.s32.f32 %v1681_v45 }
 0x2c8   : > { %1745 = vmin.xlane.f32.xlu1 %v6241_v3 }
 0x2c9   : > { %5148 = vmatprep.subr.bf16.mxu1 %v5147_v42 }
 0x2ca   : > { %5150 = vmatpush3.bf16.msra.mxu1 %v5147_v42  ;;  %v1696_v42 = vand.u32 65535, %v6143_v39  ;;  %v1726_v39 = vand.u32 65535, %v6181_v5  ;;  %v1741_v5 = vand.u32 65535, %v6213_v50  ;;  %v4597_v50 = vld [vmem:[%s5951_s13 + $0x40] sm:$0xff] }
 0x2cc   : > { %v1728_v18 = vcvt.s32.f32 %v1726_v39  ;;  %v1743_v45 = vcvt.s32.f32 %v1741_v5 }
 0x2e6   : > { %v6258_v41 = vpop.f32.mrb[8].mxu0 }
 0x2e7   : > { %v4915_v60 = vpop.f32.mrb[9].mxu0 }
 0x345   : > { %v6265_v46 = vpop.xlane.xlu0 %1640 }
 0x346   : > { %vm1642_vm10 = vcmp.eq.f32.partialorder %v6097_v15, %v6265_v46 }
 0x347   : > { %v1643_v60 = vsel %vm1642_vm10, %v1638_v30, inf  ;;  %v1698_v30 = vcvt.s32.f32 %v1696_v42 }
 0x348   : > { %1644 = vmin.xlane.f32.xlu0 %v1643_v60 }
 0x349   : > { %v6271_v33 = vpop.xlane.xlu1 %1655 }
 0x34a   : > { %v6273_v59 = vpop.xlane.xlu0 %1670  ;;  %vm1657_vm7 = vcmp.eq.f32.partialorder %v6131_v9, %v6271_v33 }
 0x34b   : > { %vm1672_vm13 = vcmp.eq.f32.partialorder %v6133_v4, %v6273_v59  ;;  %v1658_v32 = vsel %vm1657_vm7, %v1653_v51, inf  ;;  %v1713_v51 = vcvt.s32.f32 %v1711_v36 }
 0x34c   : > { %v1673_v15 = vsel %vm1672_vm13, %v1668_v61, inf  ;;  %1659 = vmin.xlane.f32.xlu1 %v1658_v32  ;;  %v4598_v32 = vld [vmem:[%s5951_s13 + $0x48] sm:$0xff] }
 0x34d   : > { %1674 = vmin.xlane.f32.xlu0 %v1673_v15  ;;  %v6281_v37 = vpop.xlane.xlu1 %1685  ;;  %v4599_v15 = vld [vmem:[%s5951_s13 + $0x50] sm:$0xff] }
 0x34e   : > { %v6283_v28 = vpop.xlane.xlu0 %1700  ;;  %vm1687_vm10 = vcmp.eq.f32.partialorder %v6164_v40, %v6281_v37 }
 0x34f   : > { %vm1702_vm12 = vcmp.eq.f32.partialorder %v6166_v25, %v6283_v28  ;;  %v1688_v9 = vsel %vm1687_vm10, %v1683_v13, inf  ;;  %vm8030_vm10 = vcmask 31744  }
 0x350   : > { %v1703_v4 = vsel %vm1702_vm12, %v1698_v30, inf  ;;  %1689 = vmin.xlane.f32.xlu1 %v1688_v9  ;;  %v8073_v30 = vmov 0  }
 0x351   : > { %1704 = vmin.xlane.f32.xlu0 %v1703_v4  ;;  %v6291_v14 = vpop.xlane.xlu1 %1715  ;;  %v1202_v9 = vsel %vm1169_vm11, 1, %v8073_v30 }
 0x352   : > { %v6293_v60 = vpop.xlane.xlu0 %1730  ;;  %vm1717_vm13 = vcmp.eq.f32.partialorder %v6199_v11, %v6291_v14  ;;  %v5151_v11 = vpack.c.bf16 %v4598_v32, %v4597_v50 }
 0x353   : > { %vm1732_vm7 = vcmp.eq.f32.partialorder %v6201_v10, %v6293_v60  ;;  %v1718_v40 = vsel %vm1717_vm13, %v1713_v51, inf  ;;  %v4600_v10 = vld [vmem:[%s5951_s13 + $0x58] sm:$0xff] }
 0x354   : > { %v1733_v25 = vsel %vm1732_vm7, %v1728_v18, inf  ;;  %1719 = vmin.xlane.f32.xlu1 %v1718_v40  ;;  %5152 = vmatprep.subr.bf16.mxu1 %v5151_v11  ;;  %v5155_v13 = vpack.c.bf16 %v4600_v10, %v4599_v15 }
 0x355   : > { %1734 = vmin.xlane.f32.xlu0 %v1733_v25  ;;  %v6300_v61 = vpop.xlane.xlu1 %1745  ;;  %5154 = vmatpush3.bf16.msra.mxu1 %v5151_v11 }
 0x356   : > { %vm1747_vm12 = vcmp.eq.f32.partialorder %v6241_v3, %v6300_v61  ;;  %5156 = vmatprep.subr.bf16.mxu1 %v5155_v13  ;;  %v8076_v3 = vmov 0.0  }
 0x357   : > { %v1748_v42 = vsel %vm1747_vm12, %v1743_v45, inf  ;;  %459 = vst.msk [vmem:[#allocation3] sm:$0xff] %vm8030_vm10, %v8076_v3  ;;  %460 = vst.msk [vmem:[#allocation3 + $0x8] sm:$0xff] %vm8030_vm10, %v8076_v3 }
 0x358   : > { %1749 = vmin.xlane.f32.xlu1 %v1748_v42  ;;  %461 = vst.msk [vmem:[#allocation3 + $0x10] sm:$0xff] %vm8030_vm10, %v8076_v3  ;;  %462 = vst.msk [vmem:[#allocation3 + $0x18] sm:$0xff] %vm8030_vm10, %v8076_v3 }
 0x359   : > { %5158 = vmatpush3.bf16.msra.mxu1 %v5155_v13  ;;  %463 = vst.msk [vmem:[#allocation3 + $0x20] sm:$0xff] %vm8030_vm10, %v8076_v3  ;;  %464 = vst.msk [vmem:[#allocation3 + $0x28] sm:$0xff] %vm8030_vm10, %v8076_v3 }
 0x35a   : > { %5159 = vmatprep.subr.bf16.mxu1 %v8054_v0  ;;  %465 = vst.msk [vmem:[#allocation3 + $0x30] sm:$0xff] %vm8030_vm10, %v8076_v3  ;;  %466 = vst.msk [vmem:[#allocation3 + $0x38] sm:$0xff] %vm8030_vm10, %v8076_v3 }
 0x35b   : > { %467 = vst.msk [vmem:[#allocation3 + $0x40] sm:$0xff] %vm8030_vm10, %v8076_v3  ;;  %468 = vst.msk [vmem:[#allocation3 + $0x48] sm:$0xff] %vm8030_vm10, %v8076_v3 }
 0x35c   : > { %469 = vst.msk [vmem:[#allocation3 + $0x50] sm:$0xff] %vm8030_vm10, %v8076_v3  ;;  %470 = vst.msk [vmem:[#allocation3 + $0x58] sm:$0xff] %vm8030_vm10, %v8076_v3 }
 0x35d   : > { %471 = vst.msk [vmem:[#allocation3 + $0x60] sm:$0xff] %vm8030_vm10, %v8076_v3  ;;  %472 = vst.msk [vmem:[#allocation3 + $0x68] sm:$0xff] %vm8030_vm10, %v8076_v3 }
 0x35e   : > { %473 = vst.msk [vmem:[#allocation3 + $0x70] sm:$0xff] %vm8030_vm10, %v8076_v3  ;;  %474 = vst.msk [vmem:[#allocation3 + $0x78] sm:$0xff] %vm8030_vm10, %v8076_v3 }
 0x35f   : > { %475 = vst.msk [vmem:[#allocation3 + $0x80] sm:$0xff] %vm8030_vm10, %v8076_v3  ;;  %476 = vst.msk [vmem:[#allocation3 + $0x88] sm:$0xff] %vm8030_vm10, %v8076_v3 }
 0x360   : > { %477 = vst.msk [vmem:[#allocation3 + $0x90] sm:$0xff] %vm8030_vm10, %v8076_v3  ;;  %478 = vst.msk [vmem:[#allocation3 + $0x98] sm:$0xff] %vm8030_vm10, %v8076_v3 }
 0x361   : > { %479 = vst.msk [vmem:[#allocation3 + $0xa0] sm:$0xff] %vm8030_vm10, %v8076_v3  ;;  %480 = vst.msk [vmem:[#allocation3 + $0xa8] sm:$0xff] %vm8030_vm10, %v8076_v3 }
 0x362   : > { %481 = vst.msk [vmem:[#allocation3 + $0xb0] sm:$0xff] %vm8030_vm10, %v8076_v3  ;;  %482 = vst.msk [vmem:[#allocation3 + $0xb8] sm:$0xff] %vm8030_vm10, %v8076_v3 }
 0x363   : > { %483 = vst.msk [vmem:[#allocation3 + $0xc0] sm:$0xff] %vm8030_vm10, %v8076_v3  ;;  %484 = vst.msk [vmem:[#allocation3 + $0xc8] sm:$0xff] %vm8030_vm10, %v8076_v3 }
 0x364   : > { %485 = vst.msk [vmem:[#allocation3 + $0xd0] sm:$0xff] %vm8030_vm10, %v8076_v3  ;;  %486 = vst.msk [vmem:[#allocation3 + $0xd8] sm:$0xff] %vm8030_vm10, %v8076_v3 }
 0x365   : > { %487 = vst.msk [vmem:[#allocation3 + $0xe0] sm:$0xff] %vm8030_vm10, %v8076_v3  ;;  %488 = vst.msk [vmem:[#allocation3 + $0xe8] sm:$0xff] %vm8030_vm10, %v8076_v3 }
 0x366   : > { %489 = vst.msk [vmem:[#allocation3 + $0xf0] sm:$0xff] %vm8030_vm10, %v8076_v3  ;;  %490 = vst.msk [vmem:[#allocation3 + $0xf8] sm:$0xff] %vm8030_vm10, %v8076_v3 }
 0x369   : > { %1211 = vperm.xlu1 %5257, %v1202_v9  }
 0x37e   : > { %v6377_v4 = vpop.f32.mrb[10].mxu0 }
 0x37f   : > { %8077 = vst [vmem:[#allocation6_spill] sm:$0xff] %v6377_v4  ;;  %v6379_v51 = vpop.f32.mrb[11].mxu0 }
 0x382   : > { %v6381_v18 = vpop.f32.mrb[12].mxu0 }
 0x383   : > { %8078 = vst [vmem:[#allocation5_spill] sm:$0xff] %v6381_v18  ;;  %v6383_v5 = vpop.f32.mrb[13].mxu0 }
 0x386   : > { %v6385_v40 = vpop.f32.mrb[14].mxu0 }
 0x387   : > { %8079 = vst [vmem:[#allocation37_spill] sm:$0xff] %v6385_v40  ;;  %v6387_v25 = vpop.f32.mrb[15].mxu0 }
 0x388   : > { %8080 = vst [vmem:[#allocation38_spill] sm:$0xff] %v6387_v25 }
 0x38a   : > { %v6389_v45 = vpop.f32.mrb[16].mxu0 }
 0x38b   : > { %8081 = vst [vmem:[#allocation39_spill] sm:$0xff] %v6389_v45  ;;  %v6391_v42 = vpop.f32.mrb[17].mxu0 }
 0x38c   : > { %8082 = vst [vmem:[#allocation40_spill] sm:$0xff] %v6391_v42 }
 0x38e   : > { %v6393_v50 = vpop.f32.mrb[18].mxu0 }
 0x38f   : > { %v2157_v32 = vsel %vm649_vm2, %v6393_v50, inf  ;;  %v6397_v11 = vpop.f32.mrb[19].mxu0 }
 0x390   : > { %2359 = vmin.xlane.f32.xlu0 %v2157_v32  ;;  %v2156_v15 = vsel %vm649_vm2, %v6397_v11, inf }
 0x392   : > { %v6401_v10 = vpop.f32.mrb[20].mxu0 }
 0x393   : > { %v6403_v13 = vpop.f32.mrb[21].mxu0  ;;  %v2159_v36 = vsel %vm649_vm2, %v6401_v10, inf }
 0x394   : > { %2357 = vmin.xlane.f32.xlu0 %v2156_v15  ;;  %v2158_v45 = vsel %vm649_vm2, %v6403_v13, inf }
 0x396   : > { %v6407_v39 = vpop.f32.mrb[22].mxu0 }
 0x397   : > { %v6409_v9 = vpop.f32.mrb[23].mxu0  ;;  %v2162_v42 = vsel %vm649_vm2, %v6407_v39, inf }
 0x398   : > { %2363 = vmin.xlane.f32.xlu0 %v2159_v36  ;;  %v2163_v18 = vmin.f32 %v2157_v32, %v2162_v42  ;;  %v2160_v4 = vsel %vm649_vm2, %v6409_v9, inf }
 0x399   : > { %v2161_v40 = vmin.f32 %v2156_v15, %v2160_v4 }
 0x39a   : > { %v6417_v25 = vpop.f32.mrb[24].mxu0 }
 0x39b   : > { %v6419_v2 = vpop.f32.mrb[25].mxu0  ;;  %v2168_v43 = vmin.f32 %v2161_v40, %v2163_v18  ;;  %v2166_v48 = vsel %vm649_vm2, %v6417_v25, inf }
 0x39c   : > { %2361 = vmin.xlane.f32.xlu0 %v2158_v45  ;;  %v2164_v8 = vsel %vm649_vm2, %v6419_v2, inf  ;;  %v2167_v32 = vmin.f32 %v2159_v36, %v2166_v48 }
 0x39d   : > { %v2165_v17 = vmin.f32 %v2158_v45, %v2164_v8 }
 0x39f   : > { %v2169_v35 = vmin.f32 %v2165_v17, %v2167_v32 }
 0x3a0   : > { %2367 = vmin.xlane.f32.xlu0 %v2162_v42 }
 0x3a1   : > { %v2170_v7 = vmin.f32 %v2168_v43, %v2169_v35 }
 0x3a3   : > { %v2171_v38 = vrot.slane %v2170_v7, 4 }
 0x3a4   : > { %2365 = vmin.xlane.f32.xlu0 %v2160_v4 }
 0x3a5   : > { %v2172_v15 = vmin.f32 %v2170_v7, %v2171_v38 }
 0x3a7   : > { %v2173_v63 = vrot.slane %v2172_v15, 2 }
 0x3a8   : > { %2369 = vmin.xlane.f32.xlu0 %v2164_v8 }
 0x3a9   : > { %v2174_v20 = vmin.f32 %v2172_v15, %v2173_v63 }
 0x3ab   : > { %v2175_v19 = vrot.slane %v2174_v20, 1 }
 0x3ac   : > { %2371 = vmin.xlane.f32.xlu0 %v2166_v48 }
 0x3ad   : > { %v2176_v18 = vmin.f32 %v2174_v20, %v2175_v19 }
 0x3af   : > { %vm2177_vm11 = vcmp.eq.f32.partialorder %v6397_v11, %v2176_v18  ;;  %vm2178_vm13 = vcmp.eq.f32.partialorder %v6393_v50, %v2176_v18  ;;  %vm2179_vm7 = vcmp.eq.f32.partialorder %v6403_v13, %v2176_v18  ;;  %vm2180_vm12 = vcmp.eq.f32.partialorder %v6401_v10, %v2176_v18 }
 0x3b0   : > { %vm2181_vm4 = vcmp.eq.f32.partialorder %v6409_v9, %v2176_v18  ;;  %vm2182_vm6 = vcmp.eq.f32.partialorder %v6407_v39, %v2176_v18  ;;  %vm2183_vm15 = vcmp.eq.f32.partialorder %v6419_v2, %v2176_v18  ;;  %vm2184_vm8 = vcmp.eq.f32.partialorder %v6417_v25, %v2176_v18 }
 0x3b1   : > { %v2185_v63 = vsel %vm2177_vm11, %v5617_v49, 64  ;;  %v2186_v19 = vsel %vm2178_vm13, %v5620_v52, 64  ;;  %v2187_v20 = vsel %vm2179_vm7, %v5623_v53, 64  ;;  %v2188_v7 = vsel %vm2180_vm12, %v5626_v54, 64 }
 0x3b2   : > { %v2189_v17 = vsel %vm2181_vm4, %v5629_v55, 64  ;;  %v2190_v48 = vsel %vm2182_vm6, %v5632_v56, 64  ;;  %v2191_v38 = vsel %vm2183_vm15, %v5635_v57, 64  ;;  %v2192_v35 = vsel %vm2184_vm8, %v5638_v58, 64 }
 0x3b3   : > { %v2193_v8 = vsel %vm649_vm2, %v2185_v63, 2147483647  ;;  %v2194_v43 = vsel %vm649_vm2, %v2186_v19, 2147483647  ;;  %v2195_v4 = vsel %vm649_vm2, %v2187_v20, 2147483647 }
 0x3b4   : > { %v2196_v40 = vsel %vm649_vm2, %v2188_v7, 2147483647  ;;  %v2197_v45 = vsel %vm649_vm2, %v2189_v17, 2147483647  ;;  %v2200_v42 = vsel %vm649_vm2, %v2190_v48, 2147483647 }
 0x3b5   : > { %vm2198_vm11 = vcmp.lt.s32.totalorder %v2193_v8, %v2197_v45  ;;  %vm2201_vm4 = vcmp.lt.s32.totalorder %v2194_v43, %v2200_v42  ;;  %v2203_v36 = vsel %vm649_vm2, %v2191_v38, 2147483647  ;;  %v2206_v32 = vsel %vm649_vm2, %v2192_v35, 2147483647 }
 0x3b6   : > { %v2199_v15 = vsel %vm2198_vm11, %v2193_v8, %v2197_v45  ;;  %v2202_v18 = vsel %vm2201_vm4, %v2194_v43, %v2200_v42  ;;  %vm2204_vm8 = vcmp.lt.s32.totalorder %v2195_v4, %v2203_v36  ;;  %vm2207_vm15 = vcmp.lt.s32.totalorder %v2196_v40, %v2206_v32 }
 0x3b7   : > { %v2205_v63 = vsel %vm2204_vm8, %v2195_v4, %v2203_v36  ;;  %v2208_v19 = vsel %vm2207_vm15, %v2196_v40, %v2206_v32  ;;  %vm2209_vm6 = vcmp.lt.s32.totalorder %v2199_v15, %v2202_v18  ;;  %v1647_v35 = vcvt.f32.s32 %v6265_v46 }
 0x3b8   : > { %v2210_v20 = vsel %vm2209_vm6, %v2199_v15, %v2202_v18  ;;  %vm2211_vm13 = vcmp.lt.s32.totalorder %v2205_v63, %v2208_v19  ;;  %v1662_v43 = vcvt.f32.s32 %v6271_v33  ;;  %v1677_v4 = vcvt.f32.s32 %v6273_v59 }
 0x3b9   : > { %v2212_v7 = vsel %vm2211_vm13, %v2205_v63, %v2208_v19  ;;  %v1648_v45 = vshll.u32 %v1647_v35, 16  ;;  %v1692_v36 = vcvt.f32.s32 %v6281_v37 }
 0x3ba   : > { %vm2213_vm7 = vcmp.lt.s32.totalorder %v2210_v20, %v2212_v7  ;;  %v1663_v15 = vshll.u32 %v1662_v43, 16  ;;  %v1678_v18 = vshll.u32 %v1677_v4, 16 }
 0x3bb   : > { %v2214_v17 = vsel %vm2213_vm7, %v2210_v20, %v2212_v7  ;;  %v1693_v20 = vshll.u32 %v1692_v36, 16  ;;  %v1722_v7 = vcvt.f32.s32 %v6291_v14  ;;  %v1752_v36 = vcvt.f32.s32 %v6300_v61 }
 0x3bc   : > { %v2215_v21 = vrot.slane %v2214_v17, 4 }
 0x3be   : > { %vm2216_vm12 = vcmp.lt.s32.totalorder %v2214_v17, %v2215_v21 }
 0x3bf   : > { %v2217_v48 = vsel %vm2216_vm12, %v2214_v17, %v2215_v21  ;;  %v1707_v21 = vcvt.f32.s32 %v6283_v28  ;;  %v1737_v28 = vcvt.f32.s32 %v6293_v60 }
 0x3c0   : > { %v2218_v26 = vrot.slane %v2217_v48, 2 }
 0x3c2   : > { %vm2219_vm14 = vcmp.lt.s32.totalorder %v2217_v48, %v2218_v26 }
 0x3c3   : > { %v2220_v38 = vsel %vm2219_vm14, %v2217_v48, %v2218_v26  ;;  %v1708_v48 = vshll.u32 %v1707_v21, 16 }
 0x3c4   : > { %v2221_v8 = vrot.slane %v2220_v38, 1 }
 0x3c6   : > { %vm2222_vm11 = vcmp.lt.s32.totalorder %v2220_v38, %v2221_v8 }
 0x3c7   : > { %v6455_v33 = vsel %vm2222_vm11, %v2220_v38, %v2221_v8 }
 0x3c8   : > { %vm2224_vm4 = vcmp.eq.s32.totalorder %v5617_v49, %v6455_v33  ;;  %vm2225_vm8 = vcmp.eq.s32.totalorder %v5620_v52, %v6455_v33  ;;  %vm2226_vm7 = vcmp.eq.s32.totalorder %v5623_v53, %v6455_v33  ;;  %vm2227_vm12 = vcmp.eq.s32.totalorder %v5626_v54, %v6455_v33 }
 0x3c9   : > { %vm5160_vm13 = vmpackc.low %vm2225_vm8, %vm2224_vm4  ;;  %vm2228_vm8 = vcmp.eq.s32.totalorder %v5629_v55, %v6455_v33 }
 0x3ca   : > { %vm5163_vm4 = vmpackc.low %vm2227_vm12, %vm2226_vm7  ;;  %vm2230_vm12 = vcmp.eq.s32.totalorder %v5635_v57, %v6455_v33 }
 0x3d5   : > { %v1645_v40 = vpop.xlane.xlu0 %1644 }
 0x3d6   : > { %v1646_v42 = vcvt.f32.s32 %v1645_v40  ;;  %v1723_v40 = vshll.u32 %v1722_v7, 16 }
 0x3d8   : > { %v1649_v32 = vadd.s32 %v1648_v45, %v1646_v42  ;;  %v1738_v42 = vshll.u32 %v1737_v28, 16 }
 0x3d9   : > { %v1660_v63 = vpop.xlane.xlu1 %1659 }
 0x3da   : > { %v1675_v26 = vpop.xlane.xlu0 %1674  ;;  %v1661_v19 = vcvt.f32.s32 %v1660_v63  ;;  %vm1755_vm14 = vcmp.eq.s32.totalorder %v5708_v44, %v1649_v32 }
 0x3db   : > { %v1676_v46 = vcvt.f32.s32 %v1675_v26  ;;  %v4587_v59 = vsel %vm1755_vm14, 1.0, %v8076_v3 }
 0x3dc   : > { %v1664_v17 = vadd.s32 %v1663_v15, %v1661_v19  ;;  %4985 = vmatprep.mubr.msk.f32.mxu1 %vm649_vm2, %v4587_v59  ;;  %v1753_v59 = vshll.u32 %v1752_v36, 16  ;;  %v6531_v36 = vpop.f32.mrb[8].mxu1 }
 0x3dd   : > { %v1679_v37 = vadd.s32 %v1678_v18, %v1676_v46  ;;  %v1690_v35 = vpop.xlane.xlu1 %1689 }
 0x3de   : > { %v1705_v43 = vpop.xlane.xlu0 %1704  ;;  %vm1756_vm15 = vcmp.eq.s32.totalorder %v5708_v44, %v1664_v17  ;;  %v1691_v38 = vcvt.f32.s32 %v1690_v35 }
 0x3df   : > { %v1706_v8 = vcvt.f32.s32 %v1705_v43  ;;  %vm1757_vm6 = vcmp.eq.s32.totalorder %v5708_v44, %v1679_v37  ;;  %v4588_v14 = vsel %vm1756_vm15, 1.0, %v8076_v3  ;;  %vm2229_vm15 = vcmp.eq.s32.totalorder %v5632_v56, %v6455_v33 }
 0x3e0   : > { %v4589_v4 = vsel %vm1757_vm6, 1.0, %v8076_v3  ;;  %v1694_v60 = vadd.s32 %v1693_v20, %v1691_v38  ;;  %4986 = vmatmul.mubr.msk.f32.vlgmr.msra.gmra.mrb[10].mxu1 %vm649_vm2, %v4588_v14  ;;  %vm5166_vm7 = vmpackc.low %vm2229_vm15, %vm2228_vm8  ;;  %v4676_v38 = vld [vmem:[%s5508_s9 + $0x18] sm:$0x1f]  ;;  %v4670_v14 = vld [vmem:[%s5503_s30 + $0xd0] sm:$0xff]  ;;  %s5437_s9 = smov 125  }
 0x3e1   : > { %v1709_v45 = vadd.s32 %v1708_v48, %v1706_v8  ;;  %5161 = vmatpush3.bf16.msk.msra.mxu1 %vm5160_vm13, %v8053_v24  ;;  %v1720_v32 = vpop.xlane.xlu1 %1719  ;;  %4988 = vmatprep.mubr.msk.f32.mxu1 %vm649_vm2, %v4589_v4  ;;  %v1194_v48 = vld [vmem:[#allocation3] sm:$0xff]  ;;  %v4669_v8 = vld [vmem:[%s5503_s30 + $0xc8] sm:$0xff]  ;;  %v4671_v4 = vld [vmem:[%s5503_s30 + $0xd8] sm:$0xff] }
 0x3e2   : > { %v1735_v15 = vpop.xlane.xlu0 %1734  ;;  %v1721_v18 = vcvt.f32.s32 %v1720_v32  ;;  %5162 = vmatprep.subr.bf16.mxu1 %v8054_v0  ;;  %vm1758_vm11 = vcmp.eq.s32.totalorder %v5708_v44, %v1694_v60  ;;  %v4673_v60 = vld [vmem:[%s5503_s30 + $0xe8] sm:$0xff]  ;;  %v4972_v32 = vpop.f32.mrb[9].mxu1 }
 0x3e3   : > { %v1736_v21 = vcvt.f32.s32 %v1735_v15  ;;  %vm1759_vm14 = vcmp.eq.s32.totalorder %v5708_v44, %v1709_v45  ;;  %v4590_v61 = vsel %vm1758_vm11, 1.0, %v8076_v3  ;;  %vm2231_vm11 = vcmp.eq.s32.totalorder %v5638_v58, %v6455_v33  ;;  %v4635_v33 = vld [vmem:[%s6018_s17 + $0x8] sm:$0xf]  ;;  %v4674_v45 = vld [vmem:[%s5503_s30 + $0xf0] sm:$0xff] }
 0x3e4   : > { %v4591_v63 = vsel %vm1759_vm14, 1.0, %v8076_v3  ;;  %v1724_v26 = vadd.s32 %v1723_v40, %v1721_v18  ;;  %4989 = vmatmul.mubr.msk.f32.gmra.mrb[12].mxu1 %vm649_vm2, %v4590_v61  ;;  %vm5169_vm8 = vmpackc.low %vm2231_vm11, %vm2230_vm12  ;;  %v4672_v40 = vld [vmem:[%s5503_s30 + $0xe0] sm:$0xff]  ;;  %v6533_v15 = vld [vmem:[#allocation2 + $0x88] sm:$0xff] }
 0x3e5   : > { %v1739_v19 = vadd.s32 %v1738_v42, %v1736_v21  ;;  %5164 = vmatpush3.bf16.msk.msra.mxu1 %vm5163_vm4, %v8053_v24  ;;  %v1750_v46 = vpop.xlane.xlu1 %1749  ;;  %4991 = vmatprep.mubr.msk.f32.mxu1 %vm649_vm2, %v4591_v63  ;;  %v4675_v42 = vld [vmem:[%s5503_s30 + $0xf8] sm:$0xff]  ;;  %8083 = vst [vmem:[#allocation41_spill] sm:$0xff] %v6533_v15  ;;  %v6547_v63 = vld [vmem:[#allocation2 + $0x80] sm:$0xff] }
 0x3e6   : > { %v1751_v20 = vcvt.f32.s32 %v1750_v46  ;;  %5165 = vmatprep.subr.bf16.mxu1 %v8054_v0  ;;  %vm1760_vm6 = vcmp.eq.s32.totalorder %v5708_v44, %v1724_v26  ;;  %8085 = vst [vmem:[#allocation43_spill] sm:$0xff] %v6547_v63  ;;  %v817_v46 = vld [vmem:[%s6554_s20] sm:$0xf] }
 0x3e7   : > { %vm1761_vm13 = vcmp.eq.s32.totalorder %v5708_v44, %v1739_v19  ;;  %v4592_v7 = vsel %vm1760_vm6, 1.0, %v8076_v3 }
 0x3e8   : > { %v4593_v17 = vsel %vm1761_vm13, 1.0, %v8076_v3  ;;  %v1754_v37 = vadd.s32 %v1753_v59, %v1751_v20  ;;  %4992 = vmatmul.mubr.msk.f32.gmra.mrb[14].mxu1 %vm649_vm2, %v4592_v7 }
 0x3e9   : > { %5167 = vmatpush3.bf16.msk.msra.mxu1 %vm5166_vm7, %v8053_v24  ;;  %v1212_v28 = vpop.permute.xlu1 %1211  ;;  %4994 = vmatprep.mubr.msk.f32.mxu1 %vm649_vm2, %v4593_v17  ;;  %v6576_v17 = vld [vmem:[#allocation2 + $0x98] sm:$0xff] }
 0x3ea   : > { %vm1234_vm14 = vcmp.eq.s32.totalorder %v1212_v28, 1  ;;  %5168 = vmatprep.subr.bf16.mxu1 %v8054_v0  ;;  %vm1762_vm4 = vcmp.eq.s32.totalorder %v5708_v44, %v1754_v37  ;;  %8087 = vst [vmem:[#allocation45_spill] sm:$0xff] %v6576_v17  ;;  %v826_v28 = vmax.f32 %v817_v46, 1e-16 }
 0x3eb   : > { %v1242_v35 = vsel %vm1234_vm14, %v6379_v51, %v1194_v48  ;;  %v4594_v43 = vsel %vm1762_vm4, 1.0, %v8076_v3  ;;  %v4668_v51 = vld [vmem:[%s5503_s30 + $0xc0] sm:$0xff]  ;;  %s7178_s30 = scalar_lea.vmem %s7928_s2, %s4753_s26  ;;  %s5436_s26 = smov 126  }
 0x3ec   : > { %1251 = vst.msk [vmem:[#allocation3] sm:$0xff] %vm8030_vm10, %v1242_v35  ;;  %4995 = vmatmul.mubr.msk.f32.gmra.mrb[16].mxu1 %vm649_vm2, %v4594_v43  ;;  %v828_v35 = vmax.f32 %v6258_v41, 1e-16  ;;  %5259 = vrsqrt.f32 %v826_v28 }
 0x3ed   : > { %5170 = vmatpush3.bf16.msk.msra.mxu1 %vm5169_vm8, %v8053_v24  ;;  %5027 = vmatprep.mubr.msk.f32.mxu1 %vm8012_vm5, %v8076_v3 }
 0x3ee   : > { %5054 = vmatprep.subr.msk.mxu1 %vm540_vm1, %v4676_v38  ;;  %5261 = vrsqrt.f32 %v828_v35 }
 0x3f0   : > { %5028 = vmatmul.mubr.msk.f32.vlgmr.msra.gmra.mrb[18].mxu1 %vm8011_vm9, %v4635_v33  ;;  %v6594_v33 = vld [vmem:[#allocation2 + $0x90] sm:$0xff] }
 0x3f1   : > { %5055 = vmatpush3.msk.msra.mxu1 %vm540_vm1, %v4676_v38  ;;  %5056 = vmatprep.mubr.msk.f32.mxu1 %vm515_vm0, %v4668_v51  ;;  %8089 = vst [vmem:[#allocation47_spill] sm:$0xff] %v6594_v33 }
 0x3f4   : > { %5057 = vmatmul.mubr.msk.f32.vlgmr.msra.gmra.mrb[20].mxu1 %vm515_vm0, %v4669_v8 }
 0x3f5   : > { %5059 = vmatprep.mubr.msk.f32.mxu1 %vm515_vm0, %v4670_v14 }
 0x3f8   : > { %5060 = vmatmul.mubr.msk.f32.gmra.mrb[22].mxu1 %vm515_vm0, %v4671_v4 }
 0x3f9   : > { %5062 = vmatprep.mubr.msk.f32.mxu1 %vm515_vm0, %v4672_v40 }
 0x3fc   : > { %5063 = vmatmul.mubr.msk.f32.gmra.mrb[24].mxu1 %vm515_vm0, %v4673_v60 }
 0x3fd   : > { %5065 = vmatprep.mubr.msk.f32.mxu1 %vm515_vm0, %v4674_v45  ;;  %v6621_v45 = vld [vmem:[#allocation2 + $0xa8] sm:$0xff] }
 0x3fe   : > { %8091 = vst [vmem:[#allocation49_spill] sm:$0xff] %v6621_v45 }
 0x400   : > { %5066 = vmatmul.mubr.msk.f32.gmra.mrb[26].mxu1 %vm515_vm0, %v4675_v42 }
 0x41d   : > { %v6535_v18 = vpop.xlane.xlu0 %2359 }
 0x41e   : > { %8084 = vst [vmem:[#allocation42_spill] sm:$0xff] %v6535_v18  ;;  %vm2374_vm1 = vcmp.eq.f32.partialorder %v6393_v50, %v6535_v18  ;;  %vm2679_vm15 = vcmp.lt.f32.partialorder %v6535_v18, %v6533_v15 }
 0x41f   : > { %v2382_v21 = vsel %vm2374_vm1, %v5708_v44, 48  ;;  %v2687_v61 = vsel %vm2679_vm15, %v6535_v18, %v6533_v15 }
 0x420   : > { %v6557_v50 = vsel %vm649_vm2, %v2382_v21, 2147483647  ;;  %2695 = vst.msk [vmem:[#allocation2 + $0x88] sm:$0xff] %vm8022_vm3, %v2687_v61 }
 0x421   : > { %v6560_v26 = vpop.xlane.xlu0 %2357  ;;  %v2406_v19 = vshra.s32 %v6557_v50, 16 }
 0x422   : > { %8086 = vst [vmem:[#allocation44_spill] sm:$0xff] %v6560_v26  ;;  %vm2373_vm0 = vcmp.eq.f32.partialorder %v6397_v11, %v6560_v26  ;;  %vm8018_vm6 = vcmp.lt.f32.partialorder %v6560_v26, %v6547_v63 }
 0x423   : > { %v6568_v59 = vcvt.s32.f32 %v2406_v19  ;;  %v2381_v20 = vsel %vm2373_vm0, %v5708_v44, 48  ;;  %v2686_v7 = vsel %vm8018_vm6, %v6560_v26, %v6547_v63  ;;  %v6638_v19 = vld [vmem:[#allocation2 + $0xa0] sm:$0xff] }
 0x424   : > { %v6579_v37 = vsel %vm649_vm2, %v2381_v20, 2147483647  ;;  %2694 = vst.msk [vmem:[#allocation2 + $0x80] sm:$0xff] %vm8022_vm3, %v2686_v7  ;;  %8093 = vst [vmem:[#allocation51_spill] sm:$0xff] %v6638_v19  ;;  %v818_v7 = vmul.f32 %v817_v46, %v6258_v41 }
 0x425   : > { %v6582_v11 = vpop.xlane.xlu0 %2363  ;;  %2409 = vmin.xlane.f32.xlu0 %v6568_v59  ;;  %v2391_v48 = vshra.s32 %v6579_v37, 16 }
 0x426   : > { %8088 = vst [vmem:[#allocation46_spill] sm:$0xff] %v6582_v11  ;;  %vm2376_vm13 = vcmp.eq.f32.partialorder %v6401_v10, %v6582_v11  ;;  %vm8016_vm7 = vcmp.lt.f32.partialorder %v6582_v11, %v6576_v17 }
 0x427   : > { %v6591_v43 = vcvt.s32.f32 %v2391_v48  ;;  %v2384_v38 = vsel %vm2376_vm13, %v5708_v44, 48  ;;  %v2689_v51 = vsel %vm8016_vm7, %v6582_v11, %v6576_v17 }
 0x428   : > { %v6602_v8 = vsel %vm649_vm2, %v2384_v38, 2147483647  ;;  %2697 = vst.msk [vmem:[#allocation2 + $0x98] sm:$0xff] %vm8022_vm3, %v2689_v51  ;;  %v6666_v38 = vld [vmem:[#allocation2 + $0xb0] sm:$0xff]  ;;  %v5260_v51 = vpop.eup %5259 }
 0x429   : > { %v6605_v10 = vpop.xlane.xlu0 %2361  ;;  %2394 = vmin.xlane.f32.xlu0 %v6591_v43  ;;  %v2436_v14 = vshra.s32 %v6602_v8, 16  ;;  %8095 = vst [vmem:[#allocation53_spill] sm:$0xff] %v6666_v38 }
 0x42a   : > { %8090 = vst [vmem:[#allocation48_spill] sm:$0xff] %v6605_v10  ;;  %vm2375_vm12 = vcmp.eq.f32.partialorder %v6403_v13, %v6605_v10  ;;  %vm8017_vm11 = vcmp.lt.f32.partialorder %v6605_v10, %v6594_v33 }
 0x42b   : > { %v6613_v4 = vcvt.s32.f32 %v2436_v14  ;;  %v2383_v40 = vsel %vm2375_vm12, %v5708_v44, 48  ;;  %v2688_v60 = vsel %vm8017_vm11, %v6605_v10, %v6594_v33  ;;  %v820_v14 = vrot.slane %v818_v7, 1 }
 0x42c   : > { %v6624_v42 = vsel %vm649_vm2, %v2383_v40, 2147483647  ;;  %2696 = vst.msk [vmem:[#allocation2 + $0x90] sm:$0xff] %vm8022_vm3, %v2688_v60 }
 0x42d   : > { %v6627_v13 = vpop.xlane.xlu0 %2367  ;;  %2439 = vmin.xlane.f32.xlu0 %v6613_v4  ;;  %v2421_v32 = vshra.s32 %v6624_v42, 16 }
 0x42e   : > { %8092 = vst [vmem:[#allocation50_spill] sm:$0xff] %v6627_v13  ;;  %vm2378_vm14 = vcmp.eq.f32.partialorder %v6407_v39, %v6627_v13  ;;  %vm8014_vm4 = vcmp.lt.f32.partialorder %v6627_v13, %v6621_v45 }
 0x42f   : > { %v6635_v21 = vcvt.s32.f32 %v2421_v32  ;;  %v2386_v61 = vsel %vm2378_vm14, %v5708_v44, 48  ;;  %v2691_v20 = vsel %vm8014_vm4, %v6627_v13, %v6621_v45  ;;  %v823_v45 = vrot.slane %v818_v7, 2 }
 0x430   : > { %v6647_v48 = vsel %vm649_vm2, %v2386_v61, 2147483647  ;;  %2699 = vst.msk [vmem:[#allocation2 + $0xa8] sm:$0xff] %vm8022_vm3, %v2691_v20 }
 0x431   : > { %v6650_v39 = vpop.xlane.xlu0 %2365  ;;  %2424 = vmin.xlane.f32.xlu0 %v6635_v21  ;;  %v2466_v28 = vshra.s32 %v6647_v48, 16 }
 0x432   : > { %8094 = vst [vmem:[#allocation52_spill] sm:$0xff] %v6650_v39  ;;  %vm2377_vm8 = vcmp.eq.f32.partialorder %v6409_v9, %v6650_v39  ;;  %vm8015_vm1 = vcmp.lt.f32.partialorder %v6650_v39, %v6638_v19  ;;  %v5262_v9 = vpop.eup %5261 }
 0x433   : > { %v6658_v35 = vcvt.s32.f32 %v2466_v28  ;;  %v2385_v41 = vsel %vm2377_vm8, %v5708_v44, 48  ;;  %v2690_v46 = vsel %vm8015_vm1, %v6650_v39, %v6638_v19  ;;  %v6683_v28 = vld [vmem:[#allocation2 + $0xb8] sm:$0xff]  ;;  %vm836_vm8 = vcmask 385024  }
 0x434   : > { %v6669_v40 = vsel %vm649_vm2, %v2385_v41, 2147483647  ;;  %2698 = vst.msk [vmem:[#allocation2 + $0xa0] sm:$0xff] %vm8022_vm3, %v2690_v46  ;;  %8097 = vst [vmem:[#allocation55_spill] sm:$0xff] %v6683_v28  ;;  %v822_v46 = vadd.f32 %v820_v14, %v818_v7 }
 0x435   : > { %2469 = vmin.xlane.f32.xlu0 %v6658_v35  ;;  %v6673_v60 = vpop.xlane.xlu0 %2369  ;;  %v2451_v32 = vshra.s32 %v6669_v40, 16 }
 0x436   : > { %8096 = vst [vmem:[#allocation54_spill] sm:$0xff] %v6673_v60  ;;  %vm2379_vm0 = vcmp.eq.f32.partialorder %v6419_v2, %v6673_v60  ;;  %vm8013_vm13 = vcmp.lt.f32.partialorder %v6673_v60, %v6666_v38  ;;  %v830_v2 = vmul.f32 %v5262_v9, %v5260_v51 }
 0x437   : > { %v6680_v61 = vcvt.s32.f32 %v2451_v32  ;;  %v2387_v20 = vsel %vm2379_vm0, %v5708_v44, 48  ;;  %v2692_v41 = vsel %vm8013_vm13, %v6673_v60, %v6666_v38 }
 0x438   : > { %v6691_v13 = vsel %vm649_vm2, %v2387_v20, 2147483647  ;;  %2700 = vst.msk [vmem:[#allocation2 + $0xb0] sm:$0xff] %vm8022_vm3, %v2692_v41  ;;  %v825_v20 = vadd.f32 %v823_v45, %v822_v46  ;;  %v832_v41 = vrot.slane %v830_v2, 3 }
 0x439   : > { %2454 = vmin.xlane.f32.xlu0 %v6680_v61  ;;  %v6695_v32 = vpop.xlane.xlu0 %2371  ;;  %v2481_v19 = vshra.s32 %v6691_v13, 16 }
 0x43a   : > { %8098 = vst [vmem:[#allocation56_spill] sm:$0xff] %v6695_v32  ;;  %vm2380_vm12 = vcmp.eq.f32.partialorder %v6417_v25, %v6695_v32  ;;  %vm2685_vm14 = vcmp.lt.f32.partialorder %v6695_v32, %v6683_v28  ;;  %v834_v38 = vmul.f32 %v832_v41, %v825_v20 }
 0x43b   : > { %v6702_v14 = vcvt.s32.f32 %v2481_v19  ;;  %v2388_v7 = vsel %vm2380_vm12, %v5708_v44, 48  ;;  %v2693_v51 = vsel %vm2685_vm14, %v6695_v32, %v6683_v28 }
 0x43c   : > { %v6711_v9 = vsel %vm649_vm2, %v2388_v7, 2147483647  ;;  %2701 = vst.msk [vmem:[#allocation2 + $0xb8] sm:$0xff] %vm8022_vm3, %v2693_v51  ;;  %v837_v60 = vsel %vm836_vm8, %v834_v38, 0.0 }
 0x43d   : > { %8099 = vst [vmem:[#allocation57_spill] sm:$0xff] %v6702_v14  ;;  %8100 = vst [vmem:[#allocation58_spill] sm:$0xff] %v6711_v9  ;;  %2484 = vmin.xlane.f32.xlu0 %v6702_v14  ;;  %v2496_v25 = vshra.s32 %v6711_v9, 16 }
 0x43f   : > { %v6716_v19 = vcvt.s32.f32 %v2496_v25 }
 0x441   : > { %8101 = vst [vmem:[#allocation59_spill] sm:$0xff] %v6716_v19  ;;  %2499 = vmin.xlane.f32.xlu0 %v6716_v19 }
 0x445   : > { %838 = vadd.xlane.f32.xlu0 %v837_v60 }
 0x4b2   : > { %v6720_v39 = vpop.xlane.xlu0 %2409 }
 0x4b3   : > { %v6722_v7 = vpop.f32.mrb[10].mxu1 }
 0x4b4   : > { %8102 = vst [vmem:[#allocation60_spill] sm:$0xff] %v6722_v7  ;;  %v6724_v45 = vpop.f32.mrb[11].mxu1 }
 0x4b5   : > { %8103 = vst [vmem:[#allocation61_spill] sm:$0xff] %v6724_v45 }
 0x4b6   : > { %v6726_v46 = vpop.xlane.xlu0 %2394 }
 0x4b7   : > { %v6728_v2 = vpop.f32.mrb[12].mxu1 }
 0x4b8   : > { %8104 = vst [vmem:[#allocation62_spill] sm:$0xff] %v6728_v2  ;;  %v6730_v51 = vpop.f32.mrb[13].mxu1 }
 0x4b9   : > { %8105 = vst [vmem:[#allocation63_spill] sm:$0xff] %v6730_v51 }
 0x4ba   : > { %v6732_v25 = vpop.xlane.xlu0 %2439 }
 0x4bb   : > { %v6734_v20 = vpop.f32.mrb[14].mxu1 }
 0x4bc   : > { %8106 = vst [vmem:[#allocation64_spill] sm:$0xff] %v6734_v20  ;;  %v6736_v41 = vpop.f32.mrb[15].mxu1 }
 0x4bd   : > { %8107 = vst [vmem:[#allocation65_spill] sm:$0xff] %v6736_v41 }
 0x4be   : > { %v6738_v38 = vpop.xlane.xlu0 %2424 }
 0x4bf   : > { %v6740_v60 = vpop.f32.mrb[16].mxu1 }
 0x4c0   : > { %8108 = vst [vmem:[#allocation66_spill] sm:$0xff] %v6740_v60  ;;  %v6742_v17 = vpop.f32.mrb[17].mxu1 }
 0x4c1   : > { %8109 = vst [vmem:[#allocation67_spill] sm:$0xff] %v6742_v17 }
 0x4c2   : > { %v6744_v7 = vpop.xlane.xlu0 %2469 }
 0x4c3   : > { %v6746_v45 = vpop.f32.mrb[18].mxu1 }
 0x4c4   : > { %v5029_v11 = vpop.f32.mrb[19].mxu1 }
 0x4c6   : > { %v6748_v2 = vpop.xlane.xlu0 %2454 }
 0x4c7   : > { %v6750_v51 = vpop.f32.mrb[20].mxu1 }
 0x4c8   : > { %v6752_v33 = vpop.f32.mrb[21].mxu1  ;;  %v2911_v20 = vsel %vm649_vm2, %v6750_v51, inf }
 0x4c9   : > { %3113 = vmin.xlane.f32.xlu1 %v2911_v20  ;;  %v2910_v17 = vsel %vm649_vm2, %v6752_v33, inf }
 0x4ca   : > { %v6756_v41 = vpop.xlane.xlu0 %2484 }
 0x4cb   : > { %8110 = vst [vmem:[#allocation68_spill] sm:$0xff] %v6756_v41  ;;  %v6758_v60 = vpop.f32.mrb[22].mxu1 }
 0x4cc   : > { %v6762_v10 = vpop.f32.mrb[23].mxu1  ;;  %v2913_v63 = vsel %vm649_vm2, %v6758_v60, inf }
 0x4cd   : > { %3111 = vmin.xlane.f32.xlu1 %v2910_v17  ;;  %v2912_v18 = vsel %vm649_vm2, %v6762_v10, inf }
 0x4ce   : > { %v6764_v11 = vpop.xlane.xlu0 %2499 }
 0x4cf   : > { %8111 = vst [vmem:[#allocation69_spill] sm:$0xff] %v6764_v11  ;;  %v6768_v26 = vpop.f32.mrb[24].mxu1 }
 0x4d0   : > { %v6770_v23 = vpop.f32.mrb[25].mxu1  ;;  %v2916_v1 = vsel %vm649_vm2, %v6768_v26, inf }
 0x4d1   : > { %3117 = vmin.xlane.f32.xlu1 %v2913_v63  ;;  %v2917_v28 = vmin.f32 %v2911_v20, %v2916_v1  ;;  %v2914_v32 = vsel %vm649_vm2, %v6770_v23, inf }
 0x4d2   : > { %v839_v15 = vpop.xlane.xlu0 %838  ;;  %v2915_v47 = vmin.f32 %v2910_v17, %v2914_v32 }
 0x4d3   : > { %v840_v27 = vrot.slane %v839_v15, 4  ;;  %v6778_v62 = vpop.f32.mrb[26].mxu1 }
 0x4d4   : > { %v6780_v16 = vpop.f32.mrb[27].mxu1  ;;  %v2922_v12 = vmin.f32 %v2915_v47, %v2917_v28  ;;  %v2920_v6 = vsel %vm649_vm2, %v6778_v62, inf }
 0x4d5   : > { %v841_v31 = vadd.f32 %v840_v27, %v839_v15  ;;  %3115 = vmin.xlane.f32.xlu1 %v2912_v18  ;;  %v2921_v20 = vmin.f32 %v2913_v63, %v2920_v6  ;;  %v2918_v34 = vsel %vm649_vm2, %v6780_v16, inf }
 0x4d6   : > { %v2919_v29 = vmin.f32 %v2912_v18, %v2918_v34 }
 0x4d7   : > { %v842_v22 = vrot.slane %v841_v31, 2 }
 0x4d8   : > { %v2923_v19 = vmin.f32 %v2919_v29, %v2921_v20 }
 0x4d9   : > { %3121 = vmin.xlane.f32.xlu1 %v2916_v1  ;;  %v843_v17 = vadd.f32 %v842_v22, %v841_v31 }
 0x4da   : > { %v2924_v11 = vmin.f32 %v2922_v12, %v2923_v19 }
 0x4db   : > { %v844_v9 = vrot.slane %v843_v17, 1 }
 0x4dc   : > { %v2925_v14 = vrot.slane %v2924_v11, 4 }
 0x4dd   : > { %3119 = vmin.xlane.f32.xlu1 %v2914_v32  ;;  %v845_v41 = vadd.f32 %v844_v9, %v843_v17 }
 0x4de   : > { %v2926_v47 = vmin.f32 %v2924_v11, %v2925_v14 }
 0x4df   : > { %5208 = vpush %v845_v41 }
 0x4e0   : > { %v2927_v28 = vrot.slane %v2926_v47, 2 }
 0x4e1   : > { %3125 = vmin.xlane.f32.xlu1 %v2920_v6 }
 0x4e2   : > { %v2928_v27 = vmin.f32 %v2926_v47, %v2927_v28 }
 0x4e4   : > { %v2929_v15 = vrot.slane %v2928_v27, 1 }
 0x4e5   : > { %3123 = vmin.xlane.f32.xlu1 %v2918_v34 }
 0x4e6   : > { %v2930_v63 = vmin.f32 %v2928_v27, %v2929_v15 }
 0x4e8   : > { %vm2931_vm0 = vcmp.eq.f32.partialorder %v6752_v33, %v2930_v63  ;;  %vm2932_vm12 = vcmp.eq.f32.partialorder %v6750_v51, %v2930_v63  ;;  %vm2933_vm9 = vcmp.eq.f32.partialorder %v6762_v10, %v2930_v63  ;;  %vm2934_vm5 = vcmp.eq.f32.partialorder %v6758_v60, %v2930_v63 }
 0x4e9   : > { %vm2935_vm13 = vcmp.eq.f32.partialorder %v6770_v23, %v2930_v63  ;;  %vm2936_vm4 = vcmp.eq.f32.partialorder %v6768_v26, %v2930_v63  ;;  %vm2937_vm1 = vcmp.eq.f32.partialorder %v6780_v16, %v2930_v63  ;;  %vm2938_vm7 = vcmp.eq.f32.partialorder %v6778_v62, %v2930_v63 }
 0x4ea   : > { %v2939_v31 = vsel %vm2931_vm0, %v5617_v49, 64  ;;  %v2940_v6 = vsel %vm2932_vm12, %v5620_v52, 64  ;;  %v2941_v22 = vsel %vm2933_vm9, %v5623_v53, 64  ;;  %v2942_v12 = vsel %vm2934_vm5, %v5626_v54, 64 }
 0x4eb   : > { %v2943_v34 = vsel %vm2935_vm13, %v5629_v55, 64  ;;  %v2944_v29 = vsel %vm2936_vm4, %v5632_v56, 64  ;;  %v2945_v1 = vsel %vm2937_vm1, %v5635_v57, 64  ;;  %v2946_v18 = vsel %vm2938_vm7, %v5638_v58, 64 }
 0x4ec   : > { %v2947_v32 = vsel %vm649_vm2, %v2939_v31, 2147483647  ;;  %v2948_v14 = vsel %vm649_vm2, %v2940_v6, 2147483647  ;;  %v2949_v9 = vsel %vm649_vm2, %v2941_v22, 2147483647 }
 0x4ed   : > { %v2950_v19 = vsel %vm649_vm2, %v2942_v12, 2147483647  ;;  %v2951_v41 = vsel %vm649_vm2, %v2943_v34, 2147483647  ;;  %v2954_v11 = vsel %vm649_vm2, %v2944_v29, 2147483647 }
 0x4ee   : > { %vm2952_vm5 = vcmp.lt.s32.totalorder %v2947_v32, %v2951_v41  ;;  %vm2955_vm9 = vcmp.lt.s32.totalorder %v2948_v14, %v2954_v11  ;;  %v2957_v20 = vsel %vm649_vm2, %v2945_v1, 2147483647  ;;  %v2960_v17 = vsel %vm649_vm2, %v2946_v18, 2147483647  ;;  %v8112_v22 = vld [vmem:[#allocation11_spill] sm:$0xff]  ;;  %v8113_v12 = vld [vmem:[#allocation9_spill] sm:$0xff] }
 0x4ef   : > { %v2953_v47 = vsel %vm2952_vm5, %v2947_v32, %v2951_v41  ;;  %v2956_v28 = vsel %vm2955_vm9, %v2948_v14, %v2954_v11  ;;  %vm2958_vm7 = vcmp.lt.s32.totalorder %v2949_v9, %v2957_v20  ;;  %vm2961_vm4 = vcmp.lt.s32.totalorder %v2950_v19, %v2960_v17  ;;  %v4654_v29 = vld [vmem:[%s5951_s13 + $0x60] sm:$0xff]  ;;  %v4655_v1 = vld [vmem:[%s5951_s13 + $0x68] sm:$0xff] }
 0x4f0   : > { %v2959_v27 = vsel %vm2958_vm7, %v2949_v9, %v2957_v20  ;;  %v2962_v15 = vsel %vm2961_vm4, %v2950_v19, %v2960_v17  ;;  %vm2963_vm1 = vcmp.lt.s32.totalorder %v2953_v47, %v2956_v28  ;;  %vm8114_vm12 = vcmp.lt.f32.partialorder %v8112_v22, %v8113_v12  ;;  %v835_v32 = vld [vmem:[#allocation4] sm:$0x1]  ;;  %v4659_v22 = vld [vmem:[%s5951_s13 + $0x88] sm:$0xff] }
 0x4f1   : > { %v2964_v63 = vsel %vm2963_vm1, %v2953_v47, %v2956_v28  ;;  %vm2965_vm13 = vcmp.lt.s32.totalorder %v2959_v27, %v2962_v15  ;;  %v1204_v34 = vsel %vm8114_vm12, 1, %v8073_v30  ;;  %v5171_v18 = vpack.c.bf16 %v4655_v1, %v4654_v29 }
 0x4f2   : > { %v2966_v31 = vsel %vm2965_vm13, %v2959_v27, %v2962_v15  ;;  %v2390_v19 = vand.u32 65535, %v6579_v37  ;;  %vm2396_vm5 = vcmp.eq.f32.partialorder %v6591_v43, %v6726_v46  ;;  %v2405_v11 = vand.u32 65535, %v6557_v50  ;;  %v4656_v15 = vld [vmem:[%s5951_s13 + $0x70] sm:$0xff] }
 0x4f3   : > { %vm2967_vm0 = vcmp.lt.s32.totalorder %v2964_v63, %v2966_v31  ;;  %5172 = vmatprep.subr.bf16.mxu0 %v5171_v18  ;;  %vm2411_vm9 = vcmp.eq.f32.partialorder %v6568_v59, %v6720_v39  ;;  %v2420_v47 = vand.u32 65535, %v6624_v42  ;;  %vm2426_vm7 = vcmp.eq.f32.partialorder %v6635_v21, %v6738_v38  ;;  %v4657_v42 = vld [vmem:[%s5951_s13 + $0x78] sm:$0xff] }
 0x4f4   : > { %v6810_v6 = vsel %vm2967_vm0, %v2964_v63, %v2966_v31  ;;  %5174 = vmatpush3.bf16.msra.mxu0 %v5171_v18  ;;  %v2392_v41 = vcvt.s32.f32 %v2390_v19  ;;  %v2407_v17 = vcvt.s32.f32 %v2405_v11  ;;  %v2435_v50 = vand.u32 65535, %v6602_v8  ;;  %v4658_v31 = vld [vmem:[%s5951_s13 + $0x80] sm:$0xff]  ;;  %v6835_v8 = vld [vmem:[#allocation2 + $0xc8] sm:$0xff]  ;;  %v6870_v19 = vld [vmem:[#allocation2 + $0xd8] sm:$0xff] }
 0x4f5   : > { %v2422_v37 = vcvt.s32.f32 %v2420_v47  ;;  %vm2441_vm4 = vcmp.eq.f32.partialorder %v6613_v4, %v6732_v25  ;;  %v5175_v63 = vpack.c.bf16 %v4657_v42, %v4656_v15  ;;  %v5179_v12 = vpack.c.bf16 %v4659_v22, %v4658_v31  ;;  %8115 = vst [vmem:[#allocation11_spill] sm:$0xff] %v6870_v19  ;;  %v6887_v47 = vld [vmem:[#allocation2 + $0xd0] sm:$0xff]  ;;  %v6914_v15 = vld [vmem:[#allocation2 + $0xe8] sm:$0xff] }
 0x4f6   : > { %1217 = vperm.xlu1 %5257, %v1204_v34   ;;  %v2397_v20 = vsel %vm2396_vm5, %v2392_v41, inf  ;;  %v2412_v28 = vsel %vm2411_vm9, %v2407_v17, inf  ;;  %v2437_v27 = vcvt.s32.f32 %v2435_v50  ;;  %v6844_v34 = vld [vmem:[#allocation2 + $0xc0] sm:$0xff]  ;;  %8117 = vst [vmem:[#allocation70_spill] sm:$0xff] %v6914_v15 }
 0x4f7   : > { %v2427_v43 = vsel %vm2426_vm7, %v2422_v37, inf  ;;  %5176 = vmatprep.subr.bf16.mxu0 %v5175_v63 }
 0x4f8   : > { %v2442_v59 = vsel %vm2441_vm4, %v2437_v27, inf  ;;  %5178 = vmatpush3.bf16.msra.mxu0 %v5175_v63 }
 0x4f9   : > { %5180 = vmatprep.subr.bf16.mxu0 %v5179_v12 }
 0x4fc   : > { %5182 = vmatpush3.bf16.msra.mxu0 %v5179_v12  ;;  %v6931_v12 = vld [vmem:[#allocation2 + $0xe0] sm:$0xff] }
 0x4fd   : > { %5183 = vmatprep.subr.bf16.mxu0 %v8054_v0  ;;  %8119 = vst [vmem:[#allocation72_spill] sm:$0xff] %v6931_v12 }
 0x510   : > { %s5209_s27 = spop %5208 }
 0x511   : > { %v847_v14 = vstv %s5209_s27 }
 0x512   : > { %v848_v9 = vadd.f32 %v847_v14, %v835_v32 }
 0x514   : > { %849 = vst [vmem:[#allocation4] sm:$0x1] %v848_v9 }
 0x51a   : > { %2398 = vmin.xlane.f32.xlu1 %v2397_v20 }
 0x51e   : > { %2413 = vmin.xlane.f32.xlu1 %v2412_v28 }
 0x522   : > { %2428 = vmin.xlane.f32.xlu1 %v2427_v43 }
 0x526   : > { %2443 = vmin.xlane.f32.xlu1 %v2442_v59 }
 0x556   : > { %v6837_v21 = vpop.xlane.xlu1 %3113 }
 0x557   : > { %vm3128_vm1 = vcmp.eq.f32.partialorder %v6750_v51, %v6837_v21  ;;  %vm3433_vm13 = vcmp.lt.f32.partialorder %v6837_v21, %v6835_v8 }
 0x558   : > { %v3136_v4 = vsel %vm3128_vm1, %v5708_v44, 48  ;;  %v3441_v29 = vsel %vm3433_vm13, %v6837_v21, %v6835_v8 }
 0x559   : > { %v6852_v1 = vsel %vm649_vm2, %v3136_v4, 2147483647  ;;  %3449 = vst.msk [vmem:[#allocation2 + $0xc8] sm:$0xff] %vm8022_vm3, %v3441_v29 }
 0x55a   : > { %v6855_v18 = vpop.xlane.xlu1 %3111  ;;  %v3160_v51 = vshra.s32 %v6852_v1, 16 }
 0x55b   : > { %vm3127_vm0 = vcmp.eq.f32.partialorder %v6752_v33, %v6855_v18  ;;  %vm3432_vm12 = vcmp.lt.f32.partialorder %v6855_v18, %v6844_v34 }
 0x55c   : > { %v6862_v32 = vcvt.s32.f32 %v3160_v51  ;;  %v3135_v14 = vsel %vm3127_vm0, %v5708_v44, 48  ;;  %v3440_v9 = vsel %vm3432_vm12, %v6855_v18, %v6844_v34 }
 0x55d   : > { %v6873_v41 = vsel %vm649_vm2, %v3135_v14, 2147483647  ;;  %3448 = vst.msk [vmem:[#allocation2 + $0xc0] sm:$0xff] %vm8022_vm3, %v3440_v9 }
 0x55e   : > { %v6876_v33 = vpop.xlane.xlu1 %3117  ;;  %3163 = vmin.xlane.f32.xlu1 %v6862_v32  ;;  %v3145_v11 = vshra.s32 %v6873_v41, 16 }
 0x55f   : > { %8116 = vst [vmem:[#allocation9_spill] sm:$0xff] %v6876_v33  ;;  %vm3130_vm5 = vcmp.eq.f32.partialorder %v6758_v60, %v6876_v33  ;;  %vm3435_vm9 = vcmp.lt.f32.partialorder %v6876_v33, %v6870_v19 }
 0x560   : > { %v6884_v20 = vcvt.s32.f32 %v3145_v11  ;;  %v3138_v17 = vsel %vm3130_vm5, %v5708_v44, 48  ;;  %v3443_v28 = vsel %vm3435_vm9, %v6876_v33, %v6870_v19  ;;  %v2431_v19 = vcvt.f32.s32 %v6738_v38 }
 0x561   : > { %v6895_v37 = vsel %vm649_vm2, %v3138_v17, 2147483647  ;;  %3451 = vst.msk [vmem:[#allocation2 + $0xd8] sm:$0xff] %vm8022_vm3, %v3443_v28  ;;  %v6958_v17 = vld [vmem:[#allocation2 + $0xf8] sm:$0xff] }
 0x562   : > { %v6898_v60 = vpop.xlane.xlu1 %3115  ;;  %3148 = vmin.xlane.f32.xlu1 %v6884_v20  ;;  %v3190_v50 = vshra.s32 %v6895_v37, 16  ;;  %8121 = vst [vmem:[#allocation74_spill] sm:$0xff] %v6958_v17 }
 0x563   : > { %vm3129_vm7 = vcmp.eq.f32.partialorder %v6762_v10, %v6898_v60  ;;  %vm3434_vm4 = vcmp.lt.f32.partialorder %v6898_v60, %v6887_v47 }
 0x564   : > { %v6906_v43 = vcvt.s32.f32 %v3190_v50  ;;  %v3137_v27 = vsel %vm3129_vm7, %v5708_v44, 48  ;;  %v3442_v59 = vsel %vm3434_vm4, %v6898_v60, %v6887_v47  ;;  %v8157_v60 = vld [vmem:[#allocation70_spill] sm:$0xff] }
 0x565   : > { %v6917_v42 = vsel %vm649_vm2, %v3137_v27, 2147483647  ;;  %3450 = vst.msk [vmem:[#allocation2 + $0xd0] sm:$0xff] %vm8022_vm3, %v3442_v59 }
 0x566   : > { %v6920_v10 = vpop.xlane.xlu1 %3121  ;;  %3193 = vmin.xlane.f32.xlu1 %v6906_v43  ;;  %v3175_v63 = vshra.s32 %v6917_v42, 16 }
 0x567   : > { %8118 = vst [vmem:[#allocation71_spill] sm:$0xff] %v6920_v10  ;;  %vm3132_vm1 = vcmp.eq.f32.partialorder %v6768_v26, %v6920_v10  ;;  %vm8033_vm0 = vcmp.lt.f32.partialorder %v6920_v10, %v6914_v15 }
 0x568   : > { %v6928_v31 = vcvt.s32.f32 %v3175_v63  ;;  %v3140_v22 = vsel %vm3132_vm1, %v5708_v44, 48  ;;  %v3445_v4 = vsel %vm8033_vm0, %v6920_v10, %v6914_v15  ;;  %v6975_v63 = vld [vmem:[#allocation2 + $0xf0] sm:$0xff]  ;;  %v2401_v15 = vcvt.f32.s32 %v6726_v46 }
 0x569   : > { %v6939_v29 = vsel %vm649_vm2, %v3140_v22, 2147483647  ;;  %3453 = vst.msk [vmem:[#allocation2 + $0xe8] sm:$0xff] %vm8022_vm3, %v3445_v4  ;;  %8123 = vst [vmem:[#allocation76_spill] sm:$0xff] %v6975_v63 }
 0x56a   : > { %v6942_v26 = vpop.xlane.xlu1 %3119  ;;  %3178 = vmin.xlane.f32.xlu1 %v6928_v31  ;;  %v3220_v51 = vshra.s32 %v6939_v29, 16 }
 0x56b   : > { %8120 = vst [vmem:[#allocation73_spill] sm:$0xff] %v6942_v26  ;;  %vm3131_vm5 = vcmp.eq.f32.partialorder %v6770_v23, %v6942_v26  ;;  %vm3436_vm7 = vcmp.lt.f32.partialorder %v6942_v26, %v6931_v12 }
 0x56c   : > { %v6950_v14 = vcvt.s32.f32 %v3220_v51  ;;  %v3139_v9 = vsel %vm3131_vm5, %v5708_v44, 48  ;;  %v3444_v11 = vsel %vm3436_vm7, %v6942_v26, %v6931_v12 }
 0x56d   : > { %v6961_v28 = vsel %vm649_vm2, %v3139_v9, 2147483647  ;;  %3452 = vst.msk [vmem:[#allocation2 + $0xe0] sm:$0xff] %vm8022_vm3, %v3444_v11 }
 0x56e   : > { %v6964_v23 = vpop.xlane.xlu1 %3125  ;;  %3223 = vmin.xlane.f32.xlu1 %v6950_v14  ;;  %v3205_v50 = vshra.s32 %v6961_v28, 16  ;;  %v8156_v47 = vld [vmem:[#allocation71_spill] sm:$0xff] }
 0x56f   : > { %8122 = vst [vmem:[#allocation75_spill] sm:$0xff] %v6964_v23  ;;  %vm3134_vm1 = vcmp.eq.f32.partialorder %v6778_v62, %v6964_v23  ;;  %vm8031_vm5 = vcmp.lt.f32.partialorder %v6964_v23, %v6958_v17 }
 0x570   : > { %v6972_v27 = vcvt.s32.f32 %v3205_v50  ;;  %v3142_v59 = vsel %vm3134_vm1, %v5708_v44, 48  ;;  %v3447_v22 = vsel %vm8031_vm5, %v6964_v23, %v6958_v17 }
 0x571   : > { %v6983_v4 = vsel %vm649_vm2, %v3142_v59, 2147483647  ;;  %3455 = vst.msk [vmem:[#allocation2 + $0xf8] sm:$0xff] %vm8022_vm3, %v3447_v22  ;;  %v1196_v59 = vld [vmem:[#allocation3 + $0x10] sm:$0xff] }
 0x572   : > { %3208 = vmin.xlane.f32.xlu1 %v6972_v27  ;;  %v6987_v62 = vpop.xlane.xlu1 %3123  ;;  %v3250_v51 = vshra.s32 %v6983_v4, 16 }
 0x573   : > { %8124 = vst [vmem:[#allocation77_spill] sm:$0xff] %v6987_v62  ;;  %vm3133_vm1 = vcmp.eq.f32.partialorder %v6780_v16, %v6987_v62  ;;  %vm8032_vm11 = vcmp.lt.f32.partialorder %v6987_v62, %v6975_v63 }
 0x574   : > { %v6994_v9 = vcvt.s32.f32 %v3250_v51  ;;  %v3141_v11 = vsel %vm3133_vm1, %v5708_v44, 48  ;;  %v3446_v50 = vsel %vm8032_vm11, %v6987_v62, %v6975_v63  ;;  %v2969_v63 = vrot.slane %v6810_v6, 4 }
 0x575   : > { %v7003_v22 = vsel %vm649_vm2, %v3141_v11, 2147483647  ;;  %3454 = vst.msk [vmem:[#allocation2 + $0xf0] sm:$0xff] %vm8022_vm3, %v3446_v50 }
 0x576   : > { %3253 = vmin.xlane.f32.xlu1 %v6994_v9  ;;  %v1218_v16 = vpop.permute.xlu1 %1217  ;;  %v3235_v51 = vshra.s32 %v7003_v22, 16  ;;  %vm2970_vm1 = vcmp.lt.s32.totalorder %v6810_v6, %v2969_v63  ;;  %v3234_v34 = vand.u32 65535, %v7003_v22 }
 0x577   : > { %vm1236_vm6 = vcmp.eq.s32.totalorder %v1218_v16, 1  ;;  %v2971_v11 = vsel %vm2970_vm1, %v6810_v6, %v2969_v63 }
 0x578   : > { %v1244_v17 = vsel %vm1236_vm6, %v6383_v5, %v1196_v59  ;;  %v7009_v23 = vcvt.s32.f32 %v3235_v51  ;;  %v2972_v50 = vrot.slane %v2971_v11, 2  ;;  %v2416_v5 = vcvt.f32.s32 %v6720_v39 }
 0x579   : > { %1253 = vst.msk [vmem:[#allocation3 + $0x10] sm:$0xff] %vm8030_vm10, %v1244_v17  ;;  %v2402_v51 = vshll.u32 %v2401_v15, 16  ;;  %v2446_v39 = vcvt.f32.s32 %v6732_v25  ;;  %v2432_v15 = vshll.u32 %v2431_v19, 16  ;;  %v3236_v8 = vcvt.s32.f32 %v3234_v34  ;;  %v8187_v34 = vld [vmem:[#allocation36_spill] sm:$0xff] }
 0x57a   : > { %3238 = vmin.xlane.f32.xlu1 %v7009_v23  ;;  %vm2973_vm3 = vcmp.lt.s32.totalorder %v2971_v11, %v2972_v50  ;;  %v2417_v12 = vshll.u32 %v2416_v5, 16 }
 0x57b   : > { %v2974_v62 = vsel %vm2973_vm3, %v2971_v11, %v2972_v50 }
 0x57c   : > { %v2975_v16 = vrot.slane %v2974_v62, 1 }
 0x57e   : > { %vm2976_vm6 = vcmp.lt.s32.totalorder %v2974_v62, %v2975_v16 }
 0x57f   : > { %v2977_v6 = vsel %vm2976_vm6, %v2974_v62, %v2975_v16  ;;  %v4645_v62 = vld [vmem:[%s6554_s20 + $0x8] sm:$0xf] }
 0x580   : > { %vm2978_vm3 = vcmp.eq.s32.totalorder %v5617_v49, %v2977_v6  ;;  %vm2979_vm10 = vcmp.eq.s32.totalorder %v5620_v52, %v2977_v6  ;;  %vm2981_vm11 = vcmp.eq.s32.totalorder %v5626_v54, %v2977_v6  ;;  %v2447_v49 = vshll.u32 %v2446_v39, 16  ;;  %v4586_v54 = vld [vmem:[%s6554_s20 + $0x4] sm:$0xf] }
 0x581   : > { %vm5184_vm6 = vmpackc.low %vm2979_vm10, %vm2978_vm3  ;;  %vm2983_vm3 = vcmp.eq.s32.totalorder %v5632_v56, %v2977_v6  ;;  %v3159_v56 = vand.u32 65535, %v6852_v1  ;;  %v2333_v50 = vmax.f32 %v4645_v62, 1e-16 }
 0x583   : > { %v3161_v5 = vcvt.s32.f32 %v3159_v56 }
 0x5a7   : > { %v2399_v59 = vpop.xlane.xlu1 %2398 }
 0x5a8   : > { %v2400_v10 = vcvt.f32.s32 %v2399_v59  ;;  %v2450_v59 = vand.u32 65535, %v6669_v40 }
 0x5aa   : > { %v2403_v17 = vadd.s32 %v2402_v51, %v2400_v10 }
 0x5ab   : > { %v2414_v26 = vpop.xlane.xlu1 %2413 }
 0x5ac   : > { %v2415_v33 = vcvt.f32.s32 %v2414_v26  ;;  %vm2509_vm1 = vcmp.eq.s32.totalorder %v5708_v44, %v2403_v17  ;;  %v2465_v17 = vand.u32 65535, %v6647_v48 }
 0x5ad   : > { %v4646_v63 = vsel %vm2509_vm1, 1.0, %v8076_v3  ;;  %vm2980_vm1 = vcmp.eq.s32.totalorder %v5623_v53, %v2977_v6 }
 0x5ae   : > { %v2418_v11 = vadd.s32 %v2417_v12, %v2415_v33  ;;  %5042 = vmatprep.mubr.msk.f32.mxu0 %vm649_vm2, %v4646_v63  ;;  %vm5187_vm10 = vmpackc.low %vm2981_vm11, %vm2980_vm1  ;;  %vm2984_vm11 = vcmp.eq.s32.totalorder %v5635_v57, %v2977_v6  ;;  %vm2985_vm1 = vcmp.eq.s32.totalorder %v5638_v58, %v2977_v6  ;;  %v1581_v12 = vmax.f32 %v6531_v36, 1e-16 }
 0x5af   : > { %v2429_v46 = vpop.xlane.xlu1 %2428  ;;  %v3144_v57 = vand.u32 65535, %v6873_v41  ;;  %v2335_v58 = vmax.f32 %v6746_v45, 1e-16  ;;  %v1571_v41 = vmul.f32 %v4586_v54, %v6531_v36  ;;  %v2325_v36 = vmul.f32 %v4645_v62, %v6746_v45  ;;  %v8129_v62 = vld [vmem:[#allocation16_spill] sm:$0xff] }
 0x5b0   : > { %vm2510_vm5 = vcmp.eq.s32.totalorder %v5708_v44, %v2418_v11  ;;  %v2430_v38 = vcvt.f32.s32 %v2429_v46  ;;  %v2480_v46 = vand.u32 65535, %v6691_v13 }
 0x5b1   : > { %v4647_v10 = vsel %vm2510_vm5, 1.0, %v8076_v3  ;;  %vm2982_vm5 = vcmp.eq.s32.totalorder %v5629_v55, %v2977_v6  ;;  %v1579_v55 = vmax.f32 %v4586_v54, 1e-16  ;;  %v3146_v1 = vcvt.s32.f32 %v3144_v57  ;;  %v8132_v57 = vld [vmem:[#allocation59_spill] sm:$0xff] }
 0x5b2   : > { %v2433_v26 = vadd.s32 %v2432_v15, %v2430_v38  ;;  %5043 = vmatmul.mubr.msk.f32.vlgmr.msra.gmra.mrb[26].mxu0 %vm649_vm2, %v4647_v10  ;;  %v1573_v63 = vrot.slane %v1571_v41, 1  ;;  %v1576_v39 = vrot.slane %v1571_v41, 2  ;;  %v4713_v15 = vld [vmem:[%s5951_s13 + $0x90] sm:$0xff]  ;;  %v4714_v38 = vld [vmem:[%s5951_s13 + $0x98] sm:$0xff] }
 0x5b3   : > { %5185 = vmatpush3.bf16.msk.msra.mxu0 %vm5184_vm6, %v8053_v24  ;;  %v2444_v33 = vpop.xlane.xlu1 %2443  ;;  %5263 = vrsqrt.f32 %v1579_v55 }
 0x5b4   : > { %v2445_v52 = vcvt.f32.s32 %v2444_v33  ;;  %5186 = vmatprep.subr.bf16.mxu0 %v8054_v0  ;;  %vm2511_vm0 = vcmp.eq.s32.totalorder %v5708_v44, %v2433_v26  ;;  %5265 = vrsqrt.f32 %v1581_v12  ;;  %v1575_v10 = vadd.f32 %v1573_v63, %v1571_v41  ;;  %v8128_v12 = vld [vmem:[#allocation13_spill] sm:$0xff]  ;;  %v8134_v63 = vld [vmem:[#allocation18_spill] sm:$0xff] }
 0x5b5   : > { %v4648_v25 = vsel %vm2511_vm0, 1.0, %v8076_v3  ;;  %vm5190_vm0 = vmpackc.low %vm2983_vm3, %vm2982_vm5  ;;  %5267 = vrsqrt.f32 %v2333_v50  ;;  %v5195_v33 = vpack.c.bf16 %v4714_v38, %v4713_v15 }
 0x5b6   : > { %v2448_v19 = vadd.s32 %v2447_v49, %v2445_v52  ;;  %5045 = vmatprep.mubr.msk.f32.mxu0 %vm649_vm2, %v4648_v25  ;;  %5269 = vrsqrt.f32 %v2335_v58  ;;  %v8125_v52 = vld [vmem:[#allocation68_spill] sm:$0xff]  ;;  %v8126_v25 = vld [vmem:[#allocation57_spill] sm:$0xff]  ;;  %v1578_v54 = vadd.f32 %v1576_v39, %v1575_v10  ;;  %v8137_v10 = vld [vmem:[#allocation19_spill] sm:$0xff] }
 0x5b7   : > { %5188 = vmatpush3.bf16.msk.msra.mxu0 %vm5187_vm10, %v8053_v24  ;;  %vm5193_vm10 = vmpackc.low %vm2985_vm1, %vm2984_vm11  ;;  %vm2486_vm11 = vcmp.eq.f32.partialorder %v8126_v25, %v8125_v52  ;;  %5196 = vmatprep.subr.bf16.mxu1 %v5195_v33  ;;  %vm8130_vm1 = vcmp.lt.f32.partialorder %v8128_v12, %v8129_v62  ;;  %v8140_v25 = vld [vmem:[#allocation20_spill] sm:$0xff]  ;;  %v8146_v12 = vld [vmem:[#allocation22_spill] sm:$0xff] }
 0x5b8   : > { %5189 = vmatprep.subr.bf16.mxu0 %v8054_v0  ;;  %vm2512_vm6 = vcmp.eq.s32.totalorder %v5708_v44, %v2448_v19  ;;  %v2327_v19 = vrot.slane %v2325_v36, 1  ;;  %5198 = vmatpush3.bf16.msra.mxu1 %v5195_v33  ;;  %v1206_v50 = vsel %vm8130_vm1, 1, %v8073_v30 }
 0x5b9   : > { %v4649_v53 = vsel %vm2512_vm6, 1.0, %v8076_v3  ;;  %vm2456_vm6 = vcmp.eq.f32.partialorder %v6680_v61, %v6748_v2 }
 0x5ba   : > { %5046 = vmatmul.mubr.msk.f32.gmra.mrb[28].mxu0 %vm649_vm2, %v4649_v53  ;;  %v8127_v53 = vld [vmem:[#allocation58_spill] sm:$0xff]  ;;  %v2329_v58 = vadd.f32 %v2327_v19, %v2325_v36 }
 0x5bb   : > { %5191 = vmatpush3.bf16.msk.msra.mxu0 %vm5190_vm0, %v8053_v24  ;;  %vm2471_vm0 = vcmp.eq.f32.partialorder %v6658_v35, %v6744_v7  ;;  %v2482_v35 = vcvt.s32.f32 %v2480_v46  ;;  %v2495_v45 = vand.u32 65535, %v8127_v53  ;;  %v4718_v46 = vld [vmem:[%s5951_s13 + $0xb8] sm:$0xff] }
 0x5bc   : > { %5192 = vmatprep.subr.bf16.mxu0 %v8054_v0  ;;  %v8142_v53 = vld [vmem:[#allocation12_spill] sm:$0xff] }
 0x5bd   : > { %v5264_v6 = vpop.eup %5263  ;;  %v2487_v13 = vsel %vm2486_vm11, %v2482_v35, inf }
 0x5be   : > { %v5266_v40 = vpop.eup %5265 }
 0x5bf   : > { %5194 = vmatpush3.bf16.msk.msra.mxu0 %vm5193_vm10, %v8053_v24  ;;  %v5268_v61 = vpop.eup %5267  ;;  %v1583_v48 = vmul.f32 %v5266_v40, %v5264_v6  ;;  %v8133_v6 = vld [vmem:[#allocation14_spill] sm:$0xff] }
 0x5c0   : > { %v5270_v49 = vpop.eup %5269 }
 0x5c1   : > { %v1585_v55 = vrot.slane %v1583_v48, 3  ;;  %v2337_v56 = vmul.f32 %v5270_v49, %v5268_v61  ;;  %v8136_v61 = vld [vmem:[#allocation17_spill] sm:$0xff]  ;;  %v8139_v49 = vld [vmem:[#allocation10_spill] sm:$0xff] }
 0x5c3   : > { %v1587_v41 = vmul.f32 %v1585_v55, %v1578_v54  ;;  %v3189_v54 = vand.u32 65535, %v6895_v37  ;;  %v8171_v37 = vld [vmem:[#allocation27_spill] sm:$0xff] }
 0x5eb   : > { %v7051_v16 = vpop.xlane.xlu1 %3163 }
 0x5ec   : > { %vm3165_vm5 = vcmp.eq.f32.partialorder %v6862_v32, %v7051_v16  ;;  %v2452_v32 = vcvt.s32.f32 %v2450_v59 }
 0x5ed   : > { %v3166_v24 = vsel %vm3165_vm5, %v3161_v5, inf  ;;  %v8131_v5 = vld [vmem:[#allocation69_spill] sm:$0xff]  ;;  %vm8135_vm5 = vcmp.lt.f32.partialorder %v8133_v6, %v8134_v63  ;;  %v3204_v6 = vand.u32 65535, %v6961_v28  ;;  %v3466_v28 = vsel %vm3433_vm13, 1, %v8073_v30 }
 0x5ee   : > { %3167 = vmin.xlane.f32.xlu1 %v3166_v24  ;;  %v2457_v11 = vsel %vm2456_vm6, %v2452_v32, inf  ;;  %vm2501_vm10 = vcmp.eq.f32.partialorder %v8132_v57, %v8131_v5  ;;  %v2497_v24 = vcvt.s32.f32 %v2495_v45  ;;  %v4715_v32 = vld [vmem:[%s5951_s13 + $0xa0] sm:$0xff]  ;;  %vm8141_vm6 = vcmp.lt.f32.partialorder %v8139_v49, %v8140_v25  ;;  %v8163_v49 = vld [vmem:[#allocation74_spill] sm:$0xff] }
 0x5ef   : > { %v7057_v0 = vpop.xlane.xlu1 %3148  ;;  %v1203_v19 = vsel %vm8141_vm6, 1, %v8073_v30  ;;  %v8143_v45 = vld [vmem:[#allocation21_spill] sm:$0xff]  ;;  %v3191_v57 = vcvt.s32.f32 %v3189_v54 }
 0x5f0   : > { %vm3150_vm3 = vcmp.eq.f32.partialorder %v6884_v20, %v7057_v0  ;;  %v2467_v20 = vcvt.s32.f32 %v2465_v17  ;;  %v2502_v59 = vsel %vm2501_vm10, %v2497_v24, inf  ;;  %v4716_v17 = vld [vmem:[%s5951_s13 + $0xa8] sm:$0xff]  ;;  %v7191_v54 = vld [vmem:[#allocation3] sm:$0xff] }
 0x5f1   : > { %v3151_v51 = vsel %vm3150_vm3, %v3146_v1, inf  ;;  %v2330_v1 = vrot.slane %v2325_v36, 2  ;;  %v5199_v40 = vpack.c.bf16 %v4716_v17, %v4715_v32  ;;  %v1590_v36 = vsel %vm836_vm8, %v1587_v41, 0.0  ;;  %v8177_v32 = vld [vmem:[#allocation30_spill] sm:$0xff] }
 0x5f2   : > { %3152 = vmin.xlane.f32.xlu0 %v3151_v51  ;;  %v2472_v26 = vsel %vm2471_vm0, %v2467_v20, inf  ;;  %v2339_v51 = vrot.slane %v2337_v56, 3  ;;  %v4717_v20 = vld [vmem:[%s5951_s13 + $0xb0] sm:$0xff]  ;;  %vm8138_vm3 = vcmp.lt.f32.partialorder %v8136_v61, %v8137_v10  ;;  %vm8144_vm0 = vcmp.lt.f32.partialorder %v8142_v53, %v8143_v45  ;;  %v8159_v61 = vld [vmem:[#allocation77_spill] sm:$0xff]  ;;  %v8160_v10 = vld [vmem:[#allocation76_spill] sm:$0xff] }
 0x5f3   : > { %v2332_v39 = vadd.f32 %v2330_v1, %v2329_v58  ;;  %v5203_v15 = vpack.c.bf16 %v4718_v46, %v4717_v20  ;;  %5200 = vmatprep.subr.bf16.mxu1 %v5199_v40  ;;  %v7095_v33 = vpop.xlane.xlu1 %3193  ;;  %v8145_v56 = vld [vmem:[#allocation15_spill] sm:$0xff]  ;;  %v2712_v1 = vsel %vm2679_vm15, 1, %v8073_v30  ;;  %v2718_v17 = vsel %vm2685_vm14, 1, %v8073_v30 }
 0x5f4   : > { %5202 = vmatpush3.bf16.msra.mxu1 %v5199_v40  ;;  %vm8147_vm11 = vcmp.lt.f32.partialorder %v8145_v56, %v8146_v12  ;;  %vm3195_vm1 = vcmp.eq.f32.partialorder %v6906_v43, %v7095_v33  ;;  %v3249_v40 = vand.u32 65535, %v6983_v4  ;;  %v3467_v46 = vsel %vm3434_vm4, 1, %v8073_v30  ;;  %v8166_v53 = vld [vmem:[#allocation23_spill] sm:$0xff]  ;;  %v8168_v12 = vld [vmem:[#allocation26_spill] sm:$0xff] }
 0x5f5   : > { %v2341_v38 = vmul.f32 %v2339_v51, %v2332_v39  ;;  %5204 = vmatprep.subr.bf16.mxu1 %v5203_v15  ;;  %v1208_v62 = vsel %vm8147_vm11, 1, %v8073_v30  ;;  %v3196_v58 = vsel %vm3195_vm1, %v3191_v57, inf  ;;  %v3468_v39 = vsel %vm3435_vm9, 1, %v8073_v30  ;;  %v7202_v57 = vld [vmem:[%s7178_s30 + $0x10] sm:$0xff] }
 0x5f6   : > { %2458 = vmin.xlane.f32.xlu0 %v2457_v11  ;;  %v1207_v11 = vsel %vm8135_vm5, 1, %v8073_v30  ;;  %vm8161_vm4 = vcmp.lt.f32.partialorder %v8159_v61, %v8160_v10  ;;  %v3155_v10 = vcvt.f32.s32 %v7057_v0 }
 0x5f7   : > { %v2344_v48 = vsel %vm836_vm8, %v2341_v38, 0.0  ;;  %v7101_v35 = vpop.xlane.xlu1 %3178  ;;  %v3469_v38 = vsel %vm3436_vm7, 1, %v8073_v30 }
 0x5f8   : > { %5206 = vmatpush3.bf16.msra.mxu1 %v5203_v15  ;;  %vm3180_vm10 = vcmp.eq.f32.partialorder %v6928_v31, %v7101_v35  ;;  %v8196_v15 = vld [vmem:[#allocation45_spill] sm:$0xff] }
 0x5fa   : > { %2473 = vmin.xlane.f32.xlu0 %v2472_v26  ;;  %v1209_v26 = vsel %vm8138_vm3, 1, %v8073_v30 }
 0x5fb   : > { %v7108_v55 = vpop.xlane.xlu1 %3223 }
 0x5fc   : > { %vm3225_vm5 = vcmp.eq.f32.partialorder %v6950_v14, %v7108_v55  ;;  %v3206_v14 = vcvt.s32.f32 %v3204_v6 }
 0x5fe   : > { %2488 = vmin.xlane.f32.xlu0 %v2487_v13  ;;  %v1205_v13 = vsel %vm8144_vm0, 1, %v8073_v30 }
 0x5ff   : > { %1223 = vperm.xlu1 %5257, %v1206_v50   ;;  %v3174_v50 = vand.u32 65535, %v6917_v42  ;;  %v7124_v41 = vpop.xlane.xlu1 %3208 }
 0x600   : > { %vm3210_vm15 = vcmp.eq.f32.partialorder %v6972_v27, %v7124_v41  ;;  %v3251_v27 = vcvt.s32.f32 %v3249_v40  ;;  %v8183_v40 = vld [vmem:[#allocation32_spill] sm:$0xff] }
 0x601   : > { %v3176_v43 = vcvt.s32.f32 %v3174_v50  ;;  %v3211_v20 = vsel %vm3210_vm15, %v3206_v14, inf  ;;  %v8184_v14 = vld [vmem:[#allocation7_spill] sm:$0xff] }
 0x602   : > { %2503 = vmin.xlane.f32.xlu0 %v2502_v59  ;;  %v3219_v59 = vand.u32 65535, %v6939_v29 }
 0x603   : > { %1226 = vperm.xlu1 %5257, %v1207_v11   ;;  %v3181_v51 = vsel %vm3180_vm10, %v3176_v43, inf  ;;  %v7133_v63 = vpop.xlane.xlu1 %3253  ;;  %v3465_v11 = vsel %vm3432_vm12, 1, %v8073_v30  ;;  %vm8158_vm12 = vcmp.lt.f32.partialorder %v8156_v47, %v8157_v60  ;;  %v8174_v43 = vld [vmem:[#allocation29_spill] sm:$0xff]  ;;  %vm8185_vm10 = vcmp.lt.f32.partialorder %v8183_v40, %v8184_v14  ;;  %v8198_v60 = vld [vmem:[#allocation52_spill] sm:$0xff] }
 0x604   : > { %v3221_v31 = vcvt.s32.f32 %v3219_v59  ;;  %vm3255_vm14 = vcmp.eq.f32.partialorder %v6994_v9, %v7133_v63  ;;  %v8193_v9 = vld [vmem:[#allocation47_spill] sm:$0xff] }
 0x605   : > { %v3256_v4 = vsel %vm3255_vm14, %v3251_v27, inf }
 0x606   : > { %1591 = vadd.xlane.f32.xlu0 %v1590_v36  ;;  %v3226_v29 = vsel %vm3225_vm5, %v3221_v31, inf  ;;  %v8180_v31 = vld [vmem:[#allocation31_spill] sm:$0xff] }
 0x607   : > { %1232 = vperm.xlu1 %5257, %v1209_v26   ;;  %v7149_v18 = vpop.xlane.xlu1 %3238  ;;  %v3471_v26 = vsel %vm8161_vm4, 1, %v8073_v30 }
 0x608   : > { %vm3240_vm13 = vcmp.eq.f32.partialorder %v7009_v23, %v7149_v18  ;;  %v3470_v23 = vsel %vm8158_vm12, 1, %v8073_v30 }
 0x609   : > { %v3241_v21 = vsel %vm3240_vm13, %v3236_v8, inf }
 0x60a   : > { %2345 = vadd.xlane.f32.xlu0 %v2344_v48  ;;  %v8162_v48 = vld [vmem:[#allocation75_spill] sm:$0xff] }
 0x60b   : > { %vm8164_vm9 = vcmp.lt.f32.partialorder %v8162_v48, %v8163_v49  ;;  %v1198_v49 = vld [vmem:[#allocation3 + $0x20] sm:$0xff] }
 0x60c   : > { %v3472_v25 = vsel %vm8164_vm9, 1, %v8073_v30 }
 0x620   : > { %1214 = vperm.xlu0 %5258, %v1203_v19   ;;  %v8165_v19 = vld [vmem:[#allocation24_spill] sm:$0xff] }
 0x621   : > { %vm8167_vm7 = vcmp.lt.f32.partialorder %v8165_v19, %v8166_v53 }
 0x622   : > { %v1957_v45 = vsel %vm8167_vm7, 1, %v8073_v30  ;;  %vm8205_vm7 = vcmask 31744  }
 0x624   : > { %1220 = vperm.xlu0 %5258, %v1205_v13   ;;  %v7189_v13 = vld [vmem:[%s7178_s30] sm:$0xff] }
 0x625   : > { %v7195_v56 = vmul.f32 %v7191_v54, %v7189_v13 }
 0x628   : > { %1229 = vperm.xlu0 %5258, %v1208_v62   ;;  %v8169_v62 = vld [vmem:[#allocation25_spill] sm:$0xff] }
 0x629   : > { %vm8170_vm3 = vcmp.lt.f32.partialorder %v8168_v12, %v8169_v62  ;;  %v8202_v12 = vld [vmem:[#allocation49_spill] sm:$0xff]  ;;  %v2461_v62 = vcvt.f32.s32 %v6748_v2 }
 0x62a   : > { %v1958_v50 = vsel %vm8170_vm3, 1, %v8073_v30 }
 0x62b   : > { %3197 = vmin.xlane.f32.xlu1 %v3196_v58  ;;  %v7204_v58 = vld [vmem:[#allocation3 + $0x10] sm:$0xff] }
 0x62c   : > { %2723 = vperm.xlu0 %5258, %v2712_v1   ;;  %v7210_v24 = vmul.f32 %v7204_v58, %v7202_v57  ;;  %v8172_v1 = vld [vmem:[#allocation28_spill] sm:$0xff] }
 0x62d   : > { %vm8173_vm6 = vcmp.lt.f32.partialorder %v8171_v37, %v8172_v1  ;;  %v8204_v1 = vld [vmem:[#allocation38_spill] sm:$0xff] }
 0x62e   : > { %v1959_v59 = vsel %vm8173_vm6, 1, %v8073_v30 }
 0x62f   : > { %3182 = vmin.xlane.f32.xlu1 %v3181_v51  ;;  %v8175_v51 = vld [vmem:[#allocation8_spill] sm:$0xff] }
 0x630   : > { %2741 = vperm.xlu0 %5258, %v2718_v17   ;;  %vm8176_vm0 = vcmp.lt.f32.partialorder %v8174_v43, %v8175_v51  ;;  %v8178_v17 = vld [vmem:[#allocation33_spill] sm:$0xff]  ;;  %v2476_v51 = vcvt.f32.s32 %v6744_v7 }
 0x631   : > { %v1960_v42 = vsel %vm8176_vm0, 1, %v8073_v30  ;;  %vm8179_vm11 = vcmp.lt.f32.partialorder %v8177_v32, %v8178_v17  ;;  %v1199_v43 = vld [vmem:[#allocation3 + $0x28] sm:$0xff] }
 0x632   : > { %v1961_v6 = vsel %vm8179_vm11, 1, %v8073_v30  ;;  %v8206_v17 = vld [vmem:[#allocation54_spill] sm:$0xff] }
 0x633   : > { %3227 = vmin.xlane.f32.xlu1 %v3226_v29  ;;  %v8181_v29 = vld [vmem:[#allocation34_spill] sm:$0xff] }
 0x634   : > { %3474 = vperm.xlu0 %5258, %v3465_v11   ;;  %vm8182_vm1 = vcmp.lt.f32.partialorder %v8180_v31, %v8181_v29  ;;  %v2462_v31 = vshll.u32 %v2461_v62, 16  ;;  %v4694_v62 = vld [vmem:[%s6018_s17 + $0xc] sm:$0xf] }
 0x635   : > { %v1962_v11 = vsel %vm8182_vm1, 1, %v8073_v30  ;;  %vm8210_vm1 = vmmov %vm8205_vm7 }
 0x637   : > { %3212 = vmin.xlane.f32.xlu1 %v3211_v20  ;;  %v1963_v20 = vsel %vm8185_vm10, 1, %v8073_v30 }
 0x638   : > { %3477 = vperm.xlu0 %5258, %v3466_v28   ;;  %v8186_v28 = vld [vmem:[#allocation35_spill] sm:$0xff] }
 0x639   : > { %vm8188_vm5 = vcmp.lt.f32.partialorder %v8186_v28, %v8187_v34 }
 0x63a   : > { %v1964_v27 = vsel %vm8188_vm5, 1, %v8073_v30 }
 0x63b   : > { %3257 = vmin.xlane.f32.xlu1 %v3256_v4  ;;  %v8189_v4 = vld [vmem:[#allocation44_spill] sm:$0xff] }
 0x63c   : > { %3480 = vperm.xlu0 %5258, %v3467_v46   ;;  %v8190_v46 = vld [vmem:[#allocation43_spill] sm:$0xff] }
 0x63d   : > { %vm8191_vm15 = vcmp.lt.f32.partialorder %v8189_v4, %v8190_v46 }
 0x63e   : > { %v2711_v8 = vsel %vm8191_vm15, 1, %v8073_v30  ;;  %vm8212_vm15 = vmmov %vm8210_vm1 }
 0x63f   : > { %3242 = vmin.xlane.f32.xlu1 %v3241_v21  ;;  %v8192_v21 = vld [vmem:[#allocation48_spill] sm:$0xff] }
 0x640   : > { %3483 = vperm.xlu0 %5258, %v3468_v39   ;;  %vm8194_vm14 = vcmp.lt.f32.partialorder %v8192_v21, %v8193_v9  ;;  %v8195_v39 = vld [vmem:[#allocation46_spill] sm:$0xff]  ;;  %v8211_v9 = vld [vmem:[#allocation39_spill] sm:$0xff] }
 0x641   : > { %v2713_v22 = vsel %vm8194_vm14, 1, %v8073_v30  ;;  %vm8197_vm13 = vcmp.lt.f32.partialorder %v8195_v39, %v8196_v15 }
 0x642   : > { %v2714_v36 = vsel %vm8197_vm13, 1, %v8073_v30 }
 0x644   : > { %3486 = vperm.xlu0 %5258, %v3469_v38   ;;  %v3170_v38 = vcvt.f32.s32 %v7051_v16 }
 0x646   : > { %v3171_v48 = vshll.u32 %v3170_v38, 16 }
 0x648   : > { %3489 = vperm.xlu0 %5258, %v3470_v23   ;;  %v8199_v23 = vld [vmem:[#allocation51_spill] sm:$0xff] }
 0x649   : > { %vm8200_vm12 = vcmp.lt.f32.partialorder %v8198_v60, %v8199_v23 }
 0x64a   : > { %v2715_v61 = vsel %vm8200_vm12, 1, %v8073_v30 }
 0x64c   : > { %3492 = vperm.xlu0 %5258, %v3471_v26  }
 0x650   : > { %3495 = vperm.xlu0 %5258, %v3472_v25   ;;  %1966 = vperm.xlu1 %5257, %v1957_v45   ;;  %v8201_v45 = vld [vmem:[#allocation50_spill] sm:$0xff] }
 0x651   : > { %vm8203_vm4 = vcmp.lt.f32.partialorder %v8201_v45, %v8202_v12 }
 0x652   : > { %v2716_v16 = vsel %vm8203_vm4, 1, %v8073_v30  ;;  %vm8213_vm4 = vmmov 0  }
 0x654   : > { %3556 = vrot.lane.b32.xlu0 %v7195_v56, %s5435_s25  ;;  %1969 = vperm.xlu1 %5257, %v1958_v50   ;;  %v3156_v50 = vshll.u32 %v3155_v10, 16 }
 0x658   : > { %3560 = vrot.lane.b32.xlu0 %v7210_v24, %s5435_s25  ;;  %1972 = vperm.xlu1 %5257, %v1959_v59  }
 0x65c   : > { %1975 = vperm.xlu1 %5257, %v1960_v42  }
 0x660   : > { %1978 = vperm.xlu1 %5257, %v1961_v6   ;;  %v8207_v6 = vld [vmem:[#allocation53_spill] sm:$0xff] }
 0x661   : > { %vm8208_vm6 = vcmp.lt.f32.partialorder %v8206_v17, %v8207_v6 }
 0x662   : > { %v2717_v2 = vsel %vm8208_vm6, 1, %v8073_v30  ;;  %v1201_v30 = vld [vmem:[#allocation3 + $0x38] sm:$0xff] }
 0x664   : > { %1981 = vperm.xlu1 %5257, %v1962_v11   ;;  %v8209_v11 = vld [vmem:[#allocation37_spill] sm:$0xff] }
 0x668   : > { %1984 = vperm.xlu1 %5257, %v1963_v20  }
 0x66c   : > { %1987 = vperm.xlu1 %5257, %v1964_v27   ;;  %v2477_v27 = vshll.u32 %v2476_v51, 16  ;;  %v1195_v51 = vld [vmem:[#allocation3 + $0x8] sm:$0xff] }
 0x670   : > { %2720 = vperm.xlu1 %5257, %v2711_v8   ;;  %v2491_v8 = vcvt.f32.s32 %v8125_v52 }
 0x672   : > { %v2492_v38 = vshll.u32 %v2491_v8, 16 }
 0x674   : > { %2726 = vperm.xlu1 %5257, %v2713_v22  }
 0x678   : > { %2729 = vperm.xlu1 %5257, %v2714_v36  }
 0x67b   : > { %v3168_v47 = vpop.xlane.xlu1 %3167 }
 0x67c   : > { %v3169_v26 = vcvt.f32.s32 %v3168_v47  ;;  %2732 = vperm.xlu1 %5257, %v2715_v61   ;;  %v2506_v47 = vcvt.f32.s32 %v8131_v5 }
 0x67e   : > { %v3172_v25 = vadd.s32 %v3171_v48, %v3169_v26  ;;  %v2507_v48 = vshll.u32 %v2506_v47, 16 }
 0x67f   : > { %v3153_v19 = vpop.xlane.xlu0 %3152  ;;  %v1224_v53 = vpop.permute.xlu1 %1223 }
 0x680   : > { %v3154_v37 = vcvt.f32.s32 %v3153_v19  ;;  %vm1238_vm9 = vcmp.eq.s32.totalorder %v1224_v53, 1  ;;  %2735 = vperm.xlu1 %5257, %v2716_v16   ;;  %vm3264_vm3 = vcmp.eq.s32.totalorder %v5708_v44, %v3172_v25 }
 0x681   : > { %v1246_v0 = vsel %vm1238_vm9, %v8204_v1, %v1198_v49  ;;  %v4706_v20 = vsel %vm3264_vm3, 1.0, %v8076_v3  ;;  %vm8214_vm9 = vcmask 523264   ;;  %vm8216_vm3 = vmmov %vm8210_vm1 }
 0x682   : > { %v3157_v59 = vadd.s32 %v3156_v50, %v3154_v37  ;;  %1255 = vst.msk [vmem:[#allocation3 + $0x20] sm:$0xff] %vm8205_vm7, %v1246_v0 }
 0x683   : > { %v2459_v42 = vpop.xlane.xlu0 %2458  ;;  %v1227_v32 = vpop.permute.xlu1 %1226 }
 0x684   : > { %v2460_v29 = vcvt.f32.s32 %v2459_v42  ;;  %vm1239_vm0 = vcmp.eq.s32.totalorder %v1227_v32, 1  ;;  %2738 = vperm.xlu1 %5257, %v2717_v2   ;;  %vm3263_vm11 = vcmp.eq.s32.totalorder %v5708_v44, %v3157_v59  ;;  %v8215_v2 = vld [vmem:[#allocation6_spill] sm:$0xff] }
 0x685   : > { %v1247_v40 = vsel %vm1239_vm0, %v8209_v11, %v1199_v43  ;;  %v7271_v14 = vpop.f32.mrb[26].mxu0  ;;  %v4705_v7 = vsel %vm3263_vm11, 1.0, %v8076_v3  ;;  %vm8218_vm0 = vmmov %vm8210_vm1 }
 0x686   : > { %v2463_v28 = vadd.s32 %v2462_v31, %v2460_v29  ;;  %1256 = vst.msk [vmem:[#allocation3 + $0x28] sm:$0xff] %vm8210_vm1, %v1247_v40  ;;  %v7276_v34 = vpop.f32.mrb[27].mxu0  ;;  %5099 = vmatprep.mubr.msk.f32.mxu1 %vm649_vm2, %v4705_v7  ;;  %v1197_v29 = vld [vmem:[#allocation3 + $0x18] sm:$0xff]  ;;  %v8217_v7 = vld [vmem:[#allocation5_spill] sm:$0xff]  ;;  %vm8220_vm1 = vmmov %vm8218_vm0 }
 0x687   : > { %v2474_v4 = vpop.xlane.xlu0 %2473  ;;  %5100 = vmatmul.mubr.msk.f32.vlgmr.msra.gmra.mrb[28].mxu1 %vm649_vm2, %v4706_v20  ;;  %v1233_v46 = vpop.permute.xlu1 %1232 }
 0x688   : > { %v2475_v21 = vcvt.f32.s32 %v2474_v4  ;;  %vm1241_vm10 = vcmp.eq.s32.totalorder %v1233_v46, 1  ;;  %vm2513_vm5 = vcmp.eq.s32.totalorder %v5708_v44, %v2463_v28  ;;  %v1200_v28 = vld [vmem:[#allocation3 + $0x30] sm:$0xff]  ;;  %v3527_v4 = vld [vmem:[%s7178_s30 + $0x18] sm:$0xff] }
 0x689   : > { %v1249_v22 = vsel %vm1241_vm10, %v8211_v9, %v1201_v30  ;;  %v4650_v39 = vsel %vm2513_vm5, 1.0, %v8076_v3  ;;  %v8219_v46 = vld [vmem:[#allocation40_spill] sm:$0xff]  ;;  %v2704_v9 = vld [vmem:[#allocation3 + $0x88] sm:$0xff]  ;;  %vm8221_vm5 = vmmov %vm8218_vm0 }
 0x68a   : > { %v2478_v15 = vadd.s32 %v2477_v27, %v2475_v21  ;;  %1258 = vst.msk [vmem:[#allocation3 + $0x38] sm:$0xff] %vm8212_vm15, %v1249_v22  ;;  %5048 = vmatprep.mubr.msk.f32.mxu0 %vm649_vm2, %v4650_v39  ;;  %v7309_v27 = vld [vmem:[%s7178_s30 + $0x8] sm:$0xff]  ;;  %v3623_v39 = vmax.f32 %v3527_v4, 1e-16 }
 0x68b   : > { %v2489_v36 = vpop.xlane.xlu0 %2488 }
 0x68c   : > { %v2490_v60 = vcvt.f32.s32 %v2489_v36  ;;  %vm2514_vm14 = vcmp.eq.s32.totalorder %v5708_v44, %v2478_v15  ;;  %5271 = vrsqrt.f32 %v3623_v39 }
 0x68d   : > { %v7288_v52 = vpop.f32.mrb[28].mxu0  ;;  %v4651_v23 = vsel %vm2514_vm14, 1.0, %v8076_v3 }
 0x68e   : > { %v2493_v61 = vadd.s32 %v2492_v38, %v2490_v60  ;;  %v7291_v10 = vpop.f32.mrb[29].mxu0  ;;  %5049 = vmatmul.mubr.msk.f32.gmra.mrb[30].mxu0 %vm649_vm2, %v4651_v23  ;;  %v7327_v23 = vld [vmem:[%s7178_s30 + $0x30] sm:$0xff] }
 0x68f   : > { %v2504_v26 = vpop.xlane.xlu0 %2503 }
 0x690   : > { %v2505_v49 = vcvt.f32.s32 %v2504_v26  ;;  %vm2515_vm13 = vcmp.eq.s32.totalorder %v5708_v44, %v2493_v61  ;;  %v7330_v61 = vld [vmem:[%s7178_s30 + $0x20] sm:$0xff] }
 0x691   : > { %v4652_v5 = vsel %vm2515_vm13, 1.0, %v8076_v3  ;;  %v7332_v26 = vld [vmem:[#allocation3 + $0x20] sm:$0xff] }
 0x692   : > { %v2508_v25 = vadd.s32 %v2507_v48, %v2505_v49  ;;  %5051 = vmatprep.mubr.msk.f32.mxu0 %vm649_vm2, %v4652_v5  ;;  %v7344_v49 = vmul.f32 %v7332_v26, %v7330_v61  ;;  %v7347_v5 = vld [vmem:[%s7178_s30 + $0x28] sm:$0xff] }
 0x693   : > { %v1592_v19 = vpop.xlane.xlu0 %1591 }
 0x694   : > { %v1593_v53 = vrot.slane %v1592_v19, 4  ;;  %vm2516_vm12 = vcmp.eq.s32.totalorder %v5708_v44, %v2508_v25  ;;  %v7349_v25 = vld [vmem:[#allocation3 + $0x28] sm:$0xff] }
 0x695   : > { %v4653_v45 = vsel %vm2516_vm12, 1.0, %v8076_v3 }
 0x696   : > { %v1594_v12 = vadd.f32 %v1593_v53, %v1592_v19  ;;  %5052 = vmatmul.mubr.msk.f32.gmra.mrb[32].mxu0 %vm649_vm2, %v4653_v45  ;;  %v7357_v19 = vmul.f32 %v7349_v25, %v7347_v5  ;;  %v3200_v53 = vcvt.f32.s32 %v7095_v33  ;;  %v3531_v45 = vld [vmem:[%s7178_s30 + $0x38] sm:$0xff] }
 0x697   : > { %v2346_v16 = vpop.xlane.xlu0 %2345  ;;  %5084 = vmatprep.mubr.msk.f32.mxu0 %vm8213_vm4, %v8076_v3 }
 0x698   : > { %v2347_v50 = vrot.slane %v2346_v16, 4  ;;  %v1595_v37 = vrot.slane %v1594_v12, 2 }
 0x69a   : > { %v2348_v1 = vadd.f32 %v2347_v50, %v2346_v16  ;;  %v1596_v0 = vadd.f32 %v1595_v37, %v1594_v12  ;;  %5085 = vmatmul.mubr.msk.f32.vlgmr.msra.gmra.mrb[34].mxu0 %vm8214_vm9, %v4694_v62  ;;  %v3539_v12 = vld [vmem:[#allocation3 + $0x38] sm:$0xff]  ;;  %v5272_v16 = vpop.eup %5271  ;;  %v3185_v50 = vcvt.f32.s32 %v7101_v35 }
 0x69c   : > { %v1597_v59 = vrot.slane %v1596_v0, 1  ;;  %v2349_v43 = vrot.slane %v2348_v1, 2 }
 0x69e   : > { %v1598_v42 = vadd.f32 %v1597_v59, %v1596_v0  ;;  %v2350_v32 = vadd.f32 %v2349_v43, %v2348_v1  ;;  %v7366_v0 = vmul.f32 %v3539_v12, %v3531_v45  ;;  %v3201_v59 = vshll.u32 %v3200_v53, 16  ;;  %v1949_v53 = vld [vmem:[#allocation3 + $0x40] sm:$0xff] }
 0x69f   : > { %v1215_v17 = vpop.permute.xlu0 %1214  ;;  %v1589_v12 = vld [vmem:[#allocation4 + $0x1] sm:$0x1] }
 0x6a0   : > { %vm1235_vm7 = vcmp.eq.s32.totalorder %v1215_v17, 1  ;;  %5210 = vpush %v1598_v42  ;;  %v2351_v6 = vrot.slane %v2350_v32, 1  ;;  %v3230_v17 = vcvt.f32.s32 %v7108_v55 }
 0x6a1   : > { %v1243_v31 = vsel %vm1235_vm7, %v8215_v2, %v1195_v51  ;;  %v3186_v51 = vshll.u32 %v3185_v50, 16  ;;  %v3215_v2 = vcvt.f32.s32 %v7124_v41 }
 0x6a2   : > { %1252 = vst.msk [vmem:[#allocation3 + $0x8] sm:$0xff] %vm8216_vm3, %v1243_v31  ;;  %v2352_v11 = vadd.f32 %v2351_v6, %v2350_v32  ;;  %vm8223_vm3 = vmmov %vm8218_vm0 }
 0x6a3   : > { %v1221_v40 = vpop.permute.xlu0 %1220 }
 0x6a4   : > { %vm1237_vm6 = vcmp.eq.s32.totalorder %v1221_v40, 1  ;;  %5212 = vpush %v2352_v11 }
 0x6a5   : > { %v1245_v20 = vsel %vm1237_vm6, %v8217_v7, %v1197_v29  ;;  %v3231_v29 = vshll.u32 %v3230_v17, 16  ;;  %v3216_v7 = vshll.u32 %v3215_v2, 16  ;;  %v8224_v17 = vld [vmem:[#allocation60_spill] sm:$0xff] }
 0x6a6   : > { %1254 = vst.msk [vmem:[#allocation3 + $0x18] sm:$0xff] %vm8218_vm0, %v1245_v20 }
 0x6a7   : > { %v1230_v30 = vpop.permute.xlu0 %1229 }
 0x6a8   : > { %vm1240_vm11 = vcmp.eq.s32.totalorder %v1230_v30, 1 }
 0x6a9   : > { %v1248_v8 = vsel %vm1240_vm11, %v8219_v46, %v1200_v28  ;;  %v7313_v21 = vld [vmem:[#allocation3 + $0x8] sm:$0xff]  ;;  %v3260_v28 = vcvt.f32.s32 %v7133_v63  ;;  %v3245_v46 = vcvt.f32.s32 %v7149_v18  ;;  %vm8226_vm11 = vmmov %vm8218_vm0 }
 0x6aa   : > { %1257 = vst.msk [vmem:[#allocation3 + $0x30] sm:$0xff] %vm8220_vm1, %v1248_v8  ;;  %v7318_v22 = vmul.f32 %v7313_v21, %v7309_v27 }
 0x6ab   : > { %v2724_v15 = vpop.permute.xlu0 %2723 }
 0x6ac   : > { %vm2744_vm10 = vcmp.eq.s32.totalorder %v2724_v15, 1  ;;  %3558 = vrot.lane.b32.xlu1 %v7318_v22, %s5435_s25 }
 0x6ad   : > { %v2752_v36 = vsel %vm2744_vm10, %v7271_v14, %v2704_v9  ;;  %v3535_v38 = vld [vmem:[#allocation3 + $0x18] sm:$0xff]  ;;  %v3261_v9 = vshll.u32 %v3260_v28, 16  ;;  %v4728_v28 = vld [vmem:[%s7178_s30 + $0x48] sm:$0xff]  ;;  %vm8228_vm10 = vmmov %vm8218_vm0 }
 0x6ae   : > { %2760 = vst.msk [vmem:[#allocation3 + $0x88] sm:$0xff] %vm8221_vm5, %v2752_v36  ;;  %v7324_v47 = vmul.f32 %v3535_v38, %v3527_v4  ;;  %v3639_v60 = vmax.f32 %v3535_v38, 1e-16  ;;  %v3246_v38 = vshll.u32 %v3245_v46, 16 }
 0x6b0   : > { %5273 = vrsqrt.f32 %v3639_v60  ;;  %3562 = vrot.lane.b32.xlu0 %v7324_v47, %s5435_s25 }
 0x6b1   : > { %v7336_v48 = vld [vmem:[#allocation3 + $0x30] sm:$0xff] }
 0x6b2   : > { %v7340_v14 = vmul.f32 %v7336_v48, %v7327_v23 }
 0x6b4   : > { %3568 = vrot.lane.b32.xlu1 %v7340_v14, %s5435_s25  ;;  %3564 = vrot.lane.b32.xlu0 %v7344_v49, %s5435_s25 }
 0x6b8   : > { %3588 = vrot.lane.b32.xlu1 %v7195_v56, %s5436_s26  ;;  %3566 = vrot.lane.b32.xlu0 %v7357_v19, %s5435_s25  ;;  %v3198_v62 = vpop.xlane.xlu1 %3197 }
 0x6b9   : > { %v3199_v37 = vcvt.f32.s32 %v3198_v62 }
 0x6ba   : > { %v5274_v1 = vpop.eup %5273 }
 0x6bb   : > { %v7368_v43 = vmul.f32 %v5274_v1, %v5272_v16  ;;  %v3202_v42 = vadd.s32 %v3201_v59, %v3199_v37  ;;  %v8222_v16 = vld [vmem:[#allocation61_spill] sm:$0xff] }
 0x6bc   : > { %3592 = vrot.lane.b32.xlu1 %v7210_v24, %s5436_s26  ;;  %3570 = vrot.lane.b32.xlu0 %v7366_v0, %s5435_s25  ;;  %v3183_v33 = vpop.xlane.xlu1 %3182 }
 0x6bd   : > { %v3184_v32 = vcvt.f32.s32 %v3183_v33  ;;  %vm3266_vm14 = vcmp.eq.s32.totalorder %v5708_v44, %v3202_v42  ;;  %v1950_v33 = vld [vmem:[#allocation3 + $0x48] sm:$0xff]  ;;  %v2343_v42 = vld [vmem:[#allocation4 + $0x2] sm:$0x1] }
 0x6be   : > { %v4708_v40 = vsel %vm3266_vm14, 1.0, %v8076_v3 }
 0x6bf   : > { %v3187_v35 = vadd.s32 %v3186_v51, %v3184_v32  ;;  %v3636_v32 = vmax.f32 %v7191_v54, 1e-16 }
 0x6c0   : > { %3596 = vrot.lane.b32.xlu1 %v7344_v49, %s5436_s26  ;;  %3590 = vrot.lane.b32.xlu0 %v7318_v22, %s5436_s26  ;;  %v3228_v6 = vpop.xlane.xlu1 %3227 }
 0x6c1   : > { %v3229_v31 = vcvt.f32.s32 %v3228_v6  ;;  %vm3265_vm15 = vcmp.eq.s32.totalorder %v5708_v44, %v3187_v35 }
 0x6c2   : > { %v4707_v11 = vsel %vm3265_vm15, 1.0, %v8076_v3  ;;  %vm8230_vm15 = vmmov %vm8218_vm0 }
 0x6c3   : > { %5102 = vmatprep.mubr.msk.f32.mxu1 %vm649_vm2, %v4707_v11  ;;  %v3232_v55 = vadd.s32 %v3231_v29, %v3229_v31  ;;  %v4727_v29 = vld [vmem:[%s7178_s30 + $0x40] sm:$0xff]  ;;  %v3621_v11 = vmax.f32 %v7309_v27, 1e-16  ;;  %v8227_v27 = vld [vmem:[#allocation62_spill] sm:$0xff] }
 0x6c4   : > { %3600 = vrot.lane.b32.xlu1 %v7340_v14, %s5436_s26  ;;  %3594 = vrot.lane.b32.xlu0 %v7324_v47, %s5436_s26  ;;  %v3213_v41 = vpop.xlane.xlu1 %3212 }
 0x6c5   : > { %5103 = vmatmul.mubr.msk.f32.gmra.mrb[30].mxu1 %vm649_vm2, %v4708_v40  ;;  %v3214_v20 = vcvt.f32.s32 %v3213_v41  ;;  %vm3268_vm13 = vcmp.eq.s32.totalorder %v5708_v44, %v3232_v55  ;;  %v8225_v55 = vld [vmem:[#allocation63_spill] sm:$0xff] }
 0x6c6   : > { %v4710_v15 = vsel %vm3268_vm13, 1.0, %v8076_v3  ;;  %v1952_v41 = vld [vmem:[#allocation3 + $0x58] sm:$0xff]  ;;  %vm8232_vm13 = vmmov %vm8218_vm0 }
 0x6c7   : > { %v3217_v30 = vadd.s32 %v3216_v7, %v3214_v20 }
 0x6c8   : > { %3598 = vrot.lane.b32.xlu0 %v7357_v19, %s5436_s26  ;;  %v3258_v4 = vpop.xlane.xlu1 %3257 }
 0x6c9   : > { %v3259_v8 = vcvt.f32.s32 %v3258_v4  ;;  %vm3267_vm12 = vcmp.eq.s32.totalorder %v5708_v44, %v3217_v30  ;;  %v3828_v30 = vmax.f32 %v4727_v29, 1e-16 }
 0x6ca   : > { %v4709_v39 = vsel %vm3267_vm12, 1.0, %v8076_v3 }
 0x6cb   : > { %5105 = vmatprep.mubr.msk.f32.mxu1 %vm649_vm2, %v4709_v39  ;;  %v3262_v63 = vadd.s32 %v3261_v9, %v3259_v8  ;;  %v3622_v8 = vmax.f32 %v7202_v57, 1e-16  ;;  %v1953_v9 = vld [vmem:[#allocation3 + $0x60] sm:$0xff] }
 0x6cc   : > { %3602 = vrot.lane.b32.xlu0 %v7366_v0, %s5436_s26  ;;  %5106 = vmatmul.mubr.msk.f32.gmra.mrb[32].mxu1 %vm649_vm2, %v4710_v15  ;;  %v3243_v36 = vpop.xlane.xlu1 %3242  ;;  %v3638_v15 = vmax.f32 %v7204_v58, 1e-16  ;;  %v1954_v58 = vld [vmem:[#allocation3 + $0x68] sm:$0xff] }
 0x6cd   : > { %v3244_v60 = vcvt.f32.s32 %v3243_v36  ;;  %vm3270_vm4 = vcmp.eq.s32.totalorder %v5708_v44, %v3262_v63  ;;  %v4729_v36 = vld [vmem:[%s7178_s30 + $0x50] sm:$0xff] }
 0x6ce   : > { %v4712_v59 = vsel %vm3270_vm4, 1.0, %v8076_v3  ;;  %vm8234_vm4 = vmmov %vm8218_vm0 }
 0x6cf   : > { %v3247_v18 = vadd.s32 %v3246_v38, %v3244_v60  ;;  %v3829_v38 = vmax.f32 %v4728_v28, 1e-16  ;;  %v7433_v60 = vpop.permute.xlu0 %2741 }
 0x6d0   : > { %v1967_v45 = vpop.permute.xlu1 %1966 }
 0x6d1   : > { %vm1989_vm9 = vcmp.eq.s32.totalorder %v1967_v45, 1  ;;  %s5211_s7 = spop %5210  ;;  %vm3269_vm7 = vcmp.eq.s32.totalorder %v5708_v44, %v3247_v18  ;;  %v3620_v44 = vmax.f32 %v7189_v13, 1e-16  ;;  %v3637_v13 = vmax.f32 %v7313_v21, 1e-16  ;;  %v8229_v18 = vld [vmem:[#allocation65_spill] sm:$0xff] }
 0x6d2   : > { %v1997_v62 = vsel %vm1989_vm9, %v8222_v16, %v1949_v53  ;;  %v1600_v50 = vstv %s5211_s7  ;;  %v4711_v37 = vsel %vm3269_vm7, 1.0, %v8076_v3  ;;  %v1951_v3 = vld [vmem:[#allocation3 + $0x50] sm:$0xff]  ;;  %vm8236_vm7 = vmmov %vm8218_vm0 }
 0x6d3   : > { %2005 = vst.msk [vmem:[#allocation3 + $0x40] sm:$0xff] %vm8223_vm3, %v1997_v62  ;;  %v1601_v1 = vadd.f32 %v1600_v50, %v1589_v12  ;;  %5108 = vmatprep.mubr.msk.f32.mxu1 %vm649_vm2, %v4711_v37  ;;  %5275 = vrsqrt.f32 %v3620_v44  ;;  %v8231_v37 = vld [vmem:[#allocation64_spill] sm:$0xff]  ;;  %v7445_v44 = vpop.permute.xlu0 %3474 }
 0x6d4   : > { %5109 = vmatmul.mubr.msk.f32.gmra.mrb[34].mxu1 %vm649_vm2, %v4712_v59  ;;  %v1970_v51 = vpop.permute.xlu1 %1969  ;;  %5277 = vrsqrt.f32 %v3636_v32 }
 0x6d5   : > { %1602 = vst [vmem:[#allocation4 + $0x1] sm:$0x1] %v1601_v1  ;;  %vm1990_vm6 = vcmp.eq.s32.totalorder %v1970_v51, 1  ;;  %s5213_s8 = spop %5212  ;;  %5279 = vrsqrt.f32 %v3621_v11  ;;  %v1956_v11 = vld [vmem:[#allocation3 + $0x78] sm:$0xff] }
 0x6d6   : > { %v1998_v35 = vsel %vm1990_vm6, %v8224_v17, %v1950_v33  ;;  %v2354_v6 = vstv %s5213_s8  ;;  %5281 = vrsqrt.f32 %v3637_v13  ;;  %v1955_v33 = vld [vmem:[#allocation3 + $0x70] sm:$0xff]  ;;  %v4730_v17 = vld [vmem:[%s7178_s30 + $0x58] sm:$0xff]  ;;  %vm8237_vm6 = vmmov %vm8218_vm0 }
 0x6d7   : > { %2006 = vst.msk [vmem:[#allocation3 + $0x48] sm:$0xff] %vm8218_vm0, %v1998_v35  ;;  %v2355_v2 = vadd.f32 %v2354_v6, %v2343_v42  ;;  %5283 = vrsqrt.f32 %v3828_v30  ;;  %v3830_v6 = vmax.f32 %v4729_v36, 1e-16  ;;  %v8235_v30 = vld [vmem:[#allocation66_spill] sm:$0xff] }
 0x6d8   : > { %v1973_v31 = vpop.permute.xlu1 %1972 }
 0x6d9   : > { %2356 = vst [vmem:[#allocation4 + $0x2] sm:$0x1] %v2355_v2  ;;  %vm1991_vm2 = vcmp.eq.s32.totalorder %v1973_v31, 1 }
 0x6da   : > { %v1999_v54 = vsel %vm1991_vm2, %v8225_v55, %v1951_v3  ;;  %v3740_v40 = vld [vmem:[#allocation3 + $0x40] sm:$0xff]  ;;  %v8233_v3 = vld [vmem:[#allocation67_spill] sm:$0xff]  ;;  %vm8238_vm2 = vmmov %vm8234_vm4 }
 0x6db   : > { %2007 = vst.msk [vmem:[#allocation3 + $0x50] sm:$0xff] %vm8226_vm11, %v1999_v54  ;;  %v7419_v7 = vmul.f32 %v4727_v29, %v3740_v40  ;;  %v3844_v4 = vmax.f32 %v3740_v40, 1e-16 }
 0x6dc   : > { %v1976_v20 = vpop.permute.xlu1 %1975 }
 0x6dd   : > { %vm1992_vm1 = vcmp.eq.s32.totalorder %v1976_v20, 1  ;;  %3764 = vrot.lane.b32.xlu1 %v7419_v7, %s5435_s25  ;;  %5285 = vrsqrt.f32 %v3844_v4  ;;  %v5276_v12 = vpop.eup %5275  ;;  %v3624_v4 = vmax.f32 %v7330_v61, 1e-16  ;;  %v2705_v61 = vld [vmem:[#allocation3 + $0x90] sm:$0xff] }
 0x6de   : > { %v2000_v21 = vsel %vm1992_vm1, %v8227_v27, %v1952_v41  ;;  %v3741_v46 = vld [vmem:[#allocation3 + $0x48] sm:$0xff]  ;;  %5287 = vrsqrt.f32 %v3622_v8  ;;  %v5278_v62 = vpop.eup %5277  ;;  %vm8239_vm1 = vmmov %vm8238_vm2 }
 0x6df   : > { %2008 = vst.msk [vmem:[#allocation3 + $0x58] sm:$0xff] %vm8228_vm10, %v2000_v21  ;;  %v7427_v39 = vmul.f32 %v4728_v28, %v3741_v46  ;;  %v3845_v53 = vmax.f32 %v3741_v46, 1e-16  ;;  %5289 = vrsqrt.f32 %v3638_v15  ;;  %v5280_v59 = vpop.eup %5279  ;;  %v3652_v51 = vmul.f32 %v5278_v62, %v5276_v12  ;;  %v7458_v28 = vpop.permute.xlu0 %3477  ;;  %v2703_v46 = vld [vmem:[#allocation3 + $0x80] sm:$0xff] }
 0x6e0   : > { %v1979_v63 = vpop.permute.xlu1 %1978  ;;  %5291 = vrsqrt.f32 %v3829_v38  ;;  %v5282_v42 = vpop.eup %5281  ;;  %v3831_v15 = vmax.f32 %v4730_v17, 1e-16  ;;  %vm3498_vm10 = vcmp.eq.s32.totalorder %v7458_v28, 1 }
 0x6e1   : > { %vm1993_vm5 = vcmp.eq.s32.totalorder %v1979_v63, 1  ;;  %3766 = vrot.lane.b32.xlu0 %v7427_v39, %s5435_s25  ;;  %5293 = vrsqrt.f32 %v3845_v53  ;;  %v5284_v29 = vpop.eup %5283  ;;  %v3653_v13 = vmul.f32 %v5282_v42, %v5280_v59  ;;  %v3641_v42 = vmax.f32 %v7349_v25, 1e-16 }
 0x6e2   : > { %v2001_v57 = vsel %vm1993_vm5, %v8229_v18, %v1953_v9  ;;  %v3742_v45 = vld [vmem:[#allocation3 + $0x50] sm:$0xff]  ;;  %5295 = vrsqrt.f32 %v3830_v6  ;;  %vm3497_vm5 = vcmp.eq.s32.totalorder %v7445_v44, 1 }
 0x6e3   : > { %2009 = vst.msk [vmem:[#allocation3 + $0x60] sm:$0xff] %vm8230_vm15, %v2001_v57  ;;  %v7437_v16 = vmul.f32 %v4729_v36, %v3742_v45  ;;  %v3846_v2 = vmax.f32 %v3742_v45, 1e-16  ;;  %v3640_v36 = vmax.f32 %v7332_v26, 1e-16  ;;  %v7469_v45 = vpop.permute.xlu0 %3480  ;;  %v4731_v26 = vld [vmem:[%s7178_s30 + $0x60] sm:$0xff]  ;;  %vm8241_vm15 = vmmov %vm8239_vm1 }
 0x6e4   : > { %v1982_v50 = vpop.permute.xlu1 %1981 }
 0x6e5   : > { %vm1994_vm14 = vcmp.eq.s32.totalorder %v1982_v50, 1  ;;  %3796 = vrot.lane.b32.xlu0 %v7419_v7, %s5436_s26  ;;  %3768 = vrot.lane.b32.xlu1 %v7437_v16, %s5435_s25  ;;  %5297 = vrsqrt.f32 %v3846_v2  ;;  %v3625_v50 = vmax.f32 %v7347_v5, 1e-16 }
 0x6e6   : > { %v2002_v1 = vsel %vm1994_vm14, %v8231_v37, %v1954_v58  ;;  %v3743_v35 = vld [vmem:[#allocation3 + $0x58] sm:$0xff]  ;;  %5299 = vrsqrt.f32 %v3624_v4  ;;  %vm8242_vm14 = vmmov %vm8239_vm1 }
 0x6e7   : > { %2010 = vst.msk [vmem:[#allocation3 + $0x68] sm:$0xff] %vm8232_vm13, %v2002_v1  ;;  %v7453_v55 = vmul.f32 %v4730_v17, %v3743_v35  ;;  %v5286_v54 = vpop.eup %5285  ;;  %v3847_v38 = vmax.f32 %v3743_v35, 1e-16  ;;  %5301 = vrsqrt.f32 %v3831_v15  ;;  %v2706_v37 = vld [vmem:[#allocation3 + $0x98] sm:$0xff]  ;;  %v4732_v35 = vld [vmem:[%s7178_s30 + $0x68] sm:$0xff] }
 0x6e8   : > { %v1985_v32 = vpop.permute.xlu1 %1984  ;;  %v5288_v41 = vpop.eup %5287  ;;  %v3860_v8 = vmul.f32 %v5286_v54, %v5284_v29  ;;  %5303 = vrsqrt.f32 %v3640_v36  ;;  %v3642_v54 = vmax.f32 %v7336_v48, 1e-16 }
 0x6e9   : > { %vm1995_vm12 = vcmp.eq.s32.totalorder %v1985_v32, 1  ;;  %3668 = vrot.lane.b32.xlu0 %v3652_v51, %s5437_s9  ;;  %3798 = vrot.lane.b32.xlu1 %v7427_v39, %s5436_s26  ;;  %v5290_v20 = vpop.eup %5289  ;;  %5305 = vrsqrt.f32 %v3847_v38  ;;  %v3832_v51 = vmax.f32 %v4731_v26, 1e-16  ;;  %v7516_v38 = vld [vmem:[%s7178_s30 + $0x78] sm:$0xff] }
 0x6ea   : > { %v2003_v31 = vsel %vm1995_vm12, %v8233_v3, %v1955_v33  ;;  %v5292_v21 = vpop.eup %5291  ;;  %v3654_v53 = vmul.f32 %v5290_v20, %v5288_v41  ;;  %v3744_v58 = vld [vmem:[#allocation3 + $0x60] sm:$0xff]  ;;  %5307 = vrsqrt.f32 %v3625_v50 }
 0x6eb   : > { %2011 = vst.msk [vmem:[#allocation3 + $0x70] sm:$0xff] %vm8234_vm4, %v2003_v31  ;;  %v5294_v9 = vpop.eup %5293  ;;  %v7477_v1 = vmul.f32 %v4731_v26, %v3744_v58  ;;  %v3848_v32 = vmax.f32 %v3744_v58, 1e-16  ;;  %5309 = vrsqrt.f32 %v3832_v51  ;;  %v7537_v51 = vld [vmem:[%s7178_s30 + $0x88] sm:$0xff]  ;;  %vm8243_vm4 = vcmask 7168  }
 0x6ec   : > { %v1988_v40 = vpop.permute.xlu1 %1987  ;;  %v3861_v57 = vmul.f32 %v5294_v9, %v5292_v21  ;;  %v5296_v62 = vpop.eup %5295  ;;  %5311 = vrsqrt.f32 %v3641_v42 }
 0x6ed   : > { %vm1996_vm9 = vcmp.eq.s32.totalorder %v1988_v40, 1  ;;  %3670 = vrot.lane.b32.xlu1 %v3653_v13, %s5437_s9  ;;  %3770 = vrot.lane.b32.xlu0 %v7453_v55, %s5435_s25  ;;  %5313 = vrsqrt.f32 %v3848_v32  ;;  %v3833_v13 = vmax.f32 %v4732_v35, 1e-16  ;;  %v4733_v40 = vld [vmem:[%s7178_s30 + $0x70] sm:$0xff]  ;;  %v7541_v32 = vld [vmem:[#allocation3 + $0x88] sm:$0xff] }
 0x6ee   : > { %v2004_v27 = vsel %vm1996_vm9, %v8235_v30, %v1956_v11  ;;  %v3745_v6 = vld [vmem:[#allocation3 + $0x68] sm:$0xff]  ;;  %v3834_v48 = vmax.f32 %v4733_v40, 1e-16  ;;  %vm8244_vm9 = vmmov %vm8243_vm4 }
 0x6ef   : > { %2012 = vst.msk [vmem:[#allocation3 + $0x78] sm:$0xff] %vm8236_vm7, %v2004_v27  ;;  %v5298_v59 = vpop.eup %5297  ;;  %v7493_v31 = vmul.f32 %v4732_v35, %v3745_v6  ;;  %vm8245_vm7 = vmmov %vm8239_vm1 }
 0x6f0   : > { %v2721_v63 = vpop.permute.xlu1 %2720  ;;  %v3862_v17 = vmul.f32 %v5298_v59, %v5296_v62  ;;  %v5300_v25 = vpop.eup %5299 }
 0x6f1   : > { %vm2743_vm3 = vcmp.eq.s32.totalorder %v2721_v63, 1  ;;  %3800 = vrot.lane.b32.xlu1 %v7437_v16, %s5436_s26  ;;  %3876 = vrot.lane.b32.xlu0 %v3860_v8, %s5437_s9  ;;  %v5302_v2 = vpop.eup %5301 }
 0x6f2   : > { %v2751_v18 = vsel %vm2743_vm3, %v7276_v34, %v2703_v46  ;;  %v5304_v3 = vpop.eup %5303  ;;  %vm8246_vm3 = vmmov %vm8239_vm1 }
 0x6f3   : > { %2759 = vst.msk [vmem:[#allocation3 + $0x80] sm:$0xff] %vm8237_vm6, %v2751_v18  ;;  %v5306_v29 = vpop.eup %5305  ;;  %v3656_v41 = vmul.f32 %v5304_v3, %v5300_v25  ;;  %vm2750_vm6 = vcmp.eq.s32.totalorder %v7433_v60, 1 }
 0x6f4   : > { %v2727_v12 = vpop.permute.xlu1 %2726  ;;  %v3863_v20 = vmul.f32 %v5306_v29, %v5302_v2  ;;  %v5308_v30 = vpop.eup %5307 }
 0x6f5   : > { %vm2745_vm0 = vcmp.eq.s32.totalorder %v2727_v12, 1  ;;  %3878 = vrot.lane.b32.xlu1 %v3861_v57, %s5437_s9  ;;  %3672 = vrot.lane.b32.xlu0 %v3654_v53, %s5437_s9  ;;  %v5310_v27 = vpop.eup %5309 }
 0x6f6   : > { %v2753_v34 = vsel %vm2745_vm0, %v7291_v10, %v2705_v61  ;;  %v7484_v10 = vpop.permute.xlu0 %3483  ;;  %v5312_v46 = vpop.eup %5311  ;;  %v7518_v18 = vld [vmem:[#allocation3 + $0x78] sm:$0xff] }
 0x6f7   : > { %2761 = vst.msk [vmem:[#allocation3 + $0x90] sm:$0xff] %vm8238_vm2, %v2753_v34  ;;  %v5314_v9 = vpop.eup %5313  ;;  %v3657_v15 = vmul.f32 %v5312_v46, %v5308_v30  ;;  %v7524_v12 = vmul.f32 %v7516_v38, %v7518_v18  ;;  %vm8247_vm2 = vmmov %vm8243_vm4 }
 0x6f8   : > { %v2730_v33 = vpop.permute.xlu1 %2729  ;;  %v3864_v63 = vmul.f32 %v5314_v9, %v5310_v27 }
 0x6f9   : > { %vm2746_vm11 = vcmp.eq.s32.totalorder %v2730_v33, 1  ;;  %3802 = vrot.lane.b32.xlu0 %v7453_v55, %s5436_s26  ;;  %3772 = vrot.lane.b32.xlu1 %v7477_v1, %s5435_s25  ;;  %8240 = vst [vmem:[#allocation68_spill] sm:$0xff] %v7524_v12 }
 0x6fa   : > { %v2754_v5 = vsel %vm2746_vm11, %v7288_v52, %v2706_v37  ;;  %v3626_v52 = vmax.f32 %v7327_v23, 1e-16  ;;  %v7495_v11 = vpop.permute.xlu0 %3486  ;;  %v3746_v23 = vld [vmem:[#allocation3 + $0x70] sm:$0xff]  ;;  %v7546_v35 = vld [vmem:[#allocation3 + $0x80] sm:$0xff]  ;;  %vm8248_vm11 = vmmov %vm8247_vm2 }
 0x6fb   : > { %2762 = vst.msk [vmem:[#allocation3 + $0x98] sm:$0xff] %vm8239_vm1, %v2754_v5  ;;  %v3850_v4 = vmax.f32 %v3746_v23, 1e-16  ;;  %v7507_v8 = vmul.f32 %v4733_v40, %v3746_v23  ;;  %v7583_v40 = vld [vmem:[%s7178_s30 + $0x90] sm:$0xff]  ;;  %vm8249_vm1 = vmmov %vm8247_vm2 }
 0x6fc   : > { %5315 = vrsqrt.f32 %v3626_v52  ;;  %v7532_v34 = vpop.permute.xlu1 %2732  ;;  %v7568_v52 = vld [vmem:[%s7178_s30 + $0x98] sm:$0xff] }
 0x6fd   : > { %3674 = vrot.lane.b32.xlu0 %v7368_v43, %s5437_s9  ;;  %3880 = vrot.lane.b32.xlu1 %v3862_v17, %s5437_s9  ;;  %v3849_v43 = vmax.f32 %v3745_v6, 1e-16  ;;  %5317 = vrsqrt.f32 %v3833_v13  ;;  %v7544_v17 = vld [vmem:[%s7178_s30 + $0x80] sm:$0xff]  ;;  %v7553_v6 = vmul.f32 %v7537_v51, %v7541_v32  ;;  %vm2747_vm12 = vcmp.eq.s32.totalorder %v7532_v34, 1 }
 0x6fe   : > { %5319 = vrsqrt.f32 %v3642_v54  ;;  %v7505_v21 = vpop.permute.xlu0 %3489  ;;  %v7557_v25 = vmul.f32 %v7544_v17, %v7546_v35 }
 0x6ff   : > { %5321 = vrsqrt.f32 %v3849_v43 }
 0x700   : > { %5323 = vrsqrt.f32 %v3834_v48  ;;  %v7539_v5 = vpop.permute.xlu1 %2735 }
 0x701   : > { %3804 = vrot.lane.b32.xlu0 %v7477_v1, %s5436_s26  ;;  %3774 = vrot.lane.b32.xlu1 %v7493_v31, %s5435_s25  ;;  %5325 = vrsqrt.f32 %v3850_v4  ;;  %vm2748_vm13 = vcmp.eq.s32.totalorder %v7539_v5, 1  ;;  %v4037_v5 = vmax.f32 %v7537_v51, 1e-16 }
 0x702   : > { %v7513_v36 = vpop.permute.xlu0 %3492  ;;  %v7570_v29 = vld [vmem:[#allocation3 + $0x98] sm:$0xff] }
 0x703   : > { %v7580_v43 = vmul.f32 %v7568_v52, %v7570_v29  ;;  %5327 = vrsqrt.f32 %v4037_v5 }
 0x704   : > { %v7565_v3 = vpop.permute.xlu1 %2738 }
 0x705   : > { %3676 = vrot.lane.b32.xlu0 %v3656_v41, %s5437_s9  ;;  %3882 = vrot.lane.b32.xlu1 %v3863_v20, %s5437_s9  ;;  %v7585_v41 = vld [vmem:[#allocation3 + $0x90] sm:$0xff]  ;;  %vm2749_vm0 = vcmp.eq.s32.totalorder %v7565_v3, 1 }
 0x706   : > { %v5316_v61 = vpop.eup %5315  ;;  %v7530_v58 = vpop.permute.xlu0 %3495  ;;  %v7593_v30 = vmul.f32 %v7583_v40, %v7585_v41 }
 0x707   : > { %v5318_v57 = vpop.eup %5317 }
 0x708   : > { %v5320_v53 = vpop.eup %5319 }
 0x709   : > { %3806 = vrot.lane.b32.xlu0 %v7493_v31, %s5436_s26  ;;  %3776 = vrot.lane.b32.xlu1 %v7507_v8, %s5435_s25  ;;  %v5322_v26 = vpop.eup %5321  ;;  %v3658_v50 = vmul.f32 %v5320_v53, %v5316_v61 }
 0x70a   : > { %v5324_v62 = vpop.eup %5323  ;;  %v3865_v37 = vmul.f32 %v5322_v26, %v5318_v57  ;;  %v3557_v42 = vpop.permute.xlu0 %3556 }
 0x70b   : > { %v5326_v59 = vpop.eup %5325 }
 0x70c   : > { %v3866_v33 = vmul.f32 %v5326_v59, %v5324_v62 }
 0x70d   : > { %3678 = vrot.lane.b32.xlu0 %v3657_v15, %s5437_s9  ;;  %3884 = vrot.lane.b32.xlu1 %v3864_v63, %s5437_s9 }
 0x70e   : > { %v7563_v2 = vpop.permute.xlu0 %3560 }
 0x711   : > { %3808 = vrot.lane.b32.xlu0 %v7507_v8, %s5436_s26  ;;  %3778 = vrot.lane.b32.xlu1 %v7524_v12, %s5435_s25 }
 0x715   : > { %3680 = vrot.lane.b32.xlu0 %v3658_v50, %s5437_s9  ;;  %3886 = vrot.lane.b32.xlu1 %v3865_v37, %s5437_s9 }
 0x719   : > { %3888 = vrot.lane.b32.xlu0 %v3866_v33, %s5437_s9  ;;  %3810 = vrot.lane.b32.xlu1 %v7524_v12, %s5436_s26 }
 0x71d   : > { %3974 = vrot.lane.b32.xlu0 %v7553_v6, %s5435_s25  ;;  %3972 = vrot.lane.b32.xlu1 %v7557_v25, %s5435_s25 }
 0x71e   : > { %v3559_v13 = vpop.permute.xlu1 %3558 }
 0x71f   : > { %v3581_v9 = vadd.f32 %v3559_v13, %v7318_v22 }
 0x721   : > { %4006 = vrot.lane.b32.xlu0 %v7553_v6, %s5436_s26  ;;  %4004 = vrot.lane.b32.xlu1 %v7557_v25, %s5436_s26 }
 0x722   : > { %v7576_v54 = vpop.permute.xlu0 %3562 }
 0x725   : > { %4010 = vrot.lane.b32.xlu1 %v7580_v43, %s5436_s26  ;;  %3978 = vrot.lane.b32.xlu0 %v7580_v43, %s5435_s25 }
 0x726   : > { %v3565_v20 = vpop.permute.xlu0 %3564  ;;  %v3569_v23 = vpop.permute.xlu1 %3568 }
 0x727   : > { %v3584_v15 = vadd.f32 %v3565_v20, %v7344_v49  ;;  %v3586_v26 = vadd.f32 %v3569_v23, %v7340_v14 }
 0x729   : > { %4008 = vrot.lane.b32.xlu1 %v7593_v30, %s5436_s26  ;;  %3976 = vrot.lane.b32.xlu0 %v7593_v30, %s5435_s25 }
 0x72a   : > { %v3567_v48 = vpop.permute.xlu0 %3566  ;;  %v3589_v27 = vpop.permute.xlu1 %3588 }
 0x72b   : > { %v3585_v59 = vadd.f32 %v3567_v48, %v7357_v19 }
 0x72e   : > { %v3571_v4 = vpop.permute.xlu0 %3570  ;;  %v7599_v46 = vpop.permute.xlu1 %3592 }
 0x72f   : > { %v3587_v22 = vadd.f32 %v3571_v4, %v7366_v0 }
 0x732   : > { %v3591_v63 = vpop.permute.xlu0 %3590  ;;  %v3597_v61 = vpop.permute.xlu1 %3596 }
 0x733   : > { %v3613_v57 = vadd.f32 %v3591_v63, %v3581_v9  ;;  %v7603_v53 = vadd.f32 %v3597_v61, %v3584_v15  ;;  %v3580_v63 = vadd.f32 %v3557_v42, %v7195_v56 }
 0x735   : > { %v3612_v19 = vadd.f32 %v3589_v27, %v3580_v63  ;;  %v2707_v27 = vld [vmem:[#allocation3 + $0xa0] sm:$0xff] }
 0x736   : > { %v7606_v62 = vpop.permute.xlu0 %3594  ;;  %v3601_v50 = vpop.permute.xlu1 %3600 }
 0x737   : > { %v7608_v37 = vadd.f32 %v3601_v50, %v3586_v26  ;;  %v3458_v26 = vld [vmem:[#allocation3 + $0xc8] sm:$0xff]  ;;  %v3457_v50 = vld [vmem:[#allocation3 + $0xc0] sm:$0xff] }
 0x73a   : > { %v3599_v33 = vpop.permute.xlu0 %3598 }
 0x73b   : > { %v7611_v12 = vadd.f32 %v3599_v33, %v3585_v59 }
 0x73e   : > { %v3603_v49 = vpop.permute.xlu0 %3602 }
 0x73f   : > { %v7614_v13 = vadd.f32 %v3603_v49, %v3587_v22 }
 0x74f   : > { %v3765_v20 = vpop.permute.xlu1 %3764 }
 0x750   : > { %v3788_v15 = vadd.f32 %v3765_v20, %v7419_v7  ;;  %v2708_v20 = vld [vmem:[#allocation3 + $0xa8] sm:$0xff] }
 0x753   : > { %v3767_v9 = vpop.permute.xlu0 %3766 }
 0x754   : > { %v3789_v0 = vadd.f32 %v3767_v9, %v7427_v39 }
 0x757   : > { %v3797_v14 = vpop.permute.xlu0 %3796  ;;  %v3769_v23 = vpop.permute.xlu1 %3768 }
 0x758   : > { %v3820_v61 = vadd.f32 %v3797_v14, %v3788_v15  ;;  %v3790_v14 = vadd.f32 %v3769_v23, %v7437_v16  ;;  %v4053_v16 = vmax.f32 %v7541_v32, 1e-16  ;;  %v4052_v32 = vmax.f32 %v7546_v35, 1e-16 }
 0x75a   : > { %v5101_v48 = vpop.f32.mrb[28].mxu1  ;;  %5329 = vrsqrt.f32 %v4053_v16 }
 0x75b   : > { %v3506_v4 = vsel %vm3498_vm10, %v5101_v48, %v3458_v26  ;;  %v3384_v59 = vpop.f32.mrb[29].mxu1  ;;  %v3669_v33 = vpop.permute.xlu0 %3668  ;;  %v3582_v48 = vadd.f32 %v7563_v2, %v7210_v24  ;;  %v4036_v24 = vmax.f32 %v7544_v17, 1e-16  ;;  %vm8250_vm10 = vmmov %vm8246_vm3 }
 0x75c   : > { %3514 = vst.msk [vmem:[#allocation3 + $0xc8] sm:$0xff] %vm8241_vm15, %v3506_v4  ;;  %v3505_v7 = vsel %vm3497_vm5, %v3384_v59, %v3457_v50  ;;  %v3692_v22 = vmul.f32 %v3669_v33, %v3612_v19  ;;  %v3799_v49 = vpop.permute.xlu1 %3798  ;;  %v2710_v33 = vld [vmem:[#allocation3 + $0xb8] sm:$0xff]  ;;  %vm8251_vm5 = vmmov %vm8246_vm3 }
 0x75d   : > { %3513 = vst.msk [vmem:[#allocation3 + $0xc0] sm:$0xff] %vm8242_vm14, %v3505_v7  ;;  %v3821_v56 = vadd.f32 %v3799_v49, %v3789_v0  ;;  %v3614_v4 = vadd.f32 %v7599_v46, %v3582_v48  ;;  %v2709_v7 = vld [vmem:[#allocation3 + $0xb0] sm:$0xff]  ;;  %5331 = vrsqrt.f32 %v4036_v24  ;;  %vm8252_vm15 = vmmov %vm8249_vm1 }
 0x75e   : > { %v3700_v63 = vsel %vm8243_vm4, %v3692_v22, 0.0  ;;  %v7638_v22 = vld [vmem:[%s7178_s30 + $0xa8] sm:$0xff]  ;;  %5333 = vrsqrt.f32 %v4052_v32  ;;  %vm8253_vm14 = vmmov %vm8249_vm1  ;;  %v4741_v32 = vld [vmem:[%s7178_s30 + $0xb0] sm:$0xff] }
 0x75f   : > { %v3771_v42 = vpop.permute.xlu0 %3770  ;;  %vm8256_vm4 = vmmov %vm8249_vm1 }
 0x760   : > { %v3671_v28 = vpop.permute.xlu1 %3670  ;;  %v3791_v46 = vadd.f32 %v3771_v42, %v7453_v55  ;;  %v3583_v55 = vadd.f32 %v7576_v54, %v7324_v47  ;;  %v4055_v54 = vmax.f32 %v7570_v29, 1e-16  ;;  %v5328_v29 = vpop.eup %5327 }
 0x761   : > { %v3693_v44 = vmul.f32 %v3671_v28, %v3613_v57  ;;  %v5050_v15 = vpop.f32.mrb[30].mxu0 }
 0x762   : > { %v2756_v39 = vsel %vm2748_vm13, %v5050_v15, %v2708_v20  ;;  %v2650_v9 = vpop.f32.mrb[31].mxu0  ;;  %vm8254_vm13 = vmmov %vm8249_vm1 }
 0x763   : > { %v3701_v26 = vsel %vm8244_vm9, %v3693_v44, 0.0  ;;  %2764 = vst.msk [vmem:[#allocation3 + $0xa8] sm:$0xff] %vm8245_vm7, %v2756_v39  ;;  %v2755_v50 = vsel %vm2747_vm12, %v2650_v9, %v2707_v27  ;;  %v3877_v19 = vpop.permute.xlu0 %3876  ;;  %vm8255_vm12 = vmmov %vm8249_vm1 }
 0x764   : > { %v3702_v57 = vadd.f32 %v3701_v26, %v3700_v63  ;;  %2763 = vst.msk [vmem:[#allocation3 + $0xa0] sm:$0xff] %vm8246_vm3, %v2755_v50  ;;  %v3900_v34 = vmul.f32 %v3877_v19, %v3820_v61  ;;  %v3801_v0 = vpop.permute.xlu1 %3800  ;;  %v4039_v26 = vmax.f32 %v7568_v52, 1e-16  ;;  %v3615_v50 = vadd.f32 %v7606_v62, %v3583_v55  ;;  %vm8257_vm9 = vmmov %vm8249_vm1 }
 0x765   : > { %v3822_v23 = vadd.f32 %v3801_v0, %v3790_v14  ;;  %v7659_v14 = vld [vmem:[%s7178_s30 + $0xa0] sm:$0xff]  ;;  %v4038_v0 = vmax.f32 %v7583_v40, 1e-16  ;;  %v4054_v62 = vmax.f32 %v7585_v41, 1e-16  ;;  %vm8258_vm7 = vmmov %vm8249_vm1 }
 0x766   : > { %v3908_v20 = vsel %vm8247_vm2, %v3900_v34, 0.0  ;;  %v7677_v34 = vld [vmem:[%s7178_s30 + $0xb8] sm:$0xff]  ;;  %5335 = vrsqrt.f32 %v4039_v26  ;;  %v4041_v41 = vmax.f32 %v7638_v22, 1e-16  ;;  %vm8259_vm3 = vmmov %vm8249_vm1  ;;  %vm3499_vm2 = vcmp.eq.s32.totalorder %v7469_v45, 1 }
 0x767   : > { %v3673_v59 = vpop.permute.xlu0 %3672  ;;  %5337 = vrsqrt.f32 %v4055_v54  ;;  %v7771_v45 = vld [vmem:[%s7178_s30 + $0xd8] sm:$0xff] }
 0x768   : > { %v3694_v2 = vmul.f32 %v3673_v59, %v3614_v4  ;;  %v3879_v51 = vpop.permute.xlu1 %3878  ;;  %5339 = vrsqrt.f32 %v4038_v0 }
 0x769   : > { %v3901_v61 = vmul.f32 %v3879_v51, %v3821_v56  ;;  %v5053_v49 = vpop.f32.mrb[32].mxu0  ;;  %5341 = vrsqrt.f32 %v4054_v62 }
 0x76a   : > { %v3703_v60 = vsel %vm8248_vm11, %v3694_v2, 0.0  ;;  %v2758_v17 = vsel %vm2750_vm6, %v5053_v49, %v2710_v33  ;;  %v2660_v28 = vpop.f32.mrb[33].mxu0  ;;  %v7645_v27 = vld [vmem:[#allocation3 + $0xa8] sm:$0xff]  ;;  %v5330_v33 = vpop.eup %5329  ;;  %5343 = vrsqrt.f32 %v4041_v41  ;;  %vm8260_vm6 = vmmov %vm8249_vm1 }
 0x76b   : > { %v3704_v44 = vadd.f32 %v3703_v60, %v3702_v57  ;;  %v3909_v15 = vsel %vm8249_vm1, %v3901_v61, 0.0  ;;  %2766 = vst.msk [vmem:[#allocation3 + $0xb8] sm:$0xff] %vm8250_vm10, %v2758_v17  ;;  %v2757_v3 = vsel %vm2749_vm0, %v2660_v28, %v2709_v7  ;;  %v3803_v35 = vpop.permute.xlu0 %3802  ;;  %v7651_v56 = vmul.f32 %v7638_v22, %v7645_v27  ;;  %v7661_v63 = vld [vmem:[#allocation3 + $0xa0] sm:$0xff]  ;;  %vm8261_vm11 = vmmov %vm8251_vm5 }
 0x76c   : > { %v3910_v42 = vadd.f32 %v3909_v15, %v3908_v20  ;;  %2765 = vst.msk [vmem:[#allocation3 + $0xb0] sm:$0xff] %vm8251_vm5, %v2757_v3  ;;  %v3823_v39 = vadd.f32 %v3803_v35, %v3791_v46  ;;  %v7656_v9 = vpop.permute.xlu1 %3772  ;;  %v7674_v5 = vmul.f32 %v7659_v14, %v7661_v63  ;;  %v4057_v49 = vmax.f32 %v7645_v27, 1e-16  ;;  %v5332_v46 = vpop.eup %5331  ;;  %vm8262_vm1 = vmmov %vm8251_vm5 }
 0x76d   : > { %4014 = vrot.lane.b32.xlu1 %v7651_v56, %s5436_s26  ;;  %3982 = vrot.lane.b32.xlu0 %v7651_v56, %s5435_s25  ;;  %v7668_v47 = vpop.f32.mrb[34].mxu0  ;;  %v4069_v60 = vmul.f32 %v5330_v33, %v5328_v29  ;;  %v5334_v28 = vpop.eup %5333  ;;  %v4040_v22 = vmax.f32 %v7659_v14, 1e-16  ;;  %v4056_v27 = vmax.f32 %v7661_v63, 1e-16  ;;  %vm3500_vm0 = vcmp.eq.s32.totalorder %v7484_v10, 1 }
 0x76e   : > { %v5086_v19 = vpop.f32.mrb[35].mxu0  ;;  %5345 = vrsqrt.f32 %v4057_v49  ;;  %v4068_v54 = vmul.f32 %v5334_v28, %v5332_v46  ;;  %v4704_v29 = vld [vmem:[%s6554_s20 + $0xc] sm:$0xf]  ;;  %vm3502_vm10 = vcmp.eq.s32.totalorder %v7505_v21, 1  ;;  %vm3501_vm5 = vcmp.eq.s32.totalorder %v7495_v11, 1 }
 0x76f   : > { %v3675_v48 = vpop.permute.xlu0 %3674  ;;  %v3792_v19 = vadd.f32 %v7656_v9, %v7477_v1  ;;  %5347 = vrsqrt.f32 %v4040_v22 }
 0x770   : > { %v3695_v52 = vmul.f32 %v3675_v48, %v3615_v50  ;;  %v3881_v57 = vpop.permute.xlu1 %3880  ;;  %v5336_v55 = vpop.eup %5335  ;;  %v4042_v48 = vmax.f32 %v4741_v32, 1e-16  ;;  %5349 = vrsqrt.f32 %v4056_v27 }
 0x771   : > { %v3902_v16 = vmul.f32 %v3881_v57, %v3822_v23  ;;  %4012 = vrot.lane.b32.xlu1 %v7674_v5, %s5436_s26  ;;  %3980 = vrot.lane.b32.xlu0 %v7674_v5, %s5435_s25  ;;  %v5338_v50 = vpop.eup %5337 }
 0x772   : > { %v3705_v4 = vsel %vm8252_vm15, %v3695_v52, 0.0  ;;  %v7686_v59 = vld [vmem:[#allocation3 + $0xb8] sm:$0xff]  ;;  %v5340_v52 = vpop.eup %5339  ;;  %5351 = vrsqrt.f32 %v4042_v48  ;;  %vm8263_vm15 = vmmov %vm8262_vm1 }
 0x773   : > { %v3706_v24 = vadd.f32 %v3705_v4, %v3704_v44  ;;  %v3911_v40 = vsel %vm8253_vm14, %v3902_v16, 0.0  ;;  %v3805_v2 = vpop.permute.xlu0 %3804  ;;  %v7691_v23 = vmul.f32 %v7677_v34, %v7686_v59  ;;  %v3954_v61 = vld [vmem:[#allocation3 + $0xb0] sm:$0xff]  ;;  %v4071_v16 = vmul.f32 %v5338_v50, %v5336_v55  ;;  %v5342_v62 = vpop.eup %5341  ;;  %vm8264_vm14 = vmmov %vm8262_vm1 }
 0x774   : > { %v3912_v51 = vadd.f32 %v3911_v40, %v3910_v42  ;;  %v3775_v7 = vpop.permute.xlu1 %3774  ;;  %v7700_v17 = vmul.f32 %v4741_v32, %v3954_v61  ;;  %v4058_v63 = vmax.f32 %v3954_v61, 1e-16  ;;  %v3824_v57 = vadd.f32 %v3805_v2, %v3792_v19  ;;  %v5344_v40 = vpop.eup %5343 }
 0x775   : > { %4018 = vrot.lane.b32.xlu1 %v7691_v23, %s5436_s26  ;;  %3986 = vrot.lane.b32.xlu0 %v7691_v23, %s5435_s25  ;;  %v3089_v2 = vmax.f32 %v7668_v47, 1e-16  ;;  %v4070_v41 = vmul.f32 %v5342_v62, %v5340_v52 }
 0x776   : > { %5353 = vrsqrt.f32 %v4058_v63 }
 0x777   : > { %v3677_v20 = vpop.permute.xlu0 %3676 }
 0x778   : > { %v3696_v44 = vmul.f32 %v3677_v20, %v7603_v53  ;;  %v3883_v15 = vpop.permute.xlu1 %3882  ;;  %v5346_v49 = vpop.eup %5345  ;;  %v3793_v20 = vadd.f32 %v3775_v7, %v7493_v31 }
 0x779   : > { %v3903_v3 = vmul.f32 %v3883_v15, %v3823_v39  ;;  %4086 = vrot.lane.b32.xlu1 %v4069_v60, %s5437_s9  ;;  %3984 = vrot.lane.b32.xlu0 %v7700_v17, %s5435_s25  ;;  %v5348_v60 = vpop.eup %5347  ;;  %v4073_v15 = vmul.f32 %v5346_v49, %v5344_v40 }
 0x77a   : > { %v3707_v35 = vsel %vm8254_vm13, %v3696_v44, 0.0  ;;  %v5350_v22 = vpop.eup %5349  ;;  %vm3503_vm13 = vcmp.eq.s32.totalorder %v7513_v36, 1 }
 0x77b   : > { %v3708_v42 = vadd.f32 %v3707_v35, %v3706_v24  ;;  %v3913_v26 = vsel %vm8255_vm12, %v3903_v3, 0.0  ;;  %v3807_v53 = vpop.permute.xlu0 %3806  ;;  %v3087_v24 = vmax.f32 %v4704_v29, 1e-16  ;;  %v4072_v50 = vmul.f32 %v5350_v22, %v5348_v60  ;;  %vm8265_vm12 = vmmov %vm8262_vm1 }
 0x77c   : > { %v3914_v14 = vadd.f32 %v3913_v26, %v3912_v51  ;;  %v3777_v39 = vpop.permute.xlu1 %3776  ;;  %v3825_v28 = vadd.f32 %v3807_v53, %v3793_v20  ;;  %v5352_v7 = vpop.eup %5351  ;;  %v3459_v20 = vld [vmem:[#allocation3 + $0xd0] sm:$0xff] }
 0x77d   : > { %4016 = vrot.lane.b32.xlu1 %v7700_v17, %s5436_s26  ;;  %4084 = vrot.lane.b32.xlu0 %v4068_v54, %s5437_s9  ;;  %5355 = vrsqrt.f32 %v3087_v24  ;;  %v3794_v3 = vadd.f32 %v3777_v39, %v7507_v8  ;;  %v3079_v8 = vmul.f32 %v4704_v29, %v7668_v47 }
 0x77e   : > { %5357 = vrsqrt.f32 %v3089_v2 }
 0x77f   : > { %v3679_v0 = vpop.permute.xlu0 %3678 }
 0x780   : > { %v3697_v4 = vmul.f32 %v3679_v0, %v7611_v12  ;;  %v3885_v33 = vpop.permute.xlu1 %3884 }
 0x781   : > { %v3904_v1 = vmul.f32 %v3885_v33, %v3824_v57  ;;  %4090 = vrot.lane.b32.xlu0 %v4071_v16, %s5437_s9  ;;  %v3081_v16 = vrot.slane %v3079_v8, 1  ;;  %v7742_v33 = vld [vmem:[#allocation3 + $0xc8] sm:$0xff] }
 0x782   : > { %v3709_v9 = vsel %vm8256_vm4, %v3697_v4, 0.0  ;;  %v7740_v4 = vld [vmem:[%s7178_s30 + $0xc8] sm:$0xff]  ;;  %vm8266_vm4 = vmmov %vm8262_vm1 }
 0x783   : > { %v3710_v51 = vadd.f32 %v3709_v9, %v3708_v42  ;;  %v3915_v32 = vsel %vm8257_vm9, %v3904_v1, 0.0  ;;  %v3809_v61 = vpop.permute.xlu0 %3808  ;;  %v7749_v24 = vmul.f32 %v7740_v4, %v7742_v33  ;;  %v3083_v40 = vadd.f32 %v3081_v16, %v3079_v8  ;;  %vm8267_vm9 = vmmov %vm8259_vm3 }
 0x784   : > { %v3916_v46 = vadd.f32 %v3915_v32, %v3914_v14  ;;  %v7721_v12 = vpop.permute.xlu1 %3778  ;;  %v3826_v42 = vadd.f32 %v3809_v61, %v3794_v3  ;;  %v5354_v14 = vpop.eup %5353  ;;  %v4743_v61 = vld [vmem:[%s7178_s30 + $0xc0] sm:$0xff] }
 0x785   : > { %4088 = vrot.lane.b32.xlu0 %v4070_v41, %s5437_s9  ;;  %v4074_v57 = vmul.f32 %v5354_v14, %v5352_v7  ;;  %v4156_v41 = vld [vmem:[#allocation3 + $0xc0] sm:$0xff] }
 0x786   : > { %v7758_v60 = vmul.f32 %v4743_v61, %v4156_v41  ;;  %v4260_v11 = vmax.f32 %v4156_v41, 1e-16 }
 0x787   : > { %v3681_v44 = vpop.permute.xlu0 %3680  ;;  %v5356_v0 = vpop.eup %5355 }
 0x788   : > { %v3698_v27 = vmul.f32 %v3681_v44, %v7608_v37  ;;  %v3887_v35 = vpop.permute.xlu1 %3886  ;;  %v5358_v47 = vpop.eup %5357 }
 0x789   : > { %v3905_v55 = vmul.f32 %v3887_v35, %v3825_v28  ;;  %4094 = vrot.lane.b32.xlu0 %v4073_v15, %s5437_s9  ;;  %v3091_v49 = vmul.f32 %v5358_v47, %v5356_v0  ;;  %v3835_v0 = vmax.f32 %v7516_v38, 1e-16  ;;  %v7803_v38 = vld [vmem:[%s7178_s30 + $0xe0] sm:$0xff] }
 0x78a   : > { %v3711_v31 = vsel %vm8258_vm7, %v3698_v27, 0.0  ;;  %vm8268_vm7 = vmmov %vm8259_vm3 }
 0x78b   : > { %v7729_v26 = vadd.f32 %v3711_v31, %v3710_v51  ;;  %v3917_v53 = vsel %vm8259_vm3, %v3905_v55, 0.0  ;;  %v3889_v54 = vpop.permute.xlu0 %3888  ;;  %v3084_v51 = vrot.slane %v3079_v8, 2  ;;  %v3093_v22 = vrot.slane %v3091_v49, 3  ;;  %v3461_v31 = vld [vmem:[#allocation3 + $0xe0] sm:$0xff] }
 0x78c   : > { %v3918_v39 = vadd.f32 %v3917_v53, %v3916_v46  ;;  %v3906_v37 = vmul.f32 %v3889_v54, %v3826_v42  ;;  %v7733_v19 = vpop.permute.xlu1 %3810 }
 0x78d   : > { %4092 = vrot.lane.b32.xlu0 %v4072_v50, %s5437_s9  ;;  %v3086_v15 = vadd.f32 %v3084_v51, %v3083_v40  ;;  %v4750_v51 = vld [vmem:[%s7178_s30 + $0xf8] sm:$0xff] }
 0x78e   : > { %v3919_v48 = vsel %vm8260_vm6, %v3906_v37, 0.0  ;;  %v3464_v37 = vld [vmem:[#allocation3 + $0xf8] sm:$0xff]  ;;  %v4251_v41 = vmax.f32 %v4750_v51, 1e-16  ;;  %vm8269_vm6 = vmmov %vm8259_vm3 }
 0x78f   : > { %v7737_v63 = vadd.f32 %v3919_v48, %v3918_v39  ;;  %v3975_v52 = vpop.permute.xlu0 %3974  ;;  %v3095_v10 = vmul.f32 %v3093_v22, %v3086_v15  ;;  %v4244_v39 = vmax.f32 %v4743_v61, 1e-16  ;;  %v3463_v48 = vld [vmem:[#allocation3 + $0xf0] sm:$0xff] }
 0x790   : > { %v3973_v62 = vpop.permute.xlu1 %3972  ;;  %v3997_v29 = vadd.f32 %v3975_v52, %v7553_v6  ;;  %v3460_v6 = vld [vmem:[#allocation3 + $0xd8] sm:$0xff]  ;;  %v7786_v52 = vld [vmem:[%s7178_s30 + $0xe8] sm:$0xff] }
 0x791   : > { %4096 = vrot.lane.b32.xlu0 %v4074_v57, %s5437_s9  ;;  %v3996_v1 = vadd.f32 %v3973_v62, %v7557_v25  ;;  %v3098_v50 = vsel %vm836_vm8, %v3095_v10, 0.0  ;;  %vm3504_vm8 = vcmp.eq.s32.totalorder %v7530_v58, 1  ;;  %5359 = vrsqrt.f32 %v4244_v39 }
 0x792   : > { %5361 = vrsqrt.f32 %v4260_v11 }
 0x793   : > { %v4007_v9 = vpop.permute.xlu0 %4006  ;;  %5363 = vrsqrt.f32 %v3835_v0  ;;  %v4249_v0 = vmax.f32 %v7786_v52, 1e-16 }
 0x794   : > { %v7751_v32 = vadd.f32 %v4007_v9, %v3997_v29  ;;  %v4005_v2 = vpop.permute.xlu1 %4004  ;;  %v3851_v29 = vmax.f32 %v7518_v18, 1e-16  ;;  %v4749_v9 = vld [vmem:[%s7178_s30 + $0xf0] sm:$0xff] }
 0x795   : > { %v7754_v46 = vadd.f32 %v4005_v2, %v3996_v1  ;;  %4182 = vrot.lane.b32.xlu0 %v7749_v24, %s5435_s25  ;;  %v4250_v40 = vmax.f32 %v4749_v9, 1e-16 }
 0x796   : > { %5365 = vrsqrt.f32 %v3851_v29 }
 0x797   : > { %v3979_v25 = vpop.permute.xlu0 %3978  ;;  %5367 = vrsqrt.f32 %v4250_v40  ;;  %v5404_v40 = vld [vmem:[#allocation3 + $0x38] sm:$0xff] }
 0x798   : > { %v5104_v28 = vpop.f32.mrb[30].mxu1  ;;  %v3999_v44 = vadd.f32 %v3979_v25, %v7580_v43  ;;  %v4011_v27 = vpop.permute.xlu1 %4010  ;;  %v3462_v43 = vld [vmem:[#allocation3 + $0xe8] sm:$0xff] }
 0x799   : > { %v3508_v3 = vsel %vm3500_vm0, %v5104_v28, %v3460_v6  ;;  %v3394_v35 = vpop.f32.mrb[31].mxu1  ;;  %4212 = vrot.lane.b32.xlu0 %v7758_v60, %s5436_s26  ;;  %vm8270_vm0 = vmmov %vm8259_vm3 }
 0x79a   : > { %3516 = vst.msk [vmem:[#allocation3 + $0xd8] sm:$0xff] %vm8261_vm11, %v3508_v3  ;;  %v7766_v55 = vadd.f32 %v4011_v27, %v3999_v44  ;;  %v3507_v42 = vsel %vm3499_vm2, %v3394_v35, %v3459_v20  ;;  %v4745_v44 = vld [vmem:[%s7178_s30 + $0xd0] sm:$0xff]  ;;  %vm8271_vm2 = vmmov %vm8270_vm0 }
 0x79b   : > { %3515 = vst.msk [vmem:[#allocation3 + $0xd0] sm:$0xff] %vm8262_vm1, %v3507_v42  ;;  %v5360_v49 = vpop.eup %5359  ;;  %v4246_v11 = vmax.f32 %v4745_v44, 1e-16  ;;  %vm8272_vm11 = vmmov %vm8270_vm0 }
 0x79c   : > { %v5362_v28 = vpop.eup %5361  ;;  %vm8274_vm1 = vmmov %vm8270_vm0 }
 0x79d   : > { %v5364_v22 = vpop.eup %5363  ;;  %v4276_v3 = vmul.f32 %v5362_v28, %v5360_v49  ;;  %v4009_v49 = vpop.permute.xlu1 %4008 }
 0x79f   : > { %v5107_v7 = vpop.f32.mrb[32].mxu1 }
 0x7a0   : > { %v3510_v53 = vsel %vm3502_vm10, %v5107_v7, %v3462_v43  ;;  %v3404_v54 = vpop.f32.mrb[33].mxu1  ;;  %v5366_v27 = vpop.eup %5365  ;;  %vm8275_vm10 = vmmov %vm8270_vm0 }
 0x7a1   : > { %3518 = vst.msk [vmem:[#allocation3 + $0xe8] sm:$0xff] %vm8263_vm15, %v3510_v53  ;;  %v3509_v14 = vsel %vm3501_vm5, %v3404_v54, %v3461_v31  ;;  %3099 = vadd.xlane.f32.xlu1 %v3098_v50  ;;  %v7776_v8 = vld [vmem:[#allocation3 + $0xd8] sm:$0xff]  ;;  %v3867_v42 = vmul.f32 %v5366_v27, %v5364_v22  ;;  %v5368_v10 = vpop.eup %5367  ;;  %v4245_v31 = vmax.f32 %v7740_v4, 1e-16  ;;  %v4261_v53 = vmax.f32 %v7742_v33, 1e-16  ;;  %vm8276_vm5 = vmmov %vm8270_vm0 }
 0x7a2   : > { %3517 = vst.msk [vmem:[#allocation3 + $0xe0] sm:$0xff] %vm8264_vm14, %v3509_v14  ;;  %v7781_v21 = vmul.f32 %v7771_v45, %v7776_v8  ;;  %v4158_v15 = vld [vmem:[#allocation3 + $0xd0] sm:$0xff]  ;;  %v4247_v4 = vmax.f32 %v7771_v45, 1e-16  ;;  %v4263_v39 = vmax.f32 %v7776_v8, 1e-16  ;;  %vm8277_vm15 = vmmov %vm8270_vm0 }
 0x7a3   : > { %v7827_v35 = vmul.f32 %v4745_v44, %v4158_v15  ;;  %vm8278_vm14 = vmmov %vm8270_vm0 }
 0x7a4   : > { %4186 = vrot.lane.b32.xlu0 %v7781_v21, %s5435_s25 }
 0x7a7   : > { %v5110_v57 = vpop.f32.mrb[34].mxu1 }
 0x7a8   : > { %v3512_v16 = vsel %vm3504_vm8, %v5110_v57, %v3464_v37  ;;  %4218 = vrot.lane.b32.xlu0 %v7781_v21, %s5436_s26  ;;  %v3414_v62 = vpop.f32.mrb[35].mxu1  ;;  %v7793_v47 = vld [vmem:[#allocation3 + $0xe8] sm:$0xff]  ;;  %v4262_v37 = vmax.f32 %v4158_v15, 1e-16  ;;  %vm8279_vm8 = vmmov %vm8270_vm0 }
 0x7a9   : > { %3520 = vst.msk [vmem:[#allocation3 + $0xf8] sm:$0xff] %vm8265_vm12, %v3512_v16  ;;  %v3511_v58 = vsel %vm3503_vm13, %v3414_v62, %v3463_v48  ;;  %v7799_v36 = vmul.f32 %v7786_v52, %v7793_v47  ;;  %v7805_v1 = vld [vmem:[#allocation3 + $0xe0] sm:$0xff]  ;;  %v4265_v45 = vmax.f32 %v7793_v47, 1e-16  ;;  %v4248_v16 = vmax.f32 %v7803_v38, 1e-16  ;;  %vm8280_vm13 = vmmov %vm8270_vm0 }
 0x7aa   : > { %3519 = vst.msk [vmem:[#allocation3 + $0xf0] sm:$0xff] %vm8266_vm4, %v3511_v58  ;;  %v7812_v18 = vmul.f32 %v7803_v38, %v7805_v1  ;;  %v4264_v62 = vmax.f32 %v7805_v1, 1e-16  ;;  %v3643_v47 = vmax.f32 %v5404_v40, 1e-16  ;;  %vm8281_vm12 = vmmov %vm8270_vm0 }
 0x7ab   : > { %v4043_v38 = vmax.f32 %v7677_v34, 1e-16  ;;  %v4059_v1 = vmax.f32 %v7686_v59, 1e-16  ;;  %vm8282_vm4 = vmmov %vm8270_vm0 }
 0x7ac   : > { %4222 = vrot.lane.b32.xlu0 %v7799_v36, %s5436_s26 }
 0x7b0   : > { %4220 = vrot.lane.b32.xlu0 %v7812_v18, %s5436_s26  ;;  %v4163_v2 = vld [vmem:[#allocation3 + $0xf8] sm:$0xff] }
 0x7b1   : > { %v4162_v61 = vld [vmem:[#allocation3 + $0xf0] sm:$0xff]  ;;  %v4267_v20 = vmax.f32 %v4163_v2, 1e-16  ;;  %v7844_v33 = vmul.f32 %v4750_v51, %v4163_v2 }
 0x7b2   : > { %4214 = vrot.lane.b32.xlu1 %v7749_v24, %s5436_s26  ;;  %v7819_v6 = vmul.f32 %v4749_v9, %v4162_v61  ;;  %v4266_v25 = vmax.f32 %v4162_v61, 1e-16  ;;  %v5403_v9 = vld [vmem:[%s7178_s30 + $0x38] sm:$0xff] }
 0x7b3   : > { %v3627_v52 = vmax.f32 %v5403_v9, 1e-16 }
 0x7b4   : > { %5369 = vrsqrt.f32 %v4266_v25  ;;  %4224 = vrot.lane.b32.xlu0 %v7819_v6, %s5436_s26 }
 0x7b5   : > { %5371 = vrsqrt.f32 %v4251_v41  ;;  %v3977_v41 = vpop.permute.xlu0 %3976 }
 0x7b6   : > { %4180 = vrot.lane.b32.xlu1 %v7758_v60, %s5435_s25  ;;  %5373 = vrsqrt.f32 %v4267_v20 }
 0x7b7   : > { %5375 = vrsqrt.f32 %v4245_v31 }
 0x7b8   : > { %4292 = vrot.lane.b32.xlu0 %v4276_v3, %s5437_s9  ;;  %5377 = vrsqrt.f32 %v4261_v53 }
 0x7b9   : > { %5379 = vrsqrt.f32 %v4247_v4 }
 0x7ba   : > { %4184 = vrot.lane.b32.xlu1 %v7827_v35, %s5435_s25  ;;  %5381 = vrsqrt.f32 %v4263_v39 }
 0x7bb   : > { %5383 = vrsqrt.f32 %v4246_v11 }
 0x7bc   : > { %3890 = vrot.lane.b32.xlu0 %v3867_v42, %s5437_s9  ;;  %5385 = vrsqrt.f32 %v4262_v37 }
 0x7bd   : > { %5387 = vrsqrt.f32 %v4249_v0 }
 0x7be   : > { %v5370_v43 = vpop.eup %5369  ;;  %4216 = vrot.lane.b32.xlu1 %v7827_v35, %s5436_s26  ;;  %5389 = vrsqrt.f32 %v4265_v45 }
 0x7bf   : > { %v5372_v7 = vpop.eup %5371  ;;  %v4282_v54 = vmul.f32 %v5370_v43, %v5368_v10  ;;  %5391 = vrsqrt.f32 %v4248_v16 }
 0x7c0   : > { %v5374_v50 = vpop.eup %5373  ;;  %5393 = vrsqrt.f32 %v4264_v62 }
 0x7c1   : > { %4304 = vrot.lane.b32.xlu0 %v4282_v54, %s5437_s9  ;;  %v4283_v14 = vmul.f32 %v5374_v50, %v5372_v7  ;;  %v5376_v48 = vpop.eup %5375  ;;  %5395 = vrsqrt.f32 %v3627_v52 }
 0x7c2   : > { %4190 = vrot.lane.b32.xlu1 %v7799_v36, %s5435_s25  ;;  %v5378_v57 = vpop.eup %5377  ;;  %5397 = vrsqrt.f32 %v3643_v47 }
 0x7c3   : > { %v4277_v8 = vmul.f32 %v5378_v57, %v5376_v48  ;;  %v5380_v29 = vpop.eup %5379  ;;  %5399 = vrsqrt.f32 %v4043_v38 }
 0x7c4   : > { %v5382_v58 = vpop.eup %5381  ;;  %5401 = vrsqrt.f32 %v4059_v1 }
 0x7c5   : > { %4306 = vrot.lane.b32.xlu0 %v4283_v14, %s5437_s9  ;;  %v5384_v51 = vpop.eup %5383  ;;  %v4279_v2 = vmul.f32 %v5382_v58, %v5380_v29  ;;  %v3998_v29 = vadd.f32 %v3977_v41, %v7593_v30 }
 0x7c6   : > { %4188 = vrot.lane.b32.xlu1 %v7812_v18, %s5435_s25  ;;  %v5386_v61 = vpop.eup %5385 }
 0x7c7   : > { %v5388_v25 = vpop.eup %5387  ;;  %v4278_v20 = vmul.f32 %v5386_v61, %v5384_v51 }
 0x7c8   : > { %v5390_v28 = vpop.eup %5389 }
 0x7c9   : > { %v5392_v22 = vpop.eup %5391  ;;  %v4281_v34 = vmul.f32 %v5390_v28, %v5388_v25 }
 0x7ca   : > { %4194 = vrot.lane.b32.xlu1 %v7844_v33, %s5435_s25  ;;  %v5394_v27 = vpop.eup %5393 }
 0x7cb   : > { %v5396_v43 = vpop.eup %5395  ;;  %v4280_v7 = vmul.f32 %v5394_v27, %v5392_v22 }
 0x7cc   : > { %v5398_v53 = vpop.eup %5397 }
 0x7cd   : > { %v5400_v4 = vpop.eup %5399  ;;  %v3659_v39 = vmul.f32 %v5398_v53, %v5396_v43 }
 0x7ce   : > { %4226 = vrot.lane.b32.xlu1 %v7844_v33, %s5436_s26  ;;  %v5402_v11 = vpop.eup %5401 }
 0x7cf   : > { %v4075_v0 = vmul.f32 %v5402_v11, %v5400_v4 }
 0x7d2   : > { %4294 = vrot.lane.b32.xlu1 %v4277_v8, %s5437_s9 }
 0x7d6   : > { %4192 = vrot.lane.b32.xlu1 %v7819_v6, %s5435_s25 }
 0x7da   : > { %4298 = vrot.lane.b32.xlu1 %v4279_v2, %s5437_s9 }
 0x7de   : > { %4296 = vrot.lane.b32.xlu1 %v4278_v20, %s5437_s9 }
 0x7df   : > { %v3983_v44 = vpop.permute.xlu0 %3982  ;;  %v4015_v15 = vpop.permute.xlu1 %4014 }
 0x7e0   : > { %v4001_v3 = vadd.f32 %v3983_v44, %v7651_v56 }
 0x7e2   : > { %v4033_v42 = vadd.f32 %v4015_v15, %v4001_v3  ;;  %4302 = vrot.lane.b32.xlu1 %v4281_v34, %s5437_s9 }
 0x7e3   : > { %v3981_v59 = vpop.permute.xlu0 %3980  ;;  %v4013_v10 = vpop.permute.xlu1 %4012 }
 0x7e4   : > { %v4000_v31 = vadd.f32 %v3981_v59, %v7674_v5 }
 0x7e6   : > { %v4032_v54 = vadd.f32 %v4013_v10, %v4000_v31  ;;  %4300 = vrot.lane.b32.xlu1 %v4280_v7, %s5437_s9 }
 0x7e7   : > { %v3987_v50 = vpop.permute.xlu0 %3986  ;;  %v4019_v14 = vpop.permute.xlu1 %4018 }
 0x7e8   : > { %v4003_v56 = vadd.f32 %v3987_v50, %v7691_v23  ;;  %v8273_v50 = vld [vmem:[#allocation68_spill] sm:$0xff] }
 0x7ea   : > { %v7867_v37 = vadd.f32 %v4019_v14, %v4003_v56  ;;  %3682 = vrot.lane.b32.xlu1 %v3659_v39, %s5437_s9  ;;  %v3795_v14 = vadd.f32 %v7721_v12, %v8273_v50 }
 0x7eb   : > { %v3985_v48 = vpop.permute.xlu0 %3984  ;;  %v4087_v57 = vpop.permute.xlu1 %4086 }
 0x7ec   : > { %v4002_v5 = vadd.f32 %v3985_v48, %v7700_v17  ;;  %v4109_v45 = vmul.f32 %v4087_v57, %v7751_v32  ;;  %v4030_v17 = vadd.f32 %v4009_v49, %v3998_v29  ;;  %v3827_v4 = vadd.f32 %v7733_v19, %v3795_v14 }
 0x7ee   : > { %4098 = vrot.lane.b32.xlu1 %v4075_v0, %s5437_s9  ;;  %v4117_v58 = vsel %vm8267_vm9, %v4109_v45, 0.0  ;;  %vm8283_vm9 = vmmov %vm8270_vm0 }
 0x7ef   : > { %v4085_v8 = vpop.permute.xlu0 %4084  ;;  %v4017_v16 = vpop.permute.xlu1 %4016 }
 0x7f0   : > { %v4108_v62 = vmul.f32 %v4085_v8, %v7754_v46  ;;  %v4034_v23 = vadd.f32 %v4017_v16, %v4002_v5 }
 0x7f2   : > { %v4116_v9 = vsel %vm8268_vm7, %v4108_v62, 0.0  ;;  %vm8284_vm7 = vmmov %vm8270_vm0 }
 0x7f3   : > { %v4118_v52 = vadd.f32 %v4117_v58, %v4116_v9  ;;  %v4091_v40 = vpop.permute.xlu0 %4090 }
 0x7f4   : > { %v4111_v47 = vmul.f32 %v4091_v40, %v7766_v55 }
 0x7f6   : > { %v4121_v46 = vsel %vm8269_vm6, %v4111_v47, 0.0 }
 0x7f7   : > { %v4089_v51 = vpop.permute.xlu0 %4088 }
 0x7f8   : > { %v4110_v32 = vmul.f32 %v4089_v51, %v4030_v17 }
 0x7fa   : > { %v4119_v2 = vsel %vm8259_vm3, %v4110_v32, 0.0 }
 0x7fb   : > { %v4120_v61 = vadd.f32 %v4119_v2, %v4118_v52  ;;  %v4095_v38 = vpop.permute.xlu0 %4094 }
 0x7fc   : > { %v4113_v1 = vmul.f32 %v4095_v38, %v4033_v42 }
 0x7fd   : > { %v4122_v25 = vadd.f32 %v4121_v46, %v4120_v61 }
 0x7fe   : > { %v4125_v15 = vsel %vm8271_vm2, %v4113_v1, 0.0 }
 0x7ff   : > { %v4093_v30 = vpop.permute.xlu0 %4092 }
 0x800   : > { %v4112_v41 = vmul.f32 %v4093_v30, %v4032_v54 }
 0x802   : > { %v4123_v20 = vsel %vm8270_vm0, %v4112_v41, 0.0 }
 0x803   : > { %v4124_v28 = vadd.f32 %v4123_v20, %v4122_v25  ;;  %v4097_v44 = vpop.permute.xlu0 %4096 }
 0x804   : > { %v4114_v55 = vmul.f32 %v4097_v44, %v4034_v23 }
 0x805   : > { %v4126_v49 = vadd.f32 %v4125_v15, %v4124_v28 }
 0x806   : > { %v4127_v22 = vsel %vm8272_vm11, %v4114_v55, 0.0 }
 0x807   : > { %v7883_v3 = vadd.f32 %v4127_v22, %v4126_v49  ;;  %v4183_v34 = vpop.permute.xlu0 %4182 }
 0x808   : > { %v4205_v17 = vadd.f32 %v4183_v34, %v7749_v24 }
 0x80b   : > { %v4213_v27 = vpop.permute.xlu0 %4212 }
 0x816   : > { %v4187_v59 = vpop.permute.xlu0 %4186 }
 0x817   : > { %v4207_v42 = vadd.f32 %v4187_v59, %v7781_v21 }
 0x81a   : > { %v4219_v10 = vpop.permute.xlu0 %4218 }
 0x81b   : > { %v4239_v43 = vadd.f32 %v4219_v10, %v4207_v42 }
 0x81e   : > { %v4223_v31 = vpop.permute.xlu0 %4222 }
 0x822   : > { %v4221_v7 = vpop.permute.xlu0 %4220 }
 0x826   : > { %v4225_v53 = vpop.permute.xlu0 %4224 }
 0x82a   : > { %v4293_v54 = vpop.permute.xlu0 %4292 }
 0x82e   : > { %v3891_v56 = vpop.permute.xlu0 %3890  ;;  %v3100_v39 = vpop.xlane.xlu1 %3099 }
 0x82f   : > { %v3907_v11 = vmul.f32 %v3891_v56, %v3827_v4  ;;  %v3101_v48 = vrot.slane %v3100_v39, 4 }
 0x831   : > { %v3921_v57 = vsel %vm8274_vm1, %v3907_v11, 0.0  ;;  %v3102_v0 = vadd.f32 %v3101_v48, %v3100_v39  ;;  %v3097_v48 = vld [vmem:[#allocation4 + $0x3] sm:$0x1] }
 0x832   : > { %v3922_v21 = vadd.f32 %v3921_v57, %v7737_v63  ;;  %v4215_v5 = vpop.permute.xlu1 %4214 }
 0x833   : > { %v3103_v45 = vrot.slane %v3102_v0, 2  ;;  %v4237_v63 = vadd.f32 %v4215_v5, %v4205_v17  ;;  %v4305_v10 = vpop.permute.xlu0 %4304 }
 0x834   : > { %3923 = vadd.xlane.f32.xlu0 %v3922_v21 }
 0x835   : > { %v3104_v8 = vadd.f32 %v3103_v45, %v3102_v0 }
 0x836   : > { %v4181_v16 = vpop.permute.xlu1 %4180 }
 0x837   : > { %v3105_v62 = vrot.slane %v3104_v8, 1  ;;  %v4204_v9 = vadd.f32 %v4181_v16, %v7758_v60 }
 0x839   : > { %v3106_v23 = vadd.f32 %v3105_v62, %v3104_v8  ;;  %v4236_v40 = vadd.f32 %v4213_v27, %v4204_v9 }
 0x83a   : > { %v4185_v29 = vpop.permute.xlu1 %4184 }
 0x83b   : > { %5214 = vpush %v3106_v23  ;;  %v4316_v51 = vmul.f32 %v4293_v54, %v4236_v40  ;;  %v4206_v30 = vadd.f32 %v4185_v29, %v7827_v35 }
 0x83d   : > { %v4324_v61 = vsel %vm8275_vm10, %v4316_v51, 0.0 }
 0x83e   : > { %v4217_v12 = vpop.permute.xlu1 %4216 }
 0x83f   : > { %v4238_v41 = vadd.f32 %v4217_v12, %v4206_v30 }
 0x842   : > { %v4191_v19 = vpop.permute.xlu1 %4190 }
 0x843   : > { %v4209_v44 = vadd.f32 %v4191_v19, %v7799_v36 }
 0x845   : > { %v4241_v42 = vadd.f32 %v4223_v31, %v4209_v44 }
 0x846   : > { %v4189_v58 = vpop.permute.xlu1 %4188 }
 0x847   : > { %v4208_v24 = vadd.f32 %v4189_v58, %v7812_v18 }
 0x849   : > { %v4240_v35 = vadd.f32 %v4221_v7, %v4208_v24 }
 0x84a   : > { %v4195_v52 = vpop.permute.xlu1 %4194 }
 0x84e   : > { %v4227_v47 = vpop.permute.xlu1 %4226 }
 0x852   : > { %v4295_v32 = vpop.permute.xlu1 %4294 }
 0x853   : > { %v4317_v2 = vmul.f32 %v4295_v32, %v4237_v63 }
 0x855   : > { %v4325_v38 = vsel %vm8276_vm5, %v4317_v2, 0.0 }
 0x856   : > { %v4326_v46 = vadd.f32 %v4325_v38, %v4324_v61  ;;  %v4193_v1 = vpop.permute.xlu1 %4192 }
 0x857   : > { %v4210_v15 = vadd.f32 %v4193_v1, %v7819_v6 }
 0x859   : > { %v4242_v59 = vadd.f32 %v4225_v53, %v4210_v15  ;;  %v4307_v53 = vpop.permute.xlu0 %4306 }
 0x85a   : > { %v4299_v25 = vpop.permute.xlu1 %4298 }
 0x85b   : > { %v4319_v20 = vmul.f32 %v4299_v25, %v4239_v43  ;;  %v4211_v43 = vadd.f32 %v4195_v52, %v7844_v33  ;;  %v4322_v18 = vmul.f32 %v4305_v10, %v4242_v59  ;;  %v4141_v59 = vld [vmem:[#allocation4 + $0x2] sm:$0x1] }
 0x85d   : > { %v4329_v34 = vsel %vm8278_vm14, %v4319_v20, 0.0  ;;  %v4243_v14 = vadd.f32 %v4227_v47, %v4211_v43  ;;  %v4335_v57 = vsel %vm8281_vm12, %v4322_v18, 0.0 }
 0x85e   : > { %v4297_v60 = vpop.permute.xlu1 %4296 }
 0x85f   : > { %v4318_v28 = vmul.f32 %v4297_v60, %v4238_v41  ;;  %v4323_v7 = vmul.f32 %v4307_v53, %v4243_v14 }
 0x861   : > { %v4327_v55 = vsel %vm8277_vm15, %v4318_v28, 0.0 }
 0x862   : > { %v4328_v49 = vadd.f32 %v4327_v55, %v4326_v46  ;;  %v4303_v22 = vpop.permute.xlu1 %4302  ;;  %v3725_v55 = vld [vmem:[#allocation4] sm:$0x1] }
 0x863   : > { %v4321_v50 = vmul.f32 %v4303_v22, %v4241_v42  ;;  %v3726_v22 = vmul.f32 0.020833334, %v3725_v55 }
 0x864   : > { %v4330_v27 = vadd.f32 %v4329_v34, %v4328_v49  ;;  %v3933_v49 = vld [vmem:[#allocation4 + $0x1] sm:$0x1] }
 0x865   : > { %v4333_v39 = vsel %vm8280_vm13, %v4321_v50, 0.0  ;;  %v4142_v50 = vmul.f32 0.020833334, %v4141_v59 }
 0x866   : > { %v4301_v54 = vpop.permute.xlu1 %4300 }
 0x867   : > { %v4320_v36 = vmul.f32 %v4301_v54, %v4240_v35 }
 0x869   : > { %v4331_v6 = vsel %vm8279_vm8, %v4320_v36, 0.0 }
 0x86a   : > { %v4332_v4 = vadd.f32 %v4331_v6, %v4330_v27  ;;  %v3683_v56 = vpop.permute.xlu1 %3682  ;;  %v3934_v27 = vmul.f32 0.020833334, %v3933_v49 }
 0x86b   : > { %v3699_v11 = vmul.f32 %v3683_v56, %v7614_v13  ;;  %v4337_v13 = vsel %vm8283_vm9, %v4323_v7, 0.0 }
 0x86c   : > { %v4334_v31 = vadd.f32 %v4333_v39, %v4332_v4  ;;  %s5215_s10 = spop %5214 }
 0x86d   : > { %v3713_v33 = vsel %vm8282_vm4, %v3699_v11, 0.0  ;;  %v3108_v0 = vstv %s5215_s10 }
 0x86e   : > { %v3714_v21 = vadd.f32 %v3713_v33, %v7729_v26  ;;  %v3109_v5 = vadd.f32 %v3108_v0, %v3097_v48  ;;  %v4099_v45 = vpop.permute.xlu1 %4098  ;;  %v4336_v8 = vadd.f32 %v4335_v57, %v4334_v31 }
 0x86f   : > { %v4115_v16 = vmul.f32 %v4099_v45, %v7867_v37 }
 0x870   : > { %3110 = vst [vmem:[#allocation4 + $0x3] sm:$0x1] %v3109_v5  ;;  %3715 = vadd.xlane.f32.xlu1 %v3714_v21  ;;  %v4338_v29 = vadd.f32 %v4337_v13, %v4336_v8 }
 0x871   : > { %v4129_v62 = vsel %vm8284_vm7, %v4115_v16, 0.0 }
 0x872   : > { %v4130_v23 = vadd.f32 %v4129_v62, %v7883_v3 }
 0x874   : > { %4339 = vadd.xlane.f32.xlu1 %v4338_v29  ;;  %4131 = vadd.xlane.f32.xlu0 %v4130_v23 }
 0x877   : > { %v4349_v10 = vld [vmem:[#allocation4 + $0x3] sm:$0x1] }
 0x878   : > { %v4350_v18 = vmul.f32 0.020833334, %v4349_v10 }
 0x8c1   : > { %v3924_v12 = vpop.xlane.xlu0 %3923 }
 0x8c2   : > { %v3925_v19 = vrot.slane %v3924_v12, 4 }
 0x8c4   : > { %v3926_v58 = vadd.f32 %v3925_v19, %v3924_v12 }
 0x8c6   : > { %v3927_v26 = vrot.slane %v3926_v58, 2 }
 0x8c8   : > { %v3928_v17 = vadd.f32 %v3927_v26, %v3926_v58 }
 0x8ca   : > { %v3929_v3 = vrot.slane %v3928_v17, 1 }
 0x8cc   : > { %v3930_v20 = vadd.f32 %v3929_v3, %v3928_v17 }
 0x8fd   : > { %v3716_v9 = vpop.xlane.xlu1 %3715 }
 0x8fe   : > { %v3717_v52 = vrot.slane %v3716_v9, 4 }
 0x900   : > { %v3718_v40 = vadd.f32 %v3717_v52, %v3716_v9 }
 0x901   : > { %v4132_v47 = vpop.xlane.xlu0 %4131  ;;  %v4340_v37 = vpop.xlane.xlu1 %4339 }
 0x902   : > { %v3719_v63 = vrot.slane %v3718_v40, 2  ;;  %v4133_v51 = vrot.slane %v4132_v47, 4  ;;  %v4341_v32 = vrot.slane %v4340_v37, 4 }
 0x904   : > { %v4134_v2 = vadd.f32 %v4133_v51, %v4132_v47  ;;  %v4342_v61 = vadd.f32 %v4341_v32, %v4340_v37  ;;  %v3720_v38 = vadd.f32 %v3719_v63, %v3718_v40 }
 0x906   : > { %v4135_v46 = vrot.slane %v4134_v2, 2  ;;  %v4343_v1 = vrot.slane %v4342_v61, 2  ;;  %v3721_v25 = vrot.slane %v3720_v38, 1 }
 0x908   : > { %v4136_v30 = vadd.f32 %v4135_v46, %v4134_v2  ;;  %v4344_v41 = vadd.f32 %v4343_v1, %v4342_v61  ;;  %v3722_v60 = vadd.f32 %v3721_v25, %v3720_v38 }
 0x90a   : > { %5216 = vpush %v3722_v60  ;;  %v4137_v28 = vrot.slane %v4136_v30, 1  ;;  %v4345_v44 = vrot.slane %v4344_v41, 1 }
 0x90b   : > { %5218 = vpush %v3930_v20 }
 0x90c   : > { %v4138_v24 = vadd.f32 %v4137_v28, %v4136_v30  ;;  %v4346_v15 = vadd.f32 %v4345_v44, %v4344_v41 }
 0x90e   : > { %5220 = vpush %v4138_v24 }
 0x90f   : > { %5222 = vpush %v4346_v15 }
 0x93b   : > { %s5217_s12 = spop %5216 }
 0x93c   : > { %s3724_s13 = smul.f32 0.015625, %s5217_s12  ;;  %s5219_s14 = spop %5218 }
 0x93d   : > { %s3932_s15 = smul.f32 0.015625, %s5219_s14 }
 0x93e   : > { %v3727_v34 = vstv %s3724_s13 }
 0x93f   : > { %v3728_v42 = vadd.f32 %v3727_v34, %v3726_v22  ;;  %v3935_v35 = vstv %s3932_s15  ;;  %s5221_s19 = spop %5220 }
 0x940   : > { %v3936_v54 = vadd.f32 %v3935_v35, %v3934_v27  ;;  %s4140_s20 = smul.f32 0.015625, %s5221_s19  ;;  %s5223_s21 = spop %5222 }
 0x941   : > { %v3729_v43 = vsub.f32 0.0, %v3728_v42  ;;  %s4348_s27 = smul.f32 0.015625, %s5223_s21 }
 0x942   : > { %v3937_v36 = vsub.f32 0.0, %v3936_v54  ;;  %v4143_v14 = vstv %s4140_s20 }
 0x943   : > { %3730 = vst [vmem:[%s420_s18] sm:$0x1] %v3729_v43  ;;  %v4144_v6 = vadd.f32 %v4143_v14, %v4142_v50  ;;  %v4351_v4 = vstv %s4348_s27 }
 0x944   : > { %3938 = vst [vmem:[%s420_s18 + $0x1] sm:$0x1] %v3937_v36  ;;  %v4352_v56 = vadd.f32 %v4351_v4, %v4350_v18 }
 0x945   : > { %v4145_v39 = vsub.f32 0.0, %v4144_v6 }
 0x946   : > { %v4353_v11 = vsub.f32 0.0, %v4352_v56 }
 0x947   : > { %4146 = vst [vmem:[%s420_s18 + $0x2] sm:$0x1] %v4145_v39 }
 0x948   : > { %4354 = vst [vmem:[%s420_s18 + $0x3] sm:$0x1] %v4353_v11 }
 0x949 PF: > { %s16_s23 = sadd.s32 1, %s5427_s23   ;;  %s8285_s21 = smov %s5423_s22 }
 0x94a   : > { %p13_p6 = scmp.ge.s32.totalorder %s16_s23, 4   ;;  %s8286_s22 = smov %s8288_s24 }
 0x94c   :  { %15 = sbr.rel (!%p13_p6) target bundleno = 2 (0x2), region = 124 }

</bundles_post_ra>
